<compile_context>
chip_gen: v7x
topology: tpu7x:2x2x1
jax: 0.10.0
libtpu: 0.0.40
codegen_flags: <defaults>
</compile_context>

<pallas_src>
import jax
import jax.numpy as jnp
from jax.experimental import pallas as pl
from jax.experimental.pallas import tpu as pltpu

BN_EPS = 1e-5                      # PyTorch BatchNorm2d default
LEAKY_SLOPE = 0.2
TARGET_A_BYTES = 4 << 20           # ~4 MiB A tiles amortize per-step overhead


def _round_up(x, m):
    return ((x + m - 1) // m) * m


def _physical_vmem_bytes():
    try:
        info = pltpu.get_tpu_info()
        for attr in ("vmem_capacity_bytes", "vmem_bytes", "vmem_size_bytes"):
            v = getattr(info, attr, None)
            if v:
                return int(v)
    except Exception:
        pass
    return 64 << 20                # conservative fallback: v7x physical VMEM


_PHYS_VMEM = _physical_vmem_bytes()
# ~48 MiB on v7x (64 MiB physical), ~96 MiB on v5e / v6e (128 MiB physical).
VMEM_LIMIT = (3 * _PHYS_VMEM) // 4


def _choose_tm(M, K, Coutp, out_bytes):
    """Adaptive M tile: as large as VMEM / the ~4 MiB A-tile target allow,
    split so the tiles cover M with minimal padding."""
    budget = int(VMEM_LIMIT * 0.6)                     # headroom for scratch/spills
    per_row = 2 * (K * 2 + Coutp * out_bytes)          # dbl-buffered A(bf16) + y row
    fixed = 2 * (K * Coutp * 2) + 32 * Coutp * 4       # dbl-buffered W + stat partials
    tm_cap = max(256, (budget - fixed) // per_row)
    tm_cap = min(tm_cap, max(256, TARGET_A_BYTES // (2 * K)))
    if tm_cap >= M:
        return max(8, _round_up(M, 8))                 # whole layer in one grid step
    nt = -(-M // tm_cap)                               # number of tiles at the cap
    return max(256, _round_up(-(-M // nt), 256))       # even, MXU-aligned split


# ---------------------------------------------------------------------------
# Pallas kernels
# ---------------------------------------------------------------------------
def _matmul_leaky_kernel(a_ref, w_ref, o_ref):
    # Conv (as matmul) + LeakyReLU(0.2).  bf16 operands, f32 accumulate.
    y = jnp.dot(a_ref[...], w_ref[...], preferred_element_type=jnp.float32)
    o_ref[...] = jnp.where(y > 0, y, LEAKY_SLOPE * y).astype(o_ref.dtype)


def _matmul_sigmoid_kernel(a_ref, w_ref, o_ref):
    # Final conv (as matmul) + sigmoid.
    y = jnp.dot(a_ref[...], w_ref[...], preferred_element_type=jnp.float32)
    o_ref[...] = jax.nn.sigmoid(y).astype(o_ref.dtype)


def _matmul_stats_kernel(a_ref, w_ref, y_ref, sum_ref, ssq_ref):
    # Tiled matmul + per-tile partial BN statistics.  Every grid step writes
    # its own (8, Coutp) partial block -> no cross-step carry, so the M axis
    # is "parallel" and shards across both TensorCores on v7x.  The 8-row
    # broadcast keeps the output block (8, 128)-aligned (no masked stores).
    y = jnp.dot(a_ref[...], w_ref[...], preferred_element_type=jnp.float32)
    y_ref[...] = y.astype(y_ref.dtype)
    s = jnp.sum(y, axis=0, keepdims=True)
    ss = jnp.sum(y * y, axis=0, keepdims=True)
    sum_ref[...] = jnp.broadcast_to(s, sum_ref.shape)
    ssq_ref[...] = jnp.broadcast_to(ss, ssq_ref.shape)


# ---------------------------------------------------------------------------
# pallas_call wrappers (adaptive M tiles, lane-dense Cout)
# ---------------------------------------------------------------------------
def _pad_rows(A, tm):
    M = A.shape[0]
    Mp = _round_up(M, tm)
    if Mp != M:
        A = jnp.pad(A, ((0, Mp - M), (0, 0)))
    return A, Mp


def _matmul_act(A, Wmat, kernel, out_dtype):
    """Tiled (matmul + elementwise activation); M axis fully parallel."""
    M, K = A.shape
    Coutp = Wmat.shape[1]
    tm = _choose_tm(M, K, Coutp, jnp.dtype(out_dtype).itemsize)
    A, Mp = _pad_rows(A, tm)
    out = pl.pallas_call(
        kernel,
        out_shape=jax.ShapeDtypeStruct((Mp, Coutp), out_dtype),
        grid=(Mp // tm,),
        in_specs=[
            pl.BlockSpec((tm, K), lambda i: (i, 0)),
            pl.BlockSpec((K, Coutp), lambda i: (0, 0)),   # grid-invariant weight
        ],
        out_specs=pl.BlockSpec((tm, Coutp), lambda i: (i, 0)),
        compiler_params=pltpu.CompilerParams(
            dimension_semantics=("parallel",),
            vmem_limit_bytes=VMEM_LIMIT,
        ),
    )(A, Wmat)
    return out[:M]


def _matmul_bn_stats(A, Wmat):
    """Tiled matmul + per-tile partial per-channel sum / sumsq outputs.

    Partials are reduced in the wrapper (tiny) so the grid axis stays
    "parallel" (megacore-friendly on v7x) with no accumulator race."""
    M, K = A.shape
    Coutp = Wmat.shape[1]
    tm = _choose_tm(M, K, Coutp, 2)
    A, Mp = _pad_rows(A, tm)
    nt = Mp // tm
    y, ps, pss = pl.pallas_call(
        _matmul_stats_kernel,
        out_shape=(
            jax.ShapeDtypeStruct((Mp, Coutp), jnp.bfloat16),
            jax.ShapeDtypeStruct((nt * 8, Coutp), jnp.float32),
            jax.ShapeDtypeStruct((nt * 8, Coutp), jnp.float32),
        ),
        grid=(nt,),
        in_specs=[
            pl.BlockSpec((tm, K), lambda i: (i, 0)),
            pl.BlockSpec((K, Coutp), lambda i: (0, 0)),
        ],
        out_specs=(
            pl.BlockSpec((tm, Coutp), lambda i: (i, 0)),
            pl.BlockSpec((8, Coutp), lambda i: (i, 0)),   # per-tile partial sums
            pl.BlockSpec((8, Coutp), lambda i: (i, 0)),   # per-tile partial sumsqs
        ),
        compiler_params=pltpu.CompilerParams(
            dimension_semantics=("parallel",),
            vmem_limit_bytes=VMEM_LIMIT,
        ),
    )(A, Wmat)
    # Rows within each 8-row partial block are identical copies; take one per
    # tile and reduce across tiles (negligible XLA work).
    s = jnp.sum(ps[::8], axis=0)
    ss = jnp.sum(pss[::8], axis=0)
    return y, s, ss


# ---------------------------------------------------------------------------
# JAX glue: Conv2d -> im2col operands (standard strided conv)
# ---------------------------------------------------------------------------
def _im2col_conv(x_nhwc, kH, kW, stride, padding):
    # Cast to bf16 BEFORE building patches so the 4x-amplified A matrix and
    # all slice/stack intermediates are written once in bf16, not f32.
    x_nhwc = x_nhwc.astype(jnp.bfloat16)
    N, H, W, Cin = x_nhwc.shape
    Ho = (H + 2 * padding - kH) // stride + 1
    Wo = (W + 2 * padding - kW) // stride + 1
    xp = jnp.pad(x_nhwc, ((0, 0), (padding, padding), (padding, padding), (0, 0)))
    patches = []
    for di in range(kH):
        for dj in range(kW):
            patches.append(
                xp[:, di:di + stride * (Ho - 1) + 1:stride,
                      dj:dj + stride * (Wo - 1) + 1:stride, :]
            )
    A = jnp.stack(patches, axis=3)                    # (N, Ho, Wo, kH*kW, Cin)
    A = A.reshape(N * Ho * Wo, kH * kW * Cin)
    return A, (N, Ho, Wo)


def _prep_weight(w):
    """PyTorch Conv2d weight (Cout, Cin, kH, kW) -> bf16 (kH*kW*Cin, Coutp)."""
    Cout, Cin, kH, kW = w.shape
    Wmat = jnp.transpose(w, (2, 3, 1, 0)).reshape(kH * kW * Cin, Cout)
    Coutp = _round_up(Cout, 128)                      # lane-dense output columns
    Wmat = jnp.pad(Wmat, ((0, 0), (0, Coutp - Cout))).astype(jnp.bfloat16)
    return Wmat, Cout, Coutp


# ---------------------------------------------------------------------------
# Layers
# ---------------------------------------------------------------------------
def _conv_leaky(x_nhwc, w, stride, padding):
    A, (N, Ho, Wo) = _im2col_conv(x_nhwc, 4, 4, stride, padding)
    Wmat, Cout, _ = _prep_weight(w)
    y = _matmul_act(A, Wmat, _matmul_leaky_kernel, jnp.bfloat16)
    return y[:, :Cout].reshape(N, Ho, Wo, Cout)


def _conv_sigmoid(x_nhwc, w, stride, padding):
    A, (N, Ho, Wo) = _im2col_conv(x_nhwc, 4, 4, stride, padding)
    Wmat, Cout, _ = _prep_weight(w)
    y = _matmul_act(A, Wmat, _matmul_sigmoid_kernel, jnp.float32)
    return y[:, :Cout].reshape(N, Ho, Wo, Cout)


def _conv_bn_leaky(x_nhwc, w, gamma, beta, stride, padding):
    A, (N, Ho, Wo) = _im2col_conv(x_nhwc, 4, 4, stride, padding)
    M = A.shape[0]
    Wmat, Cout, _ = _prep_weight(w)

    y, s, ss = _matmul_bn_stats(A, Wmat)

    # Batch statistics (training-mode BatchNorm2d, biased variance).  Padded
    # rows/channels contributed zeros, so dividing by the real M is exact.
    # NOTE: single-pass var = E[y^2]-E[y]^2 in f32 can lose precision for very
    # large M (documented; acceptable alongside bf16 matmul operands).
    mean = s[:Cout] / M
    var = jnp.maximum(ss[:Cout] / M - mean * mean, 0.0)
    scale = gamma * jax.lax.rsqrt(var + BN_EPS)
    shift = beta - mean * scale

    # BN affine + LeakyReLU applied here in f32; XLA fuses it (with the row /
    # channel slices) into the next layer's im2col A construction, so y is
    # read from HBM once and no separate BN-apply pass is needed.
    z = y[:M, :Cout].astype(jnp.float32) * scale + shift
    act = jnp.where(z > 0, z, LEAKY_SLOPE * z).astype(jnp.bfloat16)
    return act.reshape(N, Ho, Wo, Cout)


# ---------------------------------------------------------------------------
# Discriminator
# ---------------------------------------------------------------------------
def init_discriminator_params(key, nc, ndf):
    ks = jax.random.split(key, 5)

    def conv_w(k, cout, cin):     # DCGAN init: N(0, 0.02); PyTorch layout (Cout,Cin,kH,kW)
        return (0.02 * jax.random.normal(k, (cout, cin, 4, 4))).astype(jnp.float32)

    chans = [nc, ndf, ndf * 2, ndf * 4, ndf * 8, 1]
    params = {}
    for i in range(5):
        params[f"w{i+1}"] = conv_w(ks[i], chans[i + 1], chans[i])
    for i in (2, 3, 4):           # BN affine params (layers 2-4)
        params[f"g{i}"] = jnp.ones((chans[i],), jnp.float32)
        params[f"b{i}"] = jnp.zeros((chans[i],), jnp.float32)
    return params


@jax.jit
def discriminator_forward(params, x_nchw):
    # NCHW (PyTorch) -> NHWC internal layout
    x = jnp.transpose(x_nchw, (0, 2, 3, 1))
    x = _conv_leaky(x, params["w1"], stride=2, padding=1)
    x = _conv_bn_leaky(x, params["w2"], params["g2"], params["b2"], stride=2, padding=1)
    x = _conv_bn_leaky(x, params["w3"], params["g3"], params["b3"], stride=2, padding=1)
    x = _conv_bn_leaky(x, params["w4"], params["g4"], params["b4"], stride=2, padding=1)
    x = _conv_sigmoid(x, params["w5"], stride=1, padding=0)
    return jnp.transpose(x, (0, 3, 1, 2))  # back to NCHW


if __name__ == "__main__":
    # Small but shape-consistent DCGAN config: nc=3, ndf=8, batch=2, 64x64 input.
    nc, ndf, batch = 3, 8, 2
    key = jax.random.PRNGKey(0)
    pkey, xkey = jax.random.split(key)
    params = init_discriminator_params(pkey, nc, ndf)
    x = jax.random.normal(xkey, (batch, nc, 64, 64), dtype=jnp.float32)

    out = discriminator_forward(params, x)
    out = jax.block_until_ready(out)

    assert out.shape == (batch, 1, 1, 1), out.shape
    assert bool(jnp.isfinite(out).all())
    assert bool(((out >= 0.0) & (out <= 1.0)).all())
    print("KERNEL_OK")
</pallas_src>

<mosaic_0001>
module attributes {stable_mosaic.version = 11 : i64} {
  func.func @_matmul_leaky_kernel(%arg0: i32, %arg1: memref<2048x48xbf16, #tpu.memory_space<vmem>>, %arg2: memref<48x128xbf16, #tpu.memory_space<vmem>>, %arg3: memref<2048x128xbf16, #tpu.memory_space<vmem>>) attributes {dimension_semantics = [#tpu.dimension_semantics<parallel>], iteration_bounds = array<i64: 1>, scalar_prefetch = 0 : i64, scratch_operands = 0 : i64, tpu.core_type = #tpu.core_type<tc>, window_params = [{transform_indices = @transform_0, window_bounds = array<i64: 2048, 48>}, {pipeline_mode = #tpu.pipeline_mode<synchronous>, transform_indices = @transform_1, window_bounds = array<i64: 48, 128>}, {transform_indices = @transform_2, window_bounds = array<i64: 2048, 128>}]} {
    %c0 = arith.constant 0 : index
    %c0_0 = arith.constant 0 : index
    %0 = vector.load %arg1[%c0, %c0_0] : memref<2048x48xbf16, #tpu.memory_space<vmem>>, vector<2048x48xbf16>
    %c0_1 = arith.constant 0 : index
    %c0_2 = arith.constant 0 : index
    %1 = vector.load %arg2[%c0_1, %c0_2] : memref<48x128xbf16, #tpu.memory_space<vmem>>, vector<48x128xbf16>
    %cst = arith.constant dense<0.000000e+00> : vector<2048x128xf32>
    %2 = tpu.matmul %0, %1, %cst {dimension_numbers = #tpu.dot_dimension_numbers<[1], [0], [0], [1], [0, 0, 1, 1], [], []>} : vector<2048x48xbf16>, vector<48x128xbf16>, vector<2048x128xf32> -> vector<2048x128xf32>
    %cst_3 = arith.constant 0.000000e+00 : f32
    %3 = vector.broadcast %cst_3 : f32 to vector<2048x128xf32>
    %4 = arith.cmpf ogt, %2, %3 : vector<2048x128xf32>
    %cst_4 = arith.constant 2.000000e-01 : f32
    %5 = vector.broadcast %cst_4 : f32 to vector<2048x128xf32>
    %6 = arith.mulf %5, %2 : vector<2048x128xf32>
    %7 = arith.select %4, %2, %6 : vector<2048x128xi1>, vector<2048x128xf32>
    %8 = arith.truncf %7 : vector<2048x128xf32> to vector<2048x128xbf16>
    %c0_5 = arith.constant 0 : index
    %c0_6 = arith.constant 0 : index
    %9 = vector.load %arg3[%c0_5, %c0_6] : memref<2048x128xbf16, #tpu.memory_space<vmem>>, vector<2048x128xbf16>
    tpu.vector_store %arg3[%c0_5, %c0_6], %8 {strides = array<i32>} : memref<2048x128xbf16, #tpu.memory_space<vmem>>, vector<2048x128xbf16>,
    return
  }
  func.func @transform_0(%arg0: i32) -> (i32, i32) {
    %c0_i32 = arith.constant 0 : i32
    %c0_i32_0 = arith.constant 0 : i32
    return %arg0, %c0_i32 : i32, i32
  }
  func.func @transform_1(%arg0: i32) -> (i32, i32) {
    %c0_i32 = arith.constant 0 : i32
    %c0_i32_0 = arith.constant 0 : i32
    %c0_i32_1 = arith.constant 0 : i32
    return %c0_i32, %c0_i32_0 : i32, i32
  }
  func.func @transform_2(%arg0: i32) -> (i32, i32) {
    %c0_i32 = arith.constant 0 : i32
    %c0_i32_0 = arith.constant 0 : i32
    return %arg0, %c0_i32 : i32, i32
  }
}

module attributes {stable_mosaic.version = 11 : i64} {
  func.func @_matmul_stats_kernel(%arg0: i32, %arg1: memref<512x128xbf16, #tpu.memory_space<vmem>>, %arg2: memref<128x128xbf16, #tpu.memory_space<vmem>>, %arg3: memref<512x128xbf16, #tpu.memory_space<vmem>>, %arg4: memref<8x128xf32, #tpu.memory_space<vmem>>, %arg5: memref<8x128xf32, #tpu.memory_space<vmem>>) attributes {dimension_semantics = [#tpu.dimension_semantics<parallel>], iteration_bounds = array<i64: 1>, scalar_prefetch = 0 : i64, scratch_operands = 0 : i64, tpu.core_type = #tpu.core_type<tc>, window_params = [{transform_indices = @transform_0, window_bounds = array<i64: 512, 128>}, {pipeline_mode = #tpu.pipeline_mode<synchronous>, transform_indices = @transform_1, window_bounds = array<i64: 128, 128>}, {transform_indices = @transform_2, window_bounds = array<i64: 512, 128>}, {transform_indices = @transform_3, window_bounds = array<i64: 8, 128>}, {transform_indices = @transform_4, window_bounds = array<i64: 8, 128>}]} {
    %c0 = arith.constant 0 : index
    %c0_0 = arith.constant 0 : index
    %0 = vector.load %arg1[%c0, %c0_0] : memref<512x128xbf16, #tpu.memory_space<vmem>>, vector<512x128xbf16>
    %c0_1 = arith.constant 0 : index
    %c0_2 = arith.constant 0 : index
    %1 = vector.load %arg2[%c0_1, %c0_2] : memref<128x128xbf16, #tpu.memory_space<vmem>>, vector<128x128xbf16>
    %cst = arith.constant dense<0.000000e+00> : vector<512x128xf32>
    %2 = tpu.matmul %0, %1, %cst {dimension_numbers = #tpu.dot_dimension_numbers<[1], [0], [0], [1], [0, 0, 1, 1], [], []>} : vector<512x128xbf16>, vector<128x128xbf16>, vector<512x128xf32> -> vector<512x128xf32>
    %3 = arith.truncf %2 : vector<512x128xf32> to vector<512x128xbf16>
    %c0_3 = arith.constant 0 : index
    %c0_4 = arith.constant 0 : index
    %4 = vector.load %arg3[%c0_3, %c0_4] : memref<512x128xbf16, #tpu.memory_space<vmem>>, vector<512x128xbf16>
    tpu.vector_store %arg3[%c0_3, %c0_4], %3 {strides = array<i32>} : memref<512x128xbf16, #tpu.memory_space<vmem>>, vector<512x128xbf16>,
    %cst_5 = arith.constant dense<0.000000e+00> : vector<128xf32>
    %5 = vector.multi_reduction <add>, %2, %cst_5 [0] : vector<512x128xf32> to vector<128xf32>
    %6 = vector.shape_cast %5 : vector<128xf32> to vector<1x128xf32>
    %7 = arith.mulf %2, %2 : vector<512x128xf32>
    %cst_6 = arith.constant dense<0.000000e+00> : vector<128xf32>
    %8 = vector.multi_reduction <add>, %7, %cst_6 [0] : vector<512x128xf32> to vector<128xf32>
    %9 = vector.shape_cast %8 : vector<128xf32> to vector<1x128xf32>
    %10 = vector.shape_cast %6 : vector<1x128xf32> to vector<1x128xf32>
    %11 = vector.broadcast %10 : vector<1x128xf32> to vector<8x128xf32>
    %c0_7 = arith.constant 0 : index
    %c0_8 = arith.constant 0 : index
    %12 = vector.load %arg4[%c0_7, %c0_8] : memref<8x128xf32, #tpu.memory_space<vmem>>, vector<8x128xf32>
    tpu.vector_store %arg4[%c0_7, %c0_8], %11 {strides = array<i32>} : memref<8x128xf32, #tpu.memory_space<vmem>>, vector<8x128xf32>,
    %13 = vector.shape_cast %9 : vector<1x128xf32> to vector<1x128xf32>
    %14 = vector.broadcast %13 : vector<1x128xf32> to vector<8x128xf32>
    %c0_9 = arith.constant 0 : index
    %c0_10 = arith.constant 0 : index
    %15 = vector.load %arg5[%c0_9, %c0_10] : memref<8x128xf32, #tpu.memory_space<vmem>>, vector<8x128xf32>
    tpu.vector_store %arg5[%c0_9, %c0_10], %14 {strides = array<i32>} : memref<8x128xf32, #tpu.memory_space<vmem>>, vector<8x128xf32>,
    return
  }
  func.func @transform_0(%arg0: i32) -> (i32, i32) {
    %c0_i32 = arith.constant 0 : i32
    %c0_i32_0 = arith.constant 0 : i32
    return %arg0, %c0_i32 : i32, i32
  }
  func.func @transform_1(%arg0: i32) -> (i32, i32) {
    %c0_i32 = arith.constant 0 : i32
    %c0_i32_0 = arith.constant 0 : i32
    %c0_i32_1 = arith.constant 0 : i32
    return %c0_i32, %c0_i32_0 : i32, i32
  }
  func.func @transform_2(%arg0: i32) -> (i32, i32) {
    %c0_i32 = arith.constant 0 : i32
    %c0_i32_0 = arith.constant 0 : i32
    return %arg0, %c0_i32 : i32, i32
  }
  func.func @transform_3(%arg0: i32) -> (i32, i32) {
    %c0_i32 = arith.constant 0 : i32
    %c0_i32_0 = arith.constant 0 : i32
    return %arg0, %c0_i32 : i32, i32
  }
  func.func @transform_4(%arg0: i32) -> (i32, i32) {
    %c0_i32 = arith.constant 0 : i32
    %c0_i32_0 = arith.constant 0 : i32
    return %arg0, %c0_i32 : i32, i32
  }
}

module attributes {stable_mosaic.version = 11 : i64} {
  func.func @_matmul_stats_kernel(%arg0: i32, %arg1: memref<128x256xbf16, #tpu.memory_space<vmem>>, %arg2: memref<256x128xbf16, #tpu.memory_space<vmem>>, %arg3: memref<128x128xbf16, #tpu.memory_space<vmem>>, %arg4: memref<8x128xf32, #tpu.memory_space<vmem>>, %arg5: memref<8x128xf32, #tpu.memory_space<vmem>>) attributes {dimension_semantics = [#tpu.dimension_semantics<parallel>], iteration_bounds = array<i64: 1>, scalar_prefetch = 0 : i64, scratch_operands = 0 : i64, tpu.core_type = #tpu.core_type<tc>, window_params = [{transform_indices = @transform_0, window_bounds = array<i64: 128, 256>}, {pipeline_mode = #tpu.pipeline_mode<synchronous>, transform_indices = @transform_1, window_bounds = array<i64: 256, 128>}, {transform_indices = @transform_2, window_bounds = array<i64: 128, 128>}, {transform_indices = @transform_3, window_bounds = array<i64: 8, 128>}, {transform_indices = @transform_4, window_bounds = array<i64: 8, 128>}]} {
    %c0 = arith.constant 0 : index
    %c0_0 = arith.constant 0 : index
    %0 = vector.load %arg1[%c0, %c0_0] : memref<128x256xbf16, #tpu.memory_space<vmem>>, vector<128x256xbf16>
    %c0_1 = arith.constant 0 : index
    %c0_2 = arith.constant 0 : index
    %1 = vector.load %arg2[%c0_1, %c0_2] : memref<256x128xbf16, #tpu.memory_space<vmem>>, vector<256x128xbf16>
    %cst = arith.constant dense<0.000000e+00> : vector<128x128xf32>
    %2 = tpu.matmul %0, %1, %cst {dimension_numbers = #tpu.dot_dimension_numbers<[1], [0], [0], [1], [0, 0, 1, 1], [], []>} : vector<128x256xbf16>, vector<256x128xbf16>, vector<128x128xf32> -> vector<128x128xf32>
    %3 = arith.truncf %2 : vector<128x128xf32> to vector<128x128xbf16>
    %c0_3 = arith.constant 0 : index
    %c0_4 = arith.constant 0 : index
    %4 = vector.load %arg3[%c0_3, %c0_4] : memref<128x128xbf16, #tpu.memory_space<vmem>>, vector<128x128xbf16>
    tpu.vector_store %arg3[%c0_3, %c0_4], %3 {strides = array<i32>} : memref<128x128xbf16, #tpu.memory_space<vmem>>, vector<128x128xbf16>,
    %cst_5 = arith.constant dense<0.000000e+00> : vector<128xf32>
    %5 = vector.multi_reduction <add>, %2, %cst_5 [0] : vector<128x128xf32> to vector<128xf32>
    %6 = vector.shape_cast %5 : vector<128xf32> to vector<1x128xf32>
    %7 = arith.mulf %2, %2 : vector<128x128xf32>
    %cst_6 = arith.constant dense<0.000000e+00> : vector<128xf32>
    %8 = vector.multi_reduction <add>, %7, %cst_6 [0] : vector<128x128xf32> to vector<128xf32>
    %9 = vector.shape_cast %8 : vector<128xf32> to vector<1x128xf32>
    %10 = vector.shape_cast %6 : vector<1x128xf32> to vector<1x128xf32>
    %11 = vector.broadcast %10 : vector<1x128xf32> to vector<8x128xf32>
    %c0_7 = arith.constant 0 : index
    %c0_8 = arith.constant 0 : index
    %12 = vector.load %arg4[%c0_7, %c0_8] : memref<8x128xf32, #tpu.memory_space<vmem>>, vector<8x128xf32>
    tpu.vector_store %arg4[%c0_7, %c0_8], %11 {strides = array<i32>} : memref<8x128xf32, #tpu.memory_space<vmem>>, vector<8x128xf32>,
    %13 = vector.shape_cast %9 : vector<1x128xf32> to vector<1x128xf32>
    %14 = vector.broadcast %13 : vector<1x128xf32> to vector<8x128xf32>
    %c0_9 = arith.constant 0 : index
    %c0_10 = arith.constant 0 : index
    %15 = vector.load %arg5[%c0_9, %c0_10] : memref<8x128xf32, #tpu.memory_space<vmem>>, vector<8x128xf32>
    tpu.vector_store %arg5[%c0_9, %c0_10], %14 {strides = array<i32>} : memref<8x128xf32, #tpu.memory_space<vmem>>, vector<8x128xf32>,
    return
  }
  func.func @transform_0(%arg0: i32) -> (i32, i32) {
    %c0_i32 = arith.constant 0 : i32
    %c0_i32_0 = arith.constant 0 : i32
    return %arg0, %c0_i32 : i32, i32
  }
  func.func @transform_1(%arg0: i32) -> (i32, i32) {
    %c0_i32 = arith.constant 0 : i32
    %c0_i32_0 = arith.constant 0 : i32
    %c0_i32_1 = arith.constant 0 : i32
    return %c0_i32, %c0_i32_0 : i32, i32
  }
  func.func @transform_2(%arg0: i32) -> (i32, i32) {
    %c0_i32 = arith.constant 0 : i32
    %c0_i32_0 = arith.constant 0 : i32
    return %arg0, %c0_i32 : i32, i32
  }
  func.func @transform_3(%arg0: i32) -> (i32, i32) {
    %c0_i32 = arith.constant 0 : i32
    %c0_i32_0 = arith.constant 0 : i32
    return %arg0, %c0_i32 : i32, i32
  }
  func.func @transform_4(%arg0: i32) -> (i32, i32) {
    %c0_i32 = arith.constant 0 : i32
    %c0_i32_0 = arith.constant 0 : i32
    return %arg0, %c0_i32 : i32, i32
  }
}

module attributes {stable_mosaic.version = 11 : i64} {
  func.func @_matmul_stats_kernel(%arg0: i32, %arg1: memref<32x512xbf16, #tpu.memory_space<vmem>>, %arg2: memref<512x128xbf16, #tpu.memory_space<vmem>>, %arg3: memref<32x128xbf16, #tpu.memory_space<vmem>>, %arg4: memref<8x128xf32, #tpu.memory_space<vmem>>, %arg5: memref<8x128xf32, #tpu.memory_space<vmem>>) attributes {dimension_semantics = [#tpu.dimension_semantics<parallel>], iteration_bounds = array<i64: 1>, scalar_prefetch = 0 : i64, scratch_operands = 0 : i64, tpu.core_type = #tpu.core_type<tc>, window_params = [{transform_indices = @transform_0, window_bounds = array<i64: 32, 512>}, {pipeline_mode = #tpu.pipeline_mode<synchronous>, transform_indices = @transform_1, window_bounds = array<i64: 512, 128>}, {transform_indices = @transform_2, window_bounds = array<i64: 32, 128>}, {transform_indices = @transform_3, window_bounds = array<i64: 8, 128>}, {transform_indices = @transform_4, window_bounds = array<i64: 8, 128>}]} {
    %c0 = arith.constant 0 : index
    %c0_0 = arith.constant 0 : index
    %0 = vector.load %arg1[%c0, %c0_0] : memref<32x512xbf16, #tpu.memory_space<vmem>>, vector<32x512xbf16>
    %c0_1 = arith.constant 0 : index
    %c0_2 = arith.constant 0 : index
    %1 = vector.load %arg2[%c0_1, %c0_2] : memref<512x128xbf16, #tpu.memory_space<vmem>>, vector<512x128xbf16>
    %cst = arith.constant dense<0.000000e+00> : vector<32x128xf32>
    %2 = tpu.matmul %0, %1, %cst {dimension_numbers = #tpu.dot_dimension_numbers<[1], [0], [0], [1], [0, 0, 1, 1], [], []>} : vector<32x512xbf16>, vector<512x128xbf16>, vector<32x128xf32> -> vector<32x128xf32>
    %3 = arith.truncf %2 : vector<32x128xf32> to vector<32x128xbf16>
    %c0_3 = arith.constant 0 : index
    %c0_4 = arith.constant 0 : index
    %4 = vector.load %arg3[%c0_3, %c0_4] : memref<32x128xbf16, #tpu.memory_space<vmem>>, vector<32x128xbf16>
    tpu.vector_store %arg3[%c0_3, %c0_4], %3 {strides = array<i32>} : memref<32x128xbf16, #tpu.memory_space<vmem>>, vector<32x128xbf16>,
    %cst_5 = arith.constant dense<0.000000e+00> : vector<128xf32>
    %5 = vector.multi_reduction <add>, %2, %cst_5 [0] : vector<32x128xf32> to vector<128xf32>
    %6 = vector.shape_cast %5 : vector<128xf32> to vector<1x128xf32>
    %7 = arith.mulf %2, %2 : vector<32x128xf32>
    %cst_6 = arith.constant dense<0.000000e+00> : vector<128xf32>
    %8 = vector.multi_reduction <add>, %7, %cst_6 [0] : vector<32x128xf32> to vector<128xf32>
    %9 = vector.shape_cast %8 : vector<128xf32> to vector<1x128xf32>
    %10 = vector.shape_cast %6 : vector<1x128xf32> to vector<1x128xf32>
    %11 = vector.broadcast %10 : vector<1x128xf32> to vector<8x128xf32>
    %c0_7 = arith.constant 0 : index
    %c0_8 = arith.constant 0 : index
    %12 = vector.load %arg4[%c0_7, %c0_8] : memref<8x128xf32, #tpu.memory_space<vmem>>, vector<8x128xf32>
    tpu.vector_store %arg4[%c0_7, %c0_8], %11 {strides = array<i32>} : memref<8x128xf32, #tpu.memory_space<vmem>>, vector<8x128xf32>,
    %13 = vector.shape_cast %9 : vector<1x128xf32> to vector<1x128xf32>
    %14 = vector.broadcast %13 : vector<1x128xf32> to vector<8x128xf32>
    %c0_9 = arith.constant 0 : index
    %c0_10 = arith.constant 0 : index
    %15 = vector.load %arg5[%c0_9, %c0_10] : memref<8x128xf32, #tpu.memory_space<vmem>>, vector<8x128xf32>
    tpu.vector_store %arg5[%c0_9, %c0_10], %14 {strides = array<i32>} : memref<8x128xf32, #tpu.memory_space<vmem>>, vector<8x128xf32>,
    return
  }
  func.func @transform_0(%arg0: i32) -> (i32, i32) {
    %c0_i32 = arith.constant 0 : i32
    %c0_i32_0 = arith.constant 0 : i32
    return %arg0, %c0_i32 : i32, i32
  }
  func.func @transform_1(%arg0: i32) -> (i32, i32) {
    %c0_i32 = arith.constant 0 : i32
    %c0_i32_0 = arith.constant 0 : i32
    %c0_i32_1 = arith.constant 0 : i32
    return %c0_i32, %c0_i32_0 : i32, i32
  }
  func.func @transform_2(%arg0: i32) -> (i32, i32) {
    %c0_i32 = arith.constant 0 : i32
    %c0_i32_0 = arith.constant 0 : i32
    return %arg0, %c0_i32 : i32, i32
  }
  func.func @transform_3(%arg0: i32) -> (i32, i32) {
    %c0_i32 = arith.constant 0 : i32
    %c0_i32_0 = arith.constant 0 : i32
    return %arg0, %c0_i32 : i32, i32
  }
  func.func @transform_4(%arg0: i32) -> (i32, i32) {
    %c0_i32 = arith.constant 0 : i32
    %c0_i32_0 = arith.constant 0 : i32
    return %arg0, %c0_i32 : i32, i32
  }
}

module attributes {stable_mosaic.version = 11 : i64} {
  func.func @_matmul_sigmoid_kernel(%arg0: i32, %arg1: memref<8x1024xbf16, #tpu.memory_space<vmem>>, %arg2: memref<1024x128xbf16, #tpu.memory_space<vmem>>, %arg3: memref<8x128xf32, #tpu.memory_space<vmem>>) attributes {dimension_semantics = [#tpu.dimension_semantics<parallel>], iteration_bounds = array<i64: 1>, scalar_prefetch = 0 : i64, scratch_operands = 0 : i64, tpu.core_type = #tpu.core_type<tc>, window_params = [{transform_indices = @transform_0, window_bounds = array<i64: 8, 1024>}, {pipeline_mode = #tpu.pipeline_mode<synchronous>, transform_indices = @transform_1, window_bounds = array<i64: 1024, 128>}, {transform_indices = @transform_2, window_bounds = array<i64: 8, 128>}]} {
    %c0 = arith.constant 0 : index
    %c0_0 = arith.constant 0 : index
    %0 = vector.load %arg1[%c0, %c0_0] : memref<8x1024xbf16, #tpu.memory_space<vmem>>, vector<8x1024xbf16>
    %c0_1 = arith.constant 0 : index
    %c0_2 = arith.constant 0 : index
    %1 = vector.load %arg2[%c0_1, %c0_2] : memref<1024x128xbf16, #tpu.memory_space<vmem>>, vector<1024x128xbf16>
    %cst = arith.constant dense<0.000000e+00> : vector<8x128xf32>
    %2 = tpu.matmul %0, %1, %cst {dimension_numbers = #tpu.dot_dimension_numbers<[1], [0], [0], [1], [0, 0, 1, 1], [], []>} : vector<8x1024xbf16>, vector<1024x128xbf16>, vector<8x128xf32> -> vector<8x128xf32>
    %3 = arith.negf %2 : vector<8x128xf32>
    %4 = math.exp %3 : vector<8x128xf32>
    %cst_3 = arith.constant 1.000000e+00 : f32
    %5 = vector.broadcast %cst_3 : f32 to vector<8x128xf32>
    %6 = arith.addf %5, %4 : vector<8x128xf32>
    %7 = arith.divf %5, %6 : vector<8x128xf32>
    %c0_4 = arith.constant 0 : index
    %c0_5 = arith.constant 0 : index
    %8 = vector.load %arg3[%c0_4, %c0_5] : memref<8x128xf32, #tpu.memory_space<vmem>>, vector<8x128xf32>
    tpu.vector_store %arg3[%c0_4, %c0_5], %7 {strides = array<i32>} : memref<8x128xf32, #tpu.memory_space<vmem>>, vector<8x128xf32>,
    return
  }
  func.func @transform_0(%arg0: i32) -> (i32, i32) {
    %c0_i32 = arith.constant 0 : i32
    %c0_i32_0 = arith.constant 0 : i32
    return %arg0, %c0_i32 : i32, i32
  }
  func.func @transform_1(%arg0: i32) -> (i32, i32) {
    %c0_i32 = arith.constant 0 : i32
    %c0_i32_0 = arith.constant 0 : i32
    %c0_i32_1 = arith.constant 0 : i32
    return %c0_i32, %c0_i32_0 : i32, i32
  }
  func.func @transform_2(%arg0: i32) -> (i32, i32) {
    %c0_i32 = arith.constant 0 : i32
    %c0_i32_0 = arith.constant 0 : i32
    return %arg0, %c0_i32 : i32, i32
  }
}

</mosaic_0001>

<bundles_post_ra>
// kernel: discriminator_forward.5
= control target key start
LH: loop header
LB: loop body
LE: loop exit
PB: predicated region body
PF: predicated region fallthrough
CT: control target
= control target key end

     0   :  { %vm932_vm0 = vcmask 392192   ;;  %s7457_s1 = inlined_call_operand.vmem [shape: bf16[48,128], index: 1, kind: input, shape index: {}]   ;;  %s7458_s0 = inlined_call_operand.vmem [shape: bf16[2048,48], index: 0, kind: input, shape index: {}]   ;;  %s7459_s2 = inlined_call_operand.vmem [shape: bf16[2048,128], index: 2, kind: output, shape index: {}]  }
   0x1   :  { %v6363_v0 = vld [vmem:[%s7457_s1] sm:$0xff]   ;;  %v6364_v1 = vld [vmem:[%s7457_s1 + $0x8] sm:$0xff]   ;;  %v6365_v2 = vld [vmem:[%s7457_s1 + $0x10] sm:$0xff]  }
   0x2   :  { %6095 = vmatprep.subr.bf16.mxu0 %v6363_v0  ;;  %6357 = vmatprep.subr.bf16.mxu1 %v6363_v0  ;;  %v6366_v3 = vld [vmem:[%s7458_s0] sm:$0xff]   ;;  %v6368_v5 = vld [vmem:[%s7458_s0 + $0x8] sm:$0xff]   ;;  %v6370_v7 = vld [vmem:[%s7458_s0 + $0x10] sm:$0xff]  }
   0x3   :  { %6096 = vmatpush3.bf16.msra.mxu0 %v6363_v0  ;;  %6360 = vmatpush3.bf16.msra.mxu1 %v6363_v0  ;;  %v6367_v4 = vld [vmem:[%s7458_s0 + $0x200] sm:$0xff]   ;;  %v6369_v6 = vld [vmem:[%s7458_s0 + $0x208] sm:$0xff]   ;;  %v6371_v8 = vld [vmem:[%s7458_s0 + $0x210] sm:$0xff]  }
   0x4   :  { %6097 = vmatprep.subr.bf16.mxu0 %v6364_v1  ;;  %6358 = vmatprep.subr.bf16.mxu1 %v6364_v1  ;;  %v6372_v9 = vld [vmem:[%s7458_s0 + $0x18] sm:$0xff]   ;;  %v6374_v11 = vld [vmem:[%s7458_s0 + $0x20] sm:$0xff]   ;;  %v6376_v13 = vld [vmem:[%s7458_s0 + $0x28] sm:$0xff]  }
   0x5   :  { %6101 = vmatprep.mubr.msk.bf16.mxu0 %vm932_vm0, %v6366_v3  ;;  %6229 = vmatprep.mubr.msk.bf16.mxu1 %vm932_vm0, %v6367_v4  ;;  %v6373_v10 = vld [vmem:[%s7458_s0 + $0x218] sm:$0xff]   ;;  %v6375_v12 = vld [vmem:[%s7458_s0 + $0x220] sm:$0xff]   ;;  %v6377_v14 = vld [vmem:[%s7458_s0 + $0x228] sm:$0xff]  }
   0x6   :  { %v6378_v15 = vld [vmem:[%s7458_s0 + $0x30] sm:$0xff]   ;;  %v6380_v17 = vld [vmem:[%s7458_s0 + $0x38] sm:$0xff]   ;;  %v6382_v19 = vld [vmem:[%s7458_s0 + $0x40] sm:$0xff]  }
   0x7   :  { %6098 = vmatpush3.bf16.msra.mxu0 %v6364_v1  ;;  %6361 = vmatpush3.bf16.msra.mxu1 %v6364_v1  ;;  %v6379_v16 = vld [vmem:[%s7458_s0 + $0x230] sm:$0xff]   ;;  %v6381_v18 = vld [vmem:[%s7458_s0 + $0x238] sm:$0xff]   ;;  %v6383_v20 = vld [vmem:[%s7458_s0 + $0x240] sm:$0xff]  }
   0x8   :  { %6099 = vmatprep.subr.bf16.mxu0 %v6365_v2  ;;  %6359 = vmatprep.subr.bf16.mxu1 %v6365_v2  ;;  %v6384_v21 = vld [vmem:[%s7458_s0 + $0x48] sm:$0xff]   ;;  %v6386_v23 = vld [vmem:[%s7458_s0 + $0x50] sm:$0xff]   ;;  %v6388_v25 = vld [vmem:[%s7458_s0 + $0x58] sm:$0xff]  }
   0x9   :  { %v6385_v22 = vld [vmem:[%s7458_s0 + $0x248] sm:$0xff]   ;;  %v6387_v24 = vld [vmem:[%s7458_s0 + $0x250] sm:$0xff]   ;;  %v6389_v26 = vld [vmem:[%s7458_s0 + $0x258] sm:$0xff]  }
   0xa   :  { %v6390_v27 = vld [vmem:[%s7458_s0 + $0x60] sm:$0xff]   ;;  %v6392_v29 = vld [vmem:[%s7458_s0 + $0x68] sm:$0xff]   ;;  %v6394_v31 = vld [vmem:[%s7458_s0 + $0x70] sm:$0xff]  }
   0xb   :  { %6100 = vmatpush3.bf16.msra.mxu0 %v6365_v2  ;;  %6362 = vmatpush3.bf16.msra.mxu1 %v6365_v2  ;;  %v6391_v28 = vld [vmem:[%s7458_s0 + $0x260] sm:$0xff]   ;;  %v6393_v30 = vld [vmem:[%s7458_s0 + $0x268] sm:$0xff]   ;;  %v6395_v32 = vld [vmem:[%s7458_s0 + $0x270] sm:$0xff]  }
   0xc   :  { %v6396_v33 = vld [vmem:[%s7458_s0 + $0x78] sm:$0xff]   ;;  %v6398_v35 = vld [vmem:[%s7458_s0 + $0x80] sm:$0xff]   ;;  %v6400_v37 = vld [vmem:[%s7458_s0 + $0x88] sm:$0xff]  }
   0xd   :  { %v6397_v34 = vld [vmem:[%s7458_s0 + $0x278] sm:$0xff]   ;;  %v6399_v36 = vld [vmem:[%s7458_s0 + $0x280] sm:$0xff]   ;;  %v6401_v38 = vld [vmem:[%s7458_s0 + $0x288] sm:$0xff]  }
   0xe   :  { %6102 = vmatmul.mubr.msk.bf16.vlgmr.msra.gmra.mrb[0].mxu0 %vm932_vm0, %v6368_v5  ;;  %6230 = vmatmul.mubr.msk.bf16.vlgmr.msra.gmra.mrb[0].mxu1 %vm932_vm0, %v6369_v6  ;;  %v6402_v39 = vld [vmem:[%s7458_s0 + $0x90] sm:$0xff]   ;;  %v6404_v41 = vld [vmem:[%s7458_s0 + $0x98] sm:$0xff]   ;;  %v6406_v43 = vld [vmem:[%s7458_s0 + $0xa0] sm:$0xff]  }
   0xf   :  { %6105 = vmatprep.mubr.msk.bf16.mxu0 %vm932_vm0, %v6370_v7  ;;  %6233 = vmatprep.mubr.msk.bf16.mxu1 %vm932_vm0, %v6371_v8  ;;  %v6403_v40 = vld [vmem:[%s7458_s0 + $0x290] sm:$0xff]   ;;  %v6405_v42 = vld [vmem:[%s7458_s0 + $0x298] sm:$0xff]   ;;  %v6407_v44 = vld [vmem:[%s7458_s0 + $0x2a0] sm:$0xff]  }
  0x10   :  { %v6408_v45 = vld [vmem:[%s7458_s0 + $0xa8] sm:$0xff]   ;;  %v6410_v47 = vld [vmem:[%s7458_s0 + $0xb0] sm:$0xff]   ;;  %v6412_v49 = vld [vmem:[%s7458_s0 + $0xb8] sm:$0xff]  }
  0x11   :  { %v6409_v46 = vld [vmem:[%s7458_s0 + $0x2a8] sm:$0xff]   ;;  %v6411_v48 = vld [vmem:[%s7458_s0 + $0x2b0] sm:$0xff]   ;;  %v6413_v50 = vld [vmem:[%s7458_s0 + $0x2b8] sm:$0xff]  }
  0x12   :  { %v6414_v51 = vld [vmem:[%s7458_s0 + $0xc0] sm:$0xff]   ;;  %v6416_v53 = vld [vmem:[%s7458_s0 + $0xc8] sm:$0xff]   ;;  %v6418_v55 = vld [vmem:[%s7458_s0 + $0xd0] sm:$0xff]  }
  0x13   :  { %v6415_v52 = vld [vmem:[%s7458_s0 + $0x2c0] sm:$0xff]   ;;  %v6417_v54 = vld [vmem:[%s7458_s0 + $0x2c8] sm:$0xff]   ;;  %v6419_v56 = vld [vmem:[%s7458_s0 + $0x2d0] sm:$0xff]  }
  0x14   :  { %v6420_v57 = vld [vmem:[%s7458_s0 + $0xd8] sm:$0xff]   ;;  %v6422_v59 = vld [vmem:[%s7458_s0 + $0xe0] sm:$0xff]   ;;  %v6424_v61 = vld [vmem:[%s7458_s0 + $0xe8] sm:$0xff]  }
  0x15   :  { %v6421_v58 = vld [vmem:[%s7458_s0 + $0x2d8] sm:$0xff]   ;;  %v6423_v60 = vld [vmem:[%s7458_s0 + $0x2e0] sm:$0xff]   ;;  %v6425_v62 = vld [vmem:[%s7458_s0 + $0x2e8] sm:$0xff]  }
  0x16   :  { %6106 = vmatmul.mubr.msk.bf16.gmra.mrb[4].mxu0 %vm932_vm0, %v6372_v9  ;;  %6234 = vmatmul.mubr.msk.bf16.gmra.mrb[4].mxu1 %vm932_vm0, %v6373_v10  ;;  %v6426_v63 = vld [vmem:[%s7458_s0 + $0xf0] sm:$0xff]   ;;  %v6428_v1 = vld [vmem:[%s7458_s0 + $0xf8] sm:$0xff]   ;;  %v6430_v3 = vld [vmem:[%s7458_s0 + $0x100] sm:$0xff]  }
  0x17   :  { %6109 = vmatprep.mubr.msk.bf16.mxu0 %vm932_vm0, %v6374_v11  ;;  %6237 = vmatprep.mubr.msk.bf16.mxu1 %vm932_vm0, %v6375_v12  ;;  %v6427_v0 = vld [vmem:[%s7458_s0 + $0x2f0] sm:$0xff]   ;;  %v6429_v2 = vld [vmem:[%s7458_s0 + $0x2f8] sm:$0xff]   ;;  %v6431_v4 = vld [vmem:[%s7458_s0 + $0x300] sm:$0xff]  }
  0x18   :  { %v6432_v5 = vld [vmem:[%s7458_s0 + $0x108] sm:$0xff]   ;;  %v6434_v7 = vld [vmem:[%s7458_s0 + $0x110] sm:$0xff]   ;;  %v6436_v9 = vld [vmem:[%s7458_s0 + $0x118] sm:$0xff]  }
  0x19   :  { %v6433_v6 = vld [vmem:[%s7458_s0 + $0x308] sm:$0xff]   ;;  %v6435_v8 = vld [vmem:[%s7458_s0 + $0x310] sm:$0xff]   ;;  %v6437_v10 = vld [vmem:[%s7458_s0 + $0x318] sm:$0xff]  }
  0x1a   :  { %v6438_v11 = vld [vmem:[%s7458_s0 + $0x120] sm:$0xff]  }
  0x1b   :  { %v6439_v12 = vld [vmem:[%s7458_s0 + $0x320] sm:$0xff]  }
  0x1e   :  { %6110 = vmatmul.mubr.msk.bf16.gmra.mrb[8].mxu0 %vm932_vm0, %v6376_v13  ;;  %6238 = vmatmul.mubr.msk.bf16.gmra.mrb[8].mxu1 %vm932_vm0, %v6377_v14  ;;  %v6440_v13 = vld [vmem:[%s7458_s0 + $0x128] sm:$0xff]  }
  0x1f   :  { %6113 = vmatprep.mubr.msk.bf16.mxu0 %vm932_vm0, %v6378_v15  ;;  %6241 = vmatprep.mubr.msk.bf16.mxu1 %vm932_vm0, %v6379_v16  ;;  %v6441_v14 = vld [vmem:[%s7458_s0 + $0x328] sm:$0xff]   ;;  %v6442_v15 = vld [vmem:[%s7458_s0 + $0x130] sm:$0xff]  }
  0x20   :  { %v6443_v16 = vld [vmem:[%s7458_s0 + $0x330] sm:$0xff]  }
  0x26   :  { %6114 = vmatmul.mubr.msk.bf16.gmra.mrb[12].mxu0 %vm932_vm0, %v6380_v17  ;;  %6242 = vmatmul.mubr.msk.bf16.gmra.mrb[12].mxu1 %vm932_vm0, %v6381_v18  ;;  %v6444_v17 = vld [vmem:[%s7458_s0 + $0x138] sm:$0xff]  }
  0x27   :  { %6117 = vmatprep.mubr.msk.bf16.mxu0 %vm932_vm0, %v6382_v19  ;;  %6245 = vmatprep.mubr.msk.bf16.mxu1 %vm932_vm0, %v6383_v20  ;;  %v6445_v18 = vld [vmem:[%s7458_s0 + $0x338] sm:$0xff]   ;;  %v6446_v19 = vld [vmem:[%s7458_s0 + $0x140] sm:$0xff]  }
  0x28   :  { %v6447_v20 = vld [vmem:[%s7458_s0 + $0x340] sm:$0xff]  }
  0x2e   :  { %6118 = vmatmul.mubr.msk.bf16.gmra.mrb[16].mxu0 %vm932_vm0, %v6384_v21  ;;  %6246 = vmatmul.mubr.msk.bf16.gmra.mrb[16].mxu1 %vm932_vm0, %v6385_v22  ;;  %v6448_v21 = vld [vmem:[%s7458_s0 + $0x148] sm:$0xff]  }
  0x2f   :  { %6121 = vmatprep.mubr.msk.bf16.mxu0 %vm932_vm0, %v6386_v23  ;;  %6249 = vmatprep.mubr.msk.bf16.mxu1 %vm932_vm0, %v6387_v24  ;;  %v6449_v22 = vld [vmem:[%s7458_s0 + $0x348] sm:$0xff]   ;;  %v6450_v23 = vld [vmem:[%s7458_s0 + $0x150] sm:$0xff]  }
  0x30   :  { %v6451_v24 = vld [vmem:[%s7458_s0 + $0x350] sm:$0xff]  }
  0x36   :  { %6122 = vmatmul.mubr.msk.bf16.gmra.mrb[20].mxu0 %vm932_vm0, %v6388_v25  ;;  %6250 = vmatmul.mubr.msk.bf16.gmra.mrb[20].mxu1 %vm932_vm0, %v6389_v26  ;;  %v6452_v25 = vld [vmem:[%s7458_s0 + $0x158] sm:$0xff]  }
  0x37   :  { %6125 = vmatprep.mubr.msk.bf16.mxu0 %vm932_vm0, %v6390_v27  ;;  %6253 = vmatprep.mubr.msk.bf16.mxu1 %vm932_vm0, %v6391_v28  ;;  %v6453_v26 = vld [vmem:[%s7458_s0 + $0x358] sm:$0xff]   ;;  %v6454_v27 = vld [vmem:[%s7458_s0 + $0x160] sm:$0xff]  }
  0x38   :  { %v6455_v28 = vld [vmem:[%s7458_s0 + $0x360] sm:$0xff]  }
  0x3e   :  { %6126 = vmatmul.mubr.msk.bf16.gmra.mrb[24].mxu0 %vm932_vm0, %v6392_v29  ;;  %6254 = vmatmul.mubr.msk.bf16.gmra.mrb[24].mxu1 %vm932_vm0, %v6393_v30  ;;  %v6456_v29 = vld [vmem:[%s7458_s0 + $0x168] sm:$0xff]  }
  0x3f   :  { %6129 = vmatprep.mubr.msk.bf16.mxu0 %vm932_vm0, %v6394_v31  ;;  %6257 = vmatprep.mubr.msk.bf16.mxu1 %vm932_vm0, %v6395_v32  ;;  %v6457_v30 = vld [vmem:[%s7458_s0 + $0x368] sm:$0xff]   ;;  %v6458_v31 = vld [vmem:[%s7458_s0 + $0x170] sm:$0xff]  }
  0x40   :  { %v6459_v32 = vld [vmem:[%s7458_s0 + $0x370] sm:$0xff]  }
  0x46   :  { %6130 = vmatmul.mubr.msk.bf16.gmra.mrb[28].mxu0 %vm932_vm0, %v6396_v33  ;;  %6258 = vmatmul.mubr.msk.bf16.gmra.mrb[28].mxu1 %vm932_vm0, %v6397_v34  ;;  %v6460_v33 = vld [vmem:[%s7458_s0 + $0x178] sm:$0xff]  }
  0x47   :  { %6133 = vmatprep.mubr.msk.bf16.mxu0 %vm932_vm0, %v6398_v35  ;;  %6261 = vmatprep.mubr.msk.bf16.mxu1 %vm932_vm0, %v6399_v36  ;;  %v6461_v34 = vld [vmem:[%s7458_s0 + $0x378] sm:$0xff]   ;;  %v6462_v35 = vld [vmem:[%s7458_s0 + $0x180] sm:$0xff]  }
  0x48   :  { %v6463_v36 = vld [vmem:[%s7458_s0 + $0x380] sm:$0xff]  }
  0x4e   :  { %6134 = vmatmul.mubr.msk.bf16.gmra.mrb[32].mxu0 %vm932_vm0, %v6400_v37  ;;  %6262 = vmatmul.mubr.msk.bf16.gmra.mrb[32].mxu1 %vm932_vm0, %v6401_v38  ;;  %v6464_v37 = vld [vmem:[%s7458_s0 + $0x188] sm:$0xff]  }
  0x4f   :  { %6137 = vmatprep.mubr.msk.bf16.mxu0 %vm932_vm0, %v6402_v39  ;;  %6265 = vmatprep.mubr.msk.bf16.mxu1 %vm932_vm0, %v6403_v40  ;;  %v6465_v38 = vld [vmem:[%s7458_s0 + $0x388] sm:$0xff]   ;;  %v6466_v39 = vld [vmem:[%s7458_s0 + $0x190] sm:$0xff]  }
  0x50   :  { %v6467_v40 = vld [vmem:[%s7458_s0 + $0x390] sm:$0xff]  }
  0x56   :  { %6138 = vmatmul.mubr.msk.bf16.gmra.mrb[36].mxu0 %vm932_vm0, %v6404_v41  ;;  %6266 = vmatmul.mubr.msk.bf16.gmra.mrb[36].mxu1 %vm932_vm0, %v6405_v42  ;;  %v6468_v41 = vld [vmem:[%s7458_s0 + $0x198] sm:$0xff]  }
  0x57   :  { %6141 = vmatprep.mubr.msk.bf16.mxu0 %vm932_vm0, %v6406_v43  ;;  %6269 = vmatprep.mubr.msk.bf16.mxu1 %vm932_vm0, %v6407_v44  ;;  %v6469_v42 = vld [vmem:[%s7458_s0 + $0x398] sm:$0xff]   ;;  %v6470_v43 = vld [vmem:[%s7458_s0 + $0x1a0] sm:$0xff]  }
  0x58   :  { %v6471_v44 = vld [vmem:[%s7458_s0 + $0x3a0] sm:$0xff]  }
  0x5e   :  { %6142 = vmatmul.mubr.msk.bf16.gmra.mrb[40].mxu0 %vm932_vm0, %v6408_v45  ;;  %6270 = vmatmul.mubr.msk.bf16.gmra.mrb[40].mxu1 %vm932_vm0, %v6409_v46  ;;  %v6472_v45 = vld [vmem:[%s7458_s0 + $0x1a8] sm:$0xff]  }
  0x5f   :  { %6145 = vmatprep.mubr.msk.bf16.mxu0 %vm932_vm0, %v6410_v47  ;;  %6273 = vmatprep.mubr.msk.bf16.mxu1 %vm932_vm0, %v6411_v48  ;;  %v6473_v46 = vld [vmem:[%s7458_s0 + $0x3a8] sm:$0xff]   ;;  %v6474_v47 = vld [vmem:[%s7458_s0 + $0x1b0] sm:$0xff]  }
  0x60   :  { %v6475_v48 = vld [vmem:[%s7458_s0 + $0x3b0] sm:$0xff]  }
  0x66   :  { %6146 = vmatmul.mubr.msk.bf16.gmra.mrb[44].mxu0 %vm932_vm0, %v6412_v49  ;;  %6274 = vmatmul.mubr.msk.bf16.gmra.mrb[44].mxu1 %vm932_vm0, %v6413_v50 }
  0x67   :  { %6149 = vmatprep.mubr.msk.bf16.mxu0 %vm932_vm0, %v6414_v51  ;;  %6277 = vmatprep.mubr.msk.bf16.mxu1 %vm932_vm0, %v6415_v52  ;;  %v6476_v51 = vld [vmem:[%s7458_s0 + $0x1b8] sm:$0xff]  }
  0x6e   :  { %6150 = vmatmul.mubr.msk.bf16.gmra.mrb[48].mxu0 %vm932_vm0, %v6416_v53  ;;  %6278 = vmatmul.mubr.msk.bf16.gmra.mrb[48].mxu1 %vm932_vm0, %v6417_v54  ;;  %v6477_v54 = vld [vmem:[%s7458_s0 + $0x3b8] sm:$0xff]  }
  0x6f   :  { %6153 = vmatprep.mubr.msk.bf16.mxu0 %vm932_vm0, %v6418_v55  ;;  %6281 = vmatprep.mubr.msk.bf16.mxu1 %vm932_vm0, %v6419_v56 }
  0x76   :  { %6154 = vmatmul.mubr.msk.bf16.gmra.mrb[52].mxu0 %vm932_vm0, %v6420_v57  ;;  %6282 = vmatmul.mubr.msk.bf16.gmra.mrb[52].mxu1 %vm932_vm0, %v6421_v58  ;;  %v6478_v57 = vld [vmem:[%s7458_s0 + $0x1c0] sm:$0xff]  }
  0x77   :  { %6157 = vmatprep.mubr.msk.bf16.mxu0 %vm932_vm0, %v6422_v59  ;;  %6285 = vmatprep.mubr.msk.bf16.mxu1 %vm932_vm0, %v6423_v60  ;;  %v6479_v58 = vld [vmem:[%s7458_s0 + $0x3c0] sm:$0xff]  }
  0x7e   :  { %6158 = vmatmul.mubr.msk.bf16.gmra.mrb[56].mxu0 %vm932_vm0, %v6424_v61  ;;  %6286 = vmatmul.mubr.msk.bf16.gmra.mrb[56].mxu1 %vm932_vm0, %v6425_v62 }
  0x7f   :  { %6161 = vmatprep.mubr.msk.bf16.mxu0 %vm932_vm0, %v6426_v63  ;;  %6289 = vmatprep.mubr.msk.bf16.mxu1 %vm932_vm0, %v6427_v0 }
  0x86   :  { %6162 = vmatmul.mubr.msk.bf16.gmra.mrb[60].mxu0 %vm932_vm0, %v6428_v1  ;;  %6290 = vmatmul.mubr.msk.bf16.gmra.mrb[60].mxu1 %vm932_vm0, %v6429_v2 }
  0x87   :  { %6165 = vmatprep.mubr.msk.bf16.mxu0 %vm932_vm0, %v6430_v3  ;;  %6293 = vmatprep.mubr.msk.bf16.mxu1 %vm932_vm0, %v6431_v4 }
  0x8e   :  { %6166 = vmatmul.mubr.msk.bf16.gmra.mrb[64].mxu0 %vm932_vm0, %v6432_v5  ;;  %6294 = vmatmul.mubr.msk.bf16.gmra.mrb[64].mxu1 %vm932_vm0, %v6433_v6 }
  0x8f   :  { %6169 = vmatprep.mubr.msk.bf16.mxu0 %vm932_vm0, %v6434_v7  ;;  %6297 = vmatprep.mubr.msk.bf16.mxu1 %vm932_vm0, %v6435_v8 }
  0x96   :  { %6170 = vmatmul.mubr.msk.bf16.gmra.mrb[68].mxu0 %vm932_vm0, %v6436_v9  ;;  %6298 = vmatmul.mubr.msk.bf16.gmra.mrb[68].mxu1 %vm932_vm0, %v6437_v10 }
  0x97   :  { %6173 = vmatprep.mubr.msk.bf16.mxu0 %vm932_vm0, %v6438_v11  ;;  %6301 = vmatprep.mubr.msk.bf16.mxu1 %vm932_vm0, %v6439_v12 }
  0x9e   :  { %6174 = vmatmul.mubr.msk.bf16.gmra.mrb[72].mxu0 %vm932_vm0, %v6440_v13  ;;  %6302 = vmatmul.mubr.msk.bf16.gmra.mrb[72].mxu1 %vm932_vm0, %v6441_v14 }
  0x9f   :  { %6177 = vmatprep.mubr.msk.bf16.mxu0 %vm932_vm0, %v6442_v15  ;;  %6305 = vmatprep.mubr.msk.bf16.mxu1 %vm932_vm0, %v6443_v16  ;;  %v6480_v15 = vld [vmem:[%s7458_s0 + $0x1c8] sm:$0xff]  }
  0xa6   :  { %6178 = vmatmul.mubr.msk.bf16.gmra.mrb[76].mxu0 %vm932_vm0, %v6444_v17  ;;  %6306 = vmatmul.mubr.msk.bf16.gmra.mrb[76].mxu1 %vm932_vm0, %v6445_v18 }
  0xa7   :  { %6181 = vmatprep.mubr.msk.bf16.mxu0 %vm932_vm0, %v6446_v19  ;;  %6309 = vmatprep.mubr.msk.bf16.mxu1 %vm932_vm0, %v6447_v20 }
  0xae   :  { %6182 = vmatmul.mubr.msk.bf16.gmra.mrb[80].mxu0 %vm932_vm0, %v6448_v21  ;;  %6310 = vmatmul.mubr.msk.bf16.gmra.mrb[80].mxu1 %vm932_vm0, %v6449_v22  ;;  %v6481_v22 = vld [vmem:[%s7458_s0 + $0x3c8] sm:$0xff]  }
  0xaf   :  { %6185 = vmatprep.mubr.msk.bf16.mxu0 %vm932_vm0, %v6450_v23  ;;  %6313 = vmatprep.mubr.msk.bf16.mxu1 %vm932_vm0, %v6451_v24  ;;  %v6482_v23 = vld [vmem:[%s7458_s0 + $0x1d0] sm:$0xff]  }
  0xb6   :  { %6186 = vmatmul.mubr.msk.bf16.gmra.mrb[84].mxu0 %vm932_vm0, %v6452_v25  ;;  %6314 = vmatmul.mubr.msk.bf16.gmra.mrb[84].mxu1 %vm932_vm0, %v6453_v26 }
  0xb7   :  { %6189 = vmatprep.mubr.msk.bf16.mxu0 %vm932_vm0, %v6454_v27  ;;  %6317 = vmatprep.mubr.msk.bf16.mxu1 %vm932_vm0, %v6455_v28  ;;  %v6483_v28 = vld [vmem:[%s7458_s0 + $0x3d0] sm:$0xff]  }
  0xbe   :  { %6190 = vmatmul.mubr.msk.bf16.gmra.mrb[88].mxu0 %vm932_vm0, %v6456_v29  ;;  %6318 = vmatmul.mubr.msk.bf16.gmra.mrb[88].mxu1 %vm932_vm0, %v6457_v30 }
  0xbf   :  { %6193 = vmatprep.mubr.msk.bf16.mxu0 %vm932_vm0, %v6458_v31  ;;  %6321 = vmatprep.mubr.msk.bf16.mxu1 %vm932_vm0, %v6459_v32 }
  0xc6   :  { %6194 = vmatmul.mubr.msk.bf16.gmra.mrb[92].mxu0 %vm932_vm0, %v6460_v33  ;;  %6322 = vmatmul.mubr.msk.bf16.gmra.mrb[92].mxu1 %vm932_vm0, %v6461_v34 }
  0xc7   :  { %6197 = vmatprep.mubr.msk.bf16.mxu0 %vm932_vm0, %v6462_v35  ;;  %6325 = vmatprep.mubr.msk.bf16.mxu1 %vm932_vm0, %v6463_v36 }
  0xce   :  { %6198 = vmatmul.mubr.msk.bf16.gmra.mrb[96].mxu0 %vm932_vm0, %v6464_v37  ;;  %6326 = vmatmul.mubr.msk.bf16.gmra.mrb[96].mxu1 %vm932_vm0, %v6465_v38 }
  0xcf   :  { %6201 = vmatprep.mubr.msk.bf16.mxu0 %vm932_vm0, %v6466_v39  ;;  %6329 = vmatprep.mubr.msk.bf16.mxu1 %vm932_vm0, %v6467_v40 }
  0xd6   :  { %6202 = vmatmul.mubr.msk.bf16.gmra.mrb[100].mxu0 %vm932_vm0, %v6468_v41  ;;  %6330 = vmatmul.mubr.msk.bf16.gmra.mrb[100].mxu1 %vm932_vm0, %v6469_v42 }
  0xd7   :  { %6205 = vmatprep.mubr.msk.bf16.mxu0 %vm932_vm0, %v6470_v43  ;;  %6333 = vmatprep.mubr.msk.bf16.mxu1 %vm932_vm0, %v6471_v44 }
  0xde   :  { %6206 = vmatmul.mubr.msk.bf16.gmra.mrb[104].mxu0 %vm932_vm0, %v6472_v45  ;;  %6334 = vmatmul.mubr.msk.bf16.gmra.mrb[104].mxu1 %vm932_vm0, %v6473_v46 }
  0xdf   :  { %6209 = vmatprep.mubr.msk.bf16.mxu0 %vm932_vm0, %v6474_v47  ;;  %6337 = vmatprep.mubr.msk.bf16.mxu1 %vm932_vm0, %v6475_v48 }
  0xe1   :  { %v6103_v49 = vpop.f32.mrb[0].mxu0  ;;  %v6231_v50 = vpop.f32.mrb[0].mxu1 }
  0xe2   :  { %vm2376_vm1 = vcmp.gt.f32.partialorder %v6103_v49, 0.0  ;;  %v2632_v52 = vmul.f32 0.2, %v6103_v49  ;;  %v2760_v53 = vmul.f32 0.2, %v6231_v50  ;;  %vm2504_vm2 = vcmp.gt.f32.partialorder %v6231_v50, 0.0 }
  0xe3   :  { %v1351_v55 = vpop.f32.mrb[1].mxu0  ;;  %v1863_v56 = vpop.f32.mrb[1].mxu1 }
  0xe4   :  { %v2630_v59 = vmul.f32 0.2, %v1351_v55  ;;  %v6104_v60 = vpop.f32.mrb[2].mxu0  ;;  %v6232_v61 = vpop.f32.mrb[2].mxu1  ;;  %v2888_v62 = vsel %vm2376_vm1, %v6103_v49, %v2632_v52  ;;  %v2758_v63 = vmul.f32 0.2, %v1863_v56  ;;  %v3016_v1 = vsel %vm2504_vm2, %v6231_v50, %v2760_v53 }
  0xe5   :  { %vm2377_vm3 = vcmp.gt.f32.partialorder %v6104_v60, 0.0  ;;  %v2633_v0 = vmul.f32 0.2, %v6104_v60  ;;  %vm2374_vm4 = vcmp.gt.f32.partialorder %v1351_v55, 0.0  ;;  %vm2505_vm5 = vcmp.gt.f32.partialorder %v6232_v61, 0.0  ;;  %v1354_v3 = vpop.f32.mrb[3].mxu0 }
  0xe6   :  { %v2761_v2 = vmul.f32 0.2, %v6232_v61  ;;  %v1866_v4 = vpop.f32.mrb[3].mxu1  ;;  %6210 = vmatmul.mubr.msk.bf16.gmra.mrb[108].mxu0 %vm932_vm0, %v6476_v51  ;;  %6338 = vmatmul.mubr.msk.bf16.gmra.mrb[108].mxu1 %vm932_vm0, %v6477_v54  ;;  %vm2502_vm6 = vcmp.gt.f32.partialorder %v1863_v56, 0.0  ;;  %vm2375_vm7 = vcmp.gt.f32.partialorder %v1354_v3, 0.0  ;;  %v2886_v10 = vsel %vm2374_vm4, %v1351_v55, %v2630_v59  ;;  %v6484_v49 = vld [vmem:[%s7458_s0 + $0x1d8] sm:$0xff]  }
  0xe7   :  { %v2889_v5 = vsel %vm2377_vm3, %v6104_v60, %v2633_v0  ;;  %v2631_v6 = vmul.f32 0.2, %v1354_v3  ;;  %6213 = vmatprep.mubr.msk.bf16.mxu0 %vm932_vm0, %v6478_v57  ;;  %6341 = vmatprep.mubr.msk.bf16.mxu1 %vm932_vm0, %v6479_v58  ;;  %vm2503_vm8 = vcmp.gt.f32.partialorder %v1866_v4, 0.0  ;;  %v2759_v9 = vmul.f32 0.2, %v1866_v4  ;;  %v6485_v55 = vld [vmem:[%s7458_s0 + $0x3d8] sm:$0xff]  }
  0xe8   :  { %v5205_v7 = vpack.c.bf16 %v2889_v5, %v2888_v62  ;;  %v3017_v8 = vsel %vm2505_vm5, %v6232_v61, %v2761_v2  ;;  %v3014_v16 = vsel %vm2502_vm6, %v1863_v56, %v2758_v63  ;;  %v6486_v57 = vld [vmem:[%s7458_s0 + $0x1e0] sm:$0xff]  }
  0xe9   :  { %v5525_v11 = vpack.c.bf16 %v3017_v8, %v3016_v1  ;;  %v2887_v12 = vsel %vm2375_vm7, %v1354_v3, %v2631_v6  ;;  %v6107_v13 = vpop.f32.mrb[4].mxu0  ;;  %v6235_v14 = vpop.f32.mrb[4].mxu1  ;;  %v3015_v18 = vsel %vm2503_vm8, %v1866_v4, %v2759_v9  ;;  %v6487_v58 = vld [vmem:[%s7458_s0 + $0x3e0] sm:$0xff]  }
  0xea   :  { %5837 = vst [vmem:[%s7459_s2 + $0x8] sm:$0xff] %v5205_v7   ;;  %v5200_v17 = vpack.c.bf16 %v2887_v12, %v2886_v10  ;;  %v2636_v19 = vmul.f32 0.2, %v6107_v13  ;;  %v1367_v20 = vpop.f32.mrb[5].mxu0  ;;  %v1879_v21 = vpop.f32.mrb[5].mxu1  ;;  %v5520_v24 = vpack.c.bf16 %v3015_v18, %v3014_v16  ;;  %vm2380_vm9 = vcmp.gt.f32.partialorder %v6107_v13, 0.0 }
  0xeb   :  { %5901 = vst [vmem:[%s7459_s2 + $0x208] sm:$0xff] %v5525_v11   ;;  %v2764_v25 = vmul.f32 0.2, %v6235_v14  ;;  %v6108_v26 = vpop.f32.mrb[6].mxu0  ;;  %v6236_v27 = vpop.f32.mrb[6].mxu1  ;;  %vm2508_vm10 = vcmp.gt.f32.partialorder %v6235_v14, 0.0 }
  0xec   :  { %5201 = vst [vmem:[%s7459_s2] sm:$0xff] %v5200_v17   ;;  %v2634_v29 = vmul.f32 0.2, %v1367_v20  ;;  %v2762_v30 = vmul.f32 0.2, %v1879_v21  ;;  %v1370_v31 = vpop.f32.mrb[7].mxu0  ;;  %5900 = vst [vmem:[%s7459_s2 + $0x200] sm:$0xff] %v5520_v24   ;;  %v2892_v34 = vsel %vm2380_vm9, %v6107_v13, %v2636_v19 }
  0xed   :  { %vm2378_vm11 = vcmp.gt.f32.partialorder %v1367_v20, 0.0  ;;  %vm2381_vm12 = vcmp.gt.f32.partialorder %v6108_v26, 0.0  ;;  %v2637_v32 = vmul.f32 0.2, %v6108_v26  ;;  %vm2509_vm13 = vcmp.gt.f32.partialorder %v6236_v27, 0.0  ;;  %v1882_v33 = vpop.f32.mrb[7].mxu1 }
  0xee   :  { %vm2506_vm14 = vcmp.gt.f32.partialorder %v1879_v21, 0.0  ;;  %v2765_v35 = vmul.f32 0.2, %v6236_v27  ;;  %vm2379_vm15 = vcmp.gt.f32.partialorder %v1370_v31, 0.0  ;;  %6214 = vmatmul.mubr.msk.bf16.gmra.mrb[112].mxu0 %vm932_vm0, %v6480_v15  ;;  %6342 = vmatmul.mubr.msk.bf16.gmra.mrb[112].mxu1 %vm932_vm0, %v6481_v22  ;;  %v2635_v37 = vmul.f32 0.2, %v1370_v31 }
  0xef   :  { %v2893_v36 = vsel %vm2381_vm12, %v6108_v26, %v2637_v32  ;;  %vm2507_vm1 = vcmp.gt.f32.partialorder %v1882_v33, 0.0  ;;  %v2763_v38 = vmul.f32 0.2, %v1882_v33  ;;  %6217 = vmatprep.mubr.msk.bf16.mxu0 %vm932_vm0, %v6482_v23  ;;  %6345 = vmatprep.mubr.msk.bf16.mxu1 %vm932_vm0, %v6483_v28  ;;  %v3020_v39 = vsel %vm2508_vm10, %v6235_v14, %v2764_v25  ;;  %v6488_v17 = vld [vmem:[%s7458_s0 + $0x1e8] sm:$0xff]   ;;  %v6490_v25 = vld [vmem:[%s7458_s0 + $0x1f0] sm:$0xff]  }
  0xf0   :  { %v2890_v40 = vsel %vm2378_vm11, %v1367_v20, %v2634_v29  ;;  %v5215_v41 = vpack.c.bf16 %v2893_v36, %v2892_v34  ;;  %v3021_v42 = vsel %vm2509_vm13, %v6236_v27, %v2765_v35  ;;  %v3018_v43 = vsel %vm2506_vm14, %v1879_v21, %v2762_v30  ;;  %v6489_v23 = vld [vmem:[%s7458_s0 + $0x3e8] sm:$0xff]   ;;  %v6491_v26 = vld [vmem:[%s7458_s0 + $0x3f0] sm:$0xff]  }
  0xf1   :  { %v5535_v44 = vpack.c.bf16 %v3021_v42, %v3020_v39  ;;  %v2891_v45 = vsel %vm2379_vm15, %v1370_v31, %v2635_v37  ;;  %v3019_v46 = vsel %vm2507_vm1, %v1882_v33, %v2763_v38  ;;  %v6111_v47 = vpop.f32.mrb[8].mxu0  ;;  %v6239_v48 = vpop.f32.mrb[8].mxu1 }
  0xf2   :  { %5839 = vst [vmem:[%s7459_s2 + $0x18] sm:$0xff] %v5215_v41   ;;  %v5210_v50 = vpack.c.bf16 %v2891_v45, %v2890_v40  ;;  %v5530_v51 = vpack.c.bf16 %v3019_v46, %v3018_v43  ;;  %vm2384_vm2 = vcmp.gt.f32.partialorder %v6111_v47, 0.0  ;;  %v2640_v52 = vmul.f32 0.2, %v6111_v47  ;;  %v1383_v53 = vpop.f32.mrb[9].mxu0  ;;  %v1895_v54 = vpop.f32.mrb[9].mxu1 }
  0xf3   :  { %5903 = vst [vmem:[%s7459_s2 + $0x218] sm:$0xff] %v5535_v44   ;;  %vm2512_vm3 = vcmp.gt.f32.partialorder %v6239_v48, 0.0  ;;  %v2768_v56 = vmul.f32 0.2, %v6239_v48  ;;  %v2638_v59 = vmul.f32 0.2, %v1383_v53 }
  0xf4   :  { %5838 = vst [vmem:[%s7459_s2 + $0x10] sm:$0xff] %v5210_v50   ;;  %5902 = vst [vmem:[%s7459_s2 + $0x210] sm:$0xff] %v5530_v51   ;;  %v2766_v60 = vmul.f32 0.2, %v1895_v54  ;;  %v6112_v61 = vpop.f32.mrb[10].mxu0  ;;  %v6240_v62 = vpop.f32.mrb[10].mxu1  ;;  %v2896_v63 = vsel %vm2384_vm2, %v6111_v47, %v2640_v52 }
  0xf5   :  { %vm2382_vm4 = vcmp.gt.f32.partialorder %v1383_v53, 0.0  ;;  %vm2385_vm5 = vcmp.gt.f32.partialorder %v6112_v61, 0.0  ;;  %v2641_v0 = vmul.f32 0.2, %v6112_v61  ;;  %v1386_v1 = vpop.f32.mrb[11].mxu0  ;;  %v1898_v2 = vpop.f32.mrb[11].mxu1  ;;  %v3024_v7 = vsel %vm2512_vm3, %v6239_v48, %v2768_v56 }
  0xf6   :  { %vm2510_vm6 = vcmp.gt.f32.partialorder %v1895_v54, 0.0  ;;  %vm2513_vm7 = vcmp.gt.f32.partialorder %v6240_v62, 0.0  ;;  %v2769_v3 = vmul.f32 0.2, %v6240_v62  ;;  %vm2383_vm8 = vcmp.gt.f32.partialorder %v1386_v1, 0.0  ;;  %6218 = vmatmul.mubr.msk.bf16.gmra.mrb[116].mxu0 %vm932_vm0, %v6484_v49  ;;  %6346 = vmatmul.mubr.msk.bf16.gmra.mrb[116].mxu1 %vm932_vm0, %v6485_v55  ;;  %v6492_v49 = vld [vmem:[%s7458_s0 + $0x1f8] sm:$0xff]  }
  0xf7   :  { %v2897_v4 = vsel %vm2385_vm5, %v6112_v61, %v2641_v0  ;;  %v2639_v5 = vmul.f32 0.2, %v1386_v1  ;;  %vm2511_vm9 = vcmp.gt.f32.partialorder %v1898_v2, 0.0  ;;  %v2767_v6 = vmul.f32 0.2, %v1898_v2  ;;  %6221 = vmatprep.mubr.msk.bf16.mxu0 %vm932_vm0, %v6486_v57  ;;  %6349 = vmatprep.mubr.msk.bf16.mxu1 %vm932_vm0, %v6487_v58  ;;  %v6493_v55 = vld [vmem:[%s7458_s0 + $0x3f8] sm:$0xff]  }
  0xf8   :  { %v2894_v8 = vsel %vm2382_vm4, %v1383_v53, %v2638_v59  ;;  %v5225_v9 = vpack.c.bf16 %v2897_v4, %v2896_v63  ;;  %v3025_v10 = vsel %vm2513_vm7, %v6240_v62, %v2769_v3  ;;  %v3022_v11 = vsel %vm2510_vm6, %v1895_v54, %v2766_v60 }
  0xf9   :  { %v5545_v12 = vpack.c.bf16 %v3025_v10, %v3024_v7  ;;  %v2895_v13 = vsel %vm2383_vm8, %v1386_v1, %v2639_v5  ;;  %v3023_v14 = vsel %vm2511_vm9, %v1898_v2, %v2767_v6  ;;  %v6115_v15 = vpop.f32.mrb[12].mxu0  ;;  %v6243_v16 = vpop.f32.mrb[12].mxu1 }
  0xfa   :  { %5841 = vst [vmem:[%s7459_s2 + $0x28] sm:$0xff] %v5225_v9   ;;  %v5220_v18 = vpack.c.bf16 %v2895_v13, %v2894_v8  ;;  %v5540_v19 = vpack.c.bf16 %v3023_v14, %v3022_v11  ;;  %vm2388_vm10 = vcmp.gt.f32.partialorder %v6115_v15, 0.0  ;;  %v2644_v20 = vmul.f32 0.2, %v6115_v15  ;;  %v1399_v21 = vpop.f32.mrb[13].mxu0  ;;  %v1911_v22 = vpop.f32.mrb[13].mxu1 }
  0xfb   :  { %5905 = vst [vmem:[%s7459_s2 + $0x228] sm:$0xff] %v5545_v12   ;;  %vm2516_vm11 = vcmp.gt.f32.partialorder %v6243_v16, 0.0  ;;  %v2772_v24 = vmul.f32 0.2, %v6243_v16  ;;  %v2642_v27 = vmul.f32 0.2, %v1399_v21 }
  0xfc   :  { %5840 = vst [vmem:[%s7459_s2 + $0x20] sm:$0xff] %v5220_v18   ;;  %5904 = vst [vmem:[%s7459_s2 + $0x220] sm:$0xff] %v5540_v19   ;;  %v2770_v28 = vmul.f32 0.2, %v1911_v22  ;;  %v6116_v29 = vpop.f32.mrb[14].mxu0  ;;  %v6244_v30 = vpop.f32.mrb[14].mxu1  ;;  %v2900_v31 = vsel %vm2388_vm10, %v6115_v15, %v2644_v20 }
  0xfd   :  { %vm2386_vm12 = vcmp.gt.f32.partialorder %v1399_v21, 0.0  ;;  %vm2389_vm13 = vcmp.gt.f32.partialorder %v6116_v29, 0.0  ;;  %v2645_v32 = vmul.f32 0.2, %v6116_v29  ;;  %v1402_v33 = vpop.f32.mrb[15].mxu0  ;;  %v1914_v34 = vpop.f32.mrb[15].mxu1  ;;  %v3028_v39 = vsel %vm2516_vm11, %v6243_v16, %v2772_v24 }
  0xfe   :  { %vm2514_vm14 = vcmp.gt.f32.partialorder %v1911_v22, 0.0  ;;  %vm2517_vm15 = vcmp.gt.f32.partialorder %v6244_v30, 0.0  ;;  %v2773_v35 = vmul.f32 0.2, %v6244_v30  ;;  %vm2387_vm1 = vcmp.gt.f32.partialorder %v1402_v33, 0.0  ;;  %6222 = vmatmul.mubr.msk.bf16.gmra.mrb[120].mxu0 %vm932_vm0, %v6488_v17  ;;  %6350 = vmatmul.mubr.msk.bf16.gmra.mrb[120].mxu1 %vm932_vm0, %v6489_v23 }
  0xff   :  { %v2901_v36 = vsel %vm2389_vm13, %v6116_v29, %v2645_v32  ;;  %v2643_v37 = vmul.f32 0.2, %v1402_v33  ;;  %vm2515_vm2 = vcmp.gt.f32.partialorder %v1914_v34, 0.0  ;;  %v2771_v38 = vmul.f32 0.2, %v1914_v34  ;;  %6225 = vmatprep.mubr.msk.bf16.mxu0 %vm932_vm0, %v6490_v25  ;;  %6353 = vmatprep.mubr.msk.bf16.mxu1 %vm932_vm0, %v6491_v26 }
 0x100   :  { %v2898_v40 = vsel %vm2386_vm12, %v1399_v21, %v2642_v27  ;;  %v5235_v41 = vpack.c.bf16 %v2901_v36, %v2900_v31  ;;  %v3029_v42 = vsel %vm2517_vm15, %v6244_v30, %v2773_v35  ;;  %v3026_v43 = vsel %vm2514_vm14, %v1911_v22, %v2770_v28 }
 0x101   :  { %v5555_v44 = vpack.c.bf16 %v3029_v42, %v3028_v39  ;;  %v2899_v45 = vsel %vm2387_vm1, %v1402_v33, %v2643_v37  ;;  %v3027_v46 = vsel %vm2515_vm2, %v1914_v34, %v2771_v38  ;;  %v6119_v47 = vpop.f32.mrb[16].mxu0  ;;  %v6247_v48 = vpop.f32.mrb[16].mxu1 }
 0x102   :  { %5843 = vst [vmem:[%s7459_s2 + $0x38] sm:$0xff] %v5235_v41   ;;  %v5230_v50 = vpack.c.bf16 %v2899_v45, %v2898_v40  ;;  %v5550_v51 = vpack.c.bf16 %v3027_v46, %v3026_v43  ;;  %vm2392_vm3 = vcmp.gt.f32.partialorder %v6119_v47, 0.0  ;;  %v2648_v52 = vmul.f32 0.2, %v6119_v47  ;;  %v1415_v53 = vpop.f32.mrb[17].mxu0  ;;  %v1927_v54 = vpop.f32.mrb[17].mxu1 }
 0x103   :  { %5907 = vst [vmem:[%s7459_s2 + $0x238] sm:$0xff] %v5555_v44   ;;  %vm2520_vm4 = vcmp.gt.f32.partialorder %v6247_v48, 0.0  ;;  %v2776_v56 = vmul.f32 0.2, %v6247_v48  ;;  %v2646_v57 = vmul.f32 0.2, %v1415_v53 }
 0x104   :  { %5842 = vst [vmem:[%s7459_s2 + $0x30] sm:$0xff] %v5230_v50   ;;  %5906 = vst [vmem:[%s7459_s2 + $0x230] sm:$0xff] %v5550_v51   ;;  %v2774_v58 = vmul.f32 0.2, %v1927_v54  ;;  %v6120_v59 = vpop.f32.mrb[18].mxu0  ;;  %v6248_v60 = vpop.f32.mrb[18].mxu1  ;;  %v2904_v61 = vsel %vm2392_vm3, %v6119_v47, %v2648_v52 }
 0x105   :  { %vm2390_vm5 = vcmp.gt.f32.partialorder %v1415_v53, 0.0  ;;  %vm2393_vm6 = vcmp.gt.f32.partialorder %v6120_v59, 0.0  ;;  %v2649_v62 = vmul.f32 0.2, %v6120_v59  ;;  %v1418_v63 = vpop.f32.mrb[19].mxu0  ;;  %v1930_v0 = vpop.f32.mrb[19].mxu1  ;;  %v3032_v5 = vsel %vm2520_vm4, %v6247_v48, %v2776_v56 }
 0x106   :  { %vm2518_vm7 = vcmp.gt.f32.partialorder %v1927_v54, 0.0  ;;  %vm2521_vm8 = vcmp.gt.f32.partialorder %v6248_v60, 0.0  ;;  %v2777_v1 = vmul.f32 0.2, %v6248_v60  ;;  %vm2391_vm9 = vcmp.gt.f32.partialorder %v1418_v63, 0.0  ;;  %6226 = vmatmul.mubr.msk.bf16.gmra.mrb[124].mxu0 %vm932_vm0, %v6492_v49  ;;  %6354 = vmatmul.mubr.msk.bf16.gmra.mrb[124].mxu1 %vm932_vm0, %v6493_v55 }
 0x107   :  { %v2905_v2 = vsel %vm2393_vm6, %v6120_v59, %v2649_v62  ;;  %v2647_v3 = vmul.f32 0.2, %v1418_v63  ;;  %vm2519_vm10 = vcmp.gt.f32.partialorder %v1930_v0, 0.0  ;;  %v2775_v4 = vmul.f32 0.2, %v1930_v0 }
 0x108   :  { %v2902_v6 = vsel %vm2390_vm5, %v1415_v53, %v2646_v57  ;;  %v5245_v7 = vpack.c.bf16 %v2905_v2, %v2904_v61  ;;  %v3033_v8 = vsel %vm2521_vm8, %v6248_v60, %v2777_v1  ;;  %v3030_v9 = vsel %vm2518_vm7, %v1927_v54, %v2774_v58 }
 0x109   :  { %v5565_v10 = vpack.c.bf16 %v3033_v8, %v3032_v5  ;;  %v2903_v11 = vsel %vm2391_vm9, %v1418_v63, %v2647_v3  ;;  %v3031_v12 = vsel %vm2519_vm10, %v1930_v0, %v2775_v4  ;;  %v6123_v13 = vpop.f32.mrb[20].mxu0  ;;  %v6251_v14 = vpop.f32.mrb[20].mxu1 }
 0x10a   :  { %5845 = vst [vmem:[%s7459_s2 + $0x48] sm:$0xff] %v5245_v7   ;;  %v5240_v15 = vpack.c.bf16 %v2903_v11, %v2902_v6  ;;  %v5560_v16 = vpack.c.bf16 %v3031_v12, %v3030_v9  ;;  %vm2396_vm0 = vcmp.gt.f32.partialorder %v6123_v13, 0.0  ;;  %v2652_v17 = vmul.f32 0.2, %v6123_v13  ;;  %v1431_v18 = vpop.f32.mrb[21].mxu0  ;;  %v1943_v19 = vpop.f32.mrb[21].mxu1 }
 0x10b   :  { %5909 = vst [vmem:[%s7459_s2 + $0x248] sm:$0xff] %v5565_v10   ;;  %vm2524_vm11 = vcmp.gt.f32.partialorder %v6251_v14, 0.0  ;;  %v2780_v20 = vmul.f32 0.2, %v6251_v14  ;;  %v2650_v21 = vmul.f32 0.2, %v1431_v18 }
 0x10c   :  { %5844 = vst [vmem:[%s7459_s2 + $0x40] sm:$0xff] %v5240_v15   ;;  %5908 = vst [vmem:[%s7459_s2 + $0x240] sm:$0xff] %v5560_v16   ;;  %v2778_v22 = vmul.f32 0.2, %v1943_v19  ;;  %v6124_v23 = vpop.f32.mrb[22].mxu0  ;;  %v6252_v24 = vpop.f32.mrb[22].mxu1  ;;  %v2908_v25 = vsel %vm2396_vm0, %v6123_v13, %v2652_v17 }
 0x10d   :  { %vm2394_vm12 = vcmp.gt.f32.partialorder %v1431_v18, 0.0  ;;  %vm2397_vm13 = vcmp.gt.f32.partialorder %v6124_v23, 0.0  ;;  %v2653_v26 = vmul.f32 0.2, %v6124_v23  ;;  %v1434_v27 = vpop.f32.mrb[23].mxu0  ;;  %v1946_v28 = vpop.f32.mrb[23].mxu1  ;;  %v3036_v33 = vsel %vm2524_vm11, %v6251_v14, %v2780_v20 }
 0x10e   :  { %vm2522_vm14 = vcmp.gt.f32.partialorder %v1943_v19, 0.0  ;;  %vm2525_vm15 = vcmp.gt.f32.partialorder %v6252_v24, 0.0  ;;  %v2781_v29 = vmul.f32 0.2, %v6252_v24  ;;  %vm2395_vm1 = vcmp.gt.f32.partialorder %v1434_v27, 0.0 }
 0x10f   :  { %v2909_v30 = vsel %vm2397_vm13, %v6124_v23, %v2653_v26  ;;  %v2651_v31 = vmul.f32 0.2, %v1434_v27  ;;  %vm2523_vm2 = vcmp.gt.f32.partialorder %v1946_v28, 0.0  ;;  %v2779_v32 = vmul.f32 0.2, %v1946_v28 }
 0x110   :  { %v2906_v34 = vsel %vm2394_vm12, %v1431_v18, %v2650_v21  ;;  %v5255_v35 = vpack.c.bf16 %v2909_v30, %v2908_v25  ;;  %v3037_v36 = vsel %vm2525_vm15, %v6252_v24, %v2781_v29  ;;  %v3034_v37 = vsel %vm2522_vm14, %v1943_v19, %v2778_v22 }
 0x111   :  { %v5575_v38 = vpack.c.bf16 %v3037_v36, %v3036_v33  ;;  %v2907_v39 = vsel %vm2395_vm1, %v1434_v27, %v2651_v31  ;;  %v3035_v40 = vsel %vm2523_vm2, %v1946_v28, %v2779_v32  ;;  %v6127_v41 = vpop.f32.mrb[24].mxu0  ;;  %v6255_v42 = vpop.f32.mrb[24].mxu1 }
 0x112   :  { %5847 = vst [vmem:[%s7459_s2 + $0x58] sm:$0xff] %v5255_v35   ;;  %v5250_v43 = vpack.c.bf16 %v2907_v39, %v2906_v34  ;;  %v5570_v44 = vpack.c.bf16 %v3035_v40, %v3034_v37  ;;  %vm2400_vm3 = vcmp.gt.f32.partialorder %v6127_v41, 0.0  ;;  %v2656_v45 = vmul.f32 0.2, %v6127_v41  ;;  %v1447_v46 = vpop.f32.mrb[25].mxu0  ;;  %v1959_v47 = vpop.f32.mrb[25].mxu1 }
 0x113   :  { %5911 = vst [vmem:[%s7459_s2 + $0x258] sm:$0xff] %v5575_v38   ;;  %vm2528_vm4 = vcmp.gt.f32.partialorder %v6255_v42, 0.0  ;;  %v2784_v48 = vmul.f32 0.2, %v6255_v42  ;;  %v2654_v49 = vmul.f32 0.2, %v1447_v46 }
 0x114   :  { %5846 = vst [vmem:[%s7459_s2 + $0x50] sm:$0xff] %v5250_v43   ;;  %5910 = vst [vmem:[%s7459_s2 + $0x250] sm:$0xff] %v5570_v44   ;;  %v2782_v50 = vmul.f32 0.2, %v1959_v47  ;;  %v6128_v51 = vpop.f32.mrb[26].mxu0  ;;  %v6256_v52 = vpop.f32.mrb[26].mxu1  ;;  %v2912_v53 = vsel %vm2400_vm3, %v6127_v41, %v2656_v45 }
 0x115   :  { %vm2398_vm5 = vcmp.gt.f32.partialorder %v1447_v46, 0.0  ;;  %vm2401_vm6 = vcmp.gt.f32.partialorder %v6128_v51, 0.0  ;;  %v2657_v54 = vmul.f32 0.2, %v6128_v51  ;;  %v1450_v55 = vpop.f32.mrb[27].mxu0  ;;  %v1962_v56 = vpop.f32.mrb[27].mxu1  ;;  %v3040_v61 = vsel %vm2528_vm4, %v6255_v42, %v2784_v48 }
 0x116   :  { %vm2526_vm7 = vcmp.gt.f32.partialorder %v1959_v47, 0.0  ;;  %vm2529_vm8 = vcmp.gt.f32.partialorder %v6256_v52, 0.0  ;;  %v2785_v57 = vmul.f32 0.2, %v6256_v52  ;;  %vm2399_vm9 = vcmp.gt.f32.partialorder %v1450_v55, 0.0 }
 0x117   :  { %v2913_v58 = vsel %vm2401_vm6, %v6128_v51, %v2657_v54  ;;  %v2655_v59 = vmul.f32 0.2, %v1450_v55  ;;  %vm2527_vm10 = vcmp.gt.f32.partialorder %v1962_v56, 0.0  ;;  %v2783_v60 = vmul.f32 0.2, %v1962_v56 }
 0x118   :  { %v2910_v62 = vsel %vm2398_vm5, %v1447_v46, %v2654_v49  ;;  %v5265_v63 = vpack.c.bf16 %v2913_v58, %v2912_v53  ;;  %v3041_v0 = vsel %vm2529_vm8, %v6256_v52, %v2785_v57  ;;  %v3038_v1 = vsel %vm2526_vm7, %v1959_v47, %v2782_v50 }
 0x119   :  { %v5585_v2 = vpack.c.bf16 %v3041_v0, %v3040_v61  ;;  %v2911_v3 = vsel %vm2399_vm9, %v1450_v55, %v2655_v59  ;;  %v3039_v4 = vsel %vm2527_vm10, %v1962_v56, %v2783_v60  ;;  %v6131_v5 = vpop.f32.mrb[28].mxu0  ;;  %v6259_v6 = vpop.f32.mrb[28].mxu1 }
 0x11a   :  { %5849 = vst [vmem:[%s7459_s2 + $0x68] sm:$0xff] %v5265_v63   ;;  %v5260_v7 = vpack.c.bf16 %v2911_v3, %v2910_v62  ;;  %v5580_v8 = vpack.c.bf16 %v3039_v4, %v3038_v1  ;;  %vm2404_vm0 = vcmp.gt.f32.partialorder %v6131_v5, 0.0  ;;  %v2660_v9 = vmul.f32 0.2, %v6131_v5  ;;  %v1463_v10 = vpop.f32.mrb[29].mxu0  ;;  %v1975_v11 = vpop.f32.mrb[29].mxu1 }
 0x11b   :  { %5913 = vst [vmem:[%s7459_s2 + $0x268] sm:$0xff] %v5585_v2   ;;  %vm2532_vm11 = vcmp.gt.f32.partialorder %v6259_v6, 0.0  ;;  %v2788_v12 = vmul.f32 0.2, %v6259_v6  ;;  %v2658_v13 = vmul.f32 0.2, %v1463_v10 }
 0x11c   :  { %5848 = vst [vmem:[%s7459_s2 + $0x60] sm:$0xff] %v5260_v7   ;;  %5912 = vst [vmem:[%s7459_s2 + $0x260] sm:$0xff] %v5580_v8   ;;  %v2786_v14 = vmul.f32 0.2, %v1975_v11  ;;  %v6132_v15 = vpop.f32.mrb[30].mxu0  ;;  %v6260_v16 = vpop.f32.mrb[30].mxu1  ;;  %v2916_v17 = vsel %vm2404_vm0, %v6131_v5, %v2660_v9 }
 0x11d   :  { %vm2402_vm12 = vcmp.gt.f32.partialorder %v1463_v10, 0.0  ;;  %vm2405_vm13 = vcmp.gt.f32.partialorder %v6132_v15, 0.0  ;;  %v2661_v18 = vmul.f32 0.2, %v6132_v15  ;;  %v1466_v19 = vpop.f32.mrb[31].mxu0  ;;  %v1978_v20 = vpop.f32.mrb[31].mxu1  ;;  %v3044_v25 = vsel %vm2532_vm11, %v6259_v6, %v2788_v12 }
 0x11e   :  { %vm2530_vm14 = vcmp.gt.f32.partialorder %v1975_v11, 0.0  ;;  %vm2533_vm15 = vcmp.gt.f32.partialorder %v6260_v16, 0.0  ;;  %v2789_v21 = vmul.f32 0.2, %v6260_v16  ;;  %vm2403_vm1 = vcmp.gt.f32.partialorder %v1466_v19, 0.0 }
 0x11f   :  { %v2917_v22 = vsel %vm2405_vm13, %v6132_v15, %v2661_v18  ;;  %v2659_v23 = vmul.f32 0.2, %v1466_v19  ;;  %vm2531_vm2 = vcmp.gt.f32.partialorder %v1978_v20, 0.0  ;;  %v2787_v24 = vmul.f32 0.2, %v1978_v20 }
 0x120   :  { %v2914_v26 = vsel %vm2402_vm12, %v1463_v10, %v2658_v13  ;;  %v5275_v27 = vpack.c.bf16 %v2917_v22, %v2916_v17  ;;  %v3045_v28 = vsel %vm2533_vm15, %v6260_v16, %v2789_v21  ;;  %v3042_v29 = vsel %vm2530_vm14, %v1975_v11, %v2786_v14 }
 0x121   :  { %v5595_v30 = vpack.c.bf16 %v3045_v28, %v3044_v25  ;;  %v2915_v31 = vsel %vm2403_vm1, %v1466_v19, %v2659_v23  ;;  %v3043_v32 = vsel %vm2531_vm2, %v1978_v20, %v2787_v24  ;;  %v6135_v33 = vpop.f32.mrb[32].mxu0  ;;  %v6263_v34 = vpop.f32.mrb[32].mxu1 }
 0x122   :  { %5851 = vst [vmem:[%s7459_s2 + $0x78] sm:$0xff] %v5275_v27   ;;  %v5270_v35 = vpack.c.bf16 %v2915_v31, %v2914_v26  ;;  %v5590_v36 = vpack.c.bf16 %v3043_v32, %v3042_v29  ;;  %vm2408_vm3 = vcmp.gt.f32.partialorder %v6135_v33, 0.0  ;;  %v2664_v37 = vmul.f32 0.2, %v6135_v33  ;;  %v1479_v38 = vpop.f32.mrb[33].mxu0  ;;  %v1991_v39 = vpop.f32.mrb[33].mxu1 }
 0x123   :  { %5915 = vst [vmem:[%s7459_s2 + $0x278] sm:$0xff] %v5595_v30   ;;  %vm2536_vm4 = vcmp.gt.f32.partialorder %v6263_v34, 0.0  ;;  %v2792_v40 = vmul.f32 0.2, %v6263_v34  ;;  %v2662_v41 = vmul.f32 0.2, %v1479_v38 }
 0x124   :  { %5850 = vst [vmem:[%s7459_s2 + $0x70] sm:$0xff] %v5270_v35   ;;  %5914 = vst [vmem:[%s7459_s2 + $0x270] sm:$0xff] %v5590_v36   ;;  %v2790_v42 = vmul.f32 0.2, %v1991_v39  ;;  %v6136_v43 = vpop.f32.mrb[34].mxu0  ;;  %v6264_v44 = vpop.f32.mrb[34].mxu1  ;;  %v2920_v45 = vsel %vm2408_vm3, %v6135_v33, %v2664_v37 }
 0x125   :  { %vm2406_vm5 = vcmp.gt.f32.partialorder %v1479_v38, 0.0  ;;  %vm2409_vm6 = vcmp.gt.f32.partialorder %v6136_v43, 0.0  ;;  %v2665_v46 = vmul.f32 0.2, %v6136_v43  ;;  %v1482_v47 = vpop.f32.mrb[35].mxu0  ;;  %v1994_v48 = vpop.f32.mrb[35].mxu1  ;;  %v3048_v53 = vsel %vm2536_vm4, %v6263_v34, %v2792_v40 }
 0x126   :  { %vm2534_vm7 = vcmp.gt.f32.partialorder %v1991_v39, 0.0  ;;  %vm2537_vm8 = vcmp.gt.f32.partialorder %v6264_v44, 0.0  ;;  %v2793_v49 = vmul.f32 0.2, %v6264_v44  ;;  %vm2407_vm9 = vcmp.gt.f32.partialorder %v1482_v47, 0.0 }
 0x127   :  { %v2921_v50 = vsel %vm2409_vm6, %v6136_v43, %v2665_v46  ;;  %v2663_v51 = vmul.f32 0.2, %v1482_v47  ;;  %vm2535_vm10 = vcmp.gt.f32.partialorder %v1994_v48, 0.0  ;;  %v2791_v52 = vmul.f32 0.2, %v1994_v48 }
 0x128   :  { %v2918_v54 = vsel %vm2406_vm5, %v1479_v38, %v2662_v41  ;;  %v5285_v55 = vpack.c.bf16 %v2921_v50, %v2920_v45  ;;  %v3049_v56 = vsel %vm2537_vm8, %v6264_v44, %v2793_v49  ;;  %v3046_v57 = vsel %vm2534_vm7, %v1991_v39, %v2790_v42 }
 0x129   :  { %v5605_v58 = vpack.c.bf16 %v3049_v56, %v3048_v53  ;;  %v2919_v59 = vsel %vm2407_vm9, %v1482_v47, %v2663_v51  ;;  %v3047_v60 = vsel %vm2535_vm10, %v1994_v48, %v2791_v52  ;;  %v6139_v61 = vpop.f32.mrb[36].mxu0  ;;  %v6267_v62 = vpop.f32.mrb[36].mxu1 }
 0x12a   :  { %5853 = vst [vmem:[%s7459_s2 + $0x88] sm:$0xff] %v5285_v55   ;;  %v5280_v63 = vpack.c.bf16 %v2919_v59, %v2918_v54  ;;  %v5600_v0 = vpack.c.bf16 %v3047_v60, %v3046_v57  ;;  %vm2412_vm0 = vcmp.gt.f32.partialorder %v6139_v61, 0.0  ;;  %v2668_v1 = vmul.f32 0.2, %v6139_v61  ;;  %v1495_v2 = vpop.f32.mrb[37].mxu0  ;;  %v2007_v3 = vpop.f32.mrb[37].mxu1 }
 0x12b   :  { %5917 = vst [vmem:[%s7459_s2 + $0x288] sm:$0xff] %v5605_v58   ;;  %vm2540_vm11 = vcmp.gt.f32.partialorder %v6267_v62, 0.0  ;;  %v2796_v4 = vmul.f32 0.2, %v6267_v62  ;;  %v2666_v5 = vmul.f32 0.2, %v1495_v2 }
 0x12c   :  { %5852 = vst [vmem:[%s7459_s2 + $0x80] sm:$0xff] %v5280_v63   ;;  %5916 = vst [vmem:[%s7459_s2 + $0x280] sm:$0xff] %v5600_v0   ;;  %v2794_v6 = vmul.f32 0.2, %v2007_v3  ;;  %v6140_v7 = vpop.f32.mrb[38].mxu0  ;;  %v6268_v8 = vpop.f32.mrb[38].mxu1  ;;  %v2924_v9 = vsel %vm2412_vm0, %v6139_v61, %v2668_v1 }
 0x12d   :  { %vm2410_vm12 = vcmp.gt.f32.partialorder %v1495_v2, 0.0  ;;  %vm2413_vm13 = vcmp.gt.f32.partialorder %v6140_v7, 0.0  ;;  %v2669_v10 = vmul.f32 0.2, %v6140_v7  ;;  %v1498_v11 = vpop.f32.mrb[39].mxu0  ;;  %v2010_v12 = vpop.f32.mrb[39].mxu1  ;;  %v3052_v17 = vsel %vm2540_vm11, %v6267_v62, %v2796_v4 }
 0x12e   :  { %vm2538_vm14 = vcmp.gt.f32.partialorder %v2007_v3, 0.0  ;;  %vm2541_vm15 = vcmp.gt.f32.partialorder %v6268_v8, 0.0  ;;  %v2797_v13 = vmul.f32 0.2, %v6268_v8  ;;  %vm2411_vm1 = vcmp.gt.f32.partialorder %v1498_v11, 0.0 }
 0x12f   :  { %v2925_v14 = vsel %vm2413_vm13, %v6140_v7, %v2669_v10  ;;  %v2667_v15 = vmul.f32 0.2, %v1498_v11  ;;  %vm2539_vm2 = vcmp.gt.f32.partialorder %v2010_v12, 0.0  ;;  %v2795_v16 = vmul.f32 0.2, %v2010_v12 }
 0x130   :  { %v2922_v18 = vsel %vm2410_vm12, %v1495_v2, %v2666_v5  ;;  %v5295_v19 = vpack.c.bf16 %v2925_v14, %v2924_v9  ;;  %v3053_v20 = vsel %vm2541_vm15, %v6268_v8, %v2797_v13  ;;  %v3050_v21 = vsel %vm2538_vm14, %v2007_v3, %v2794_v6 }
 0x131   :  { %v5615_v22 = vpack.c.bf16 %v3053_v20, %v3052_v17  ;;  %v2923_v23 = vsel %vm2411_vm1, %v1498_v11, %v2667_v15  ;;  %v3051_v24 = vsel %vm2539_vm2, %v2010_v12, %v2795_v16  ;;  %v6143_v25 = vpop.f32.mrb[40].mxu0  ;;  %v6271_v26 = vpop.f32.mrb[40].mxu1 }
 0x132   :  { %5855 = vst [vmem:[%s7459_s2 + $0x98] sm:$0xff] %v5295_v19   ;;  %v5290_v27 = vpack.c.bf16 %v2923_v23, %v2922_v18  ;;  %v5610_v28 = vpack.c.bf16 %v3051_v24, %v3050_v21  ;;  %vm2416_vm3 = vcmp.gt.f32.partialorder %v6143_v25, 0.0  ;;  %v2672_v29 = vmul.f32 0.2, %v6143_v25  ;;  %v1511_v30 = vpop.f32.mrb[41].mxu0  ;;  %v2023_v31 = vpop.f32.mrb[41].mxu1 }
 0x133   :  { %5919 = vst [vmem:[%s7459_s2 + $0x298] sm:$0xff] %v5615_v22   ;;  %vm2544_vm4 = vcmp.gt.f32.partialorder %v6271_v26, 0.0  ;;  %v2800_v32 = vmul.f32 0.2, %v6271_v26  ;;  %v2670_v33 = vmul.f32 0.2, %v1511_v30 }
 0x134   :  { %5854 = vst [vmem:[%s7459_s2 + $0x90] sm:$0xff] %v5290_v27   ;;  %5918 = vst [vmem:[%s7459_s2 + $0x290] sm:$0xff] %v5610_v28   ;;  %v2798_v34 = vmul.f32 0.2, %v2023_v31  ;;  %v6144_v35 = vpop.f32.mrb[42].mxu0  ;;  %v6272_v36 = vpop.f32.mrb[42].mxu1  ;;  %v2928_v37 = vsel %vm2416_vm3, %v6143_v25, %v2672_v29 }
 0x135   :  { %vm2414_vm5 = vcmp.gt.f32.partialorder %v1511_v30, 0.0  ;;  %vm2417_vm6 = vcmp.gt.f32.partialorder %v6144_v35, 0.0  ;;  %v2673_v38 = vmul.f32 0.2, %v6144_v35  ;;  %v1514_v39 = vpop.f32.mrb[43].mxu0  ;;  %v2026_v40 = vpop.f32.mrb[43].mxu1  ;;  %v3056_v45 = vsel %vm2544_vm4, %v6271_v26, %v2800_v32 }
 0x136   :  { %vm2542_vm7 = vcmp.gt.f32.partialorder %v2023_v31, 0.0  ;;  %vm2545_vm8 = vcmp.gt.f32.partialorder %v6272_v36, 0.0  ;;  %v2801_v41 = vmul.f32 0.2, %v6272_v36  ;;  %vm2415_vm9 = vcmp.gt.f32.partialorder %v1514_v39, 0.0 }
 0x137   :  { %v2929_v42 = vsel %vm2417_vm6, %v6144_v35, %v2673_v38  ;;  %v2671_v43 = vmul.f32 0.2, %v1514_v39  ;;  %vm2543_vm10 = vcmp.gt.f32.partialorder %v2026_v40, 0.0  ;;  %v2799_v44 = vmul.f32 0.2, %v2026_v40 }
 0x138   :  { %v2926_v46 = vsel %vm2414_vm5, %v1511_v30, %v2670_v33  ;;  %v5305_v47 = vpack.c.bf16 %v2929_v42, %v2928_v37  ;;  %v3057_v48 = vsel %vm2545_vm8, %v6272_v36, %v2801_v41  ;;  %v3054_v49 = vsel %vm2542_vm7, %v2023_v31, %v2798_v34 }
 0x139   :  { %v5625_v50 = vpack.c.bf16 %v3057_v48, %v3056_v45  ;;  %v2927_v51 = vsel %vm2415_vm9, %v1514_v39, %v2671_v43  ;;  %v3055_v52 = vsel %vm2543_vm10, %v2026_v40, %v2799_v44  ;;  %v6147_v53 = vpop.f32.mrb[44].mxu0  ;;  %v6275_v54 = vpop.f32.mrb[44].mxu1 }
 0x13a   :  { %5857 = vst [vmem:[%s7459_s2 + $0xa8] sm:$0xff] %v5305_v47   ;;  %v5300_v55 = vpack.c.bf16 %v2927_v51, %v2926_v46  ;;  %v5620_v56 = vpack.c.bf16 %v3055_v52, %v3054_v49  ;;  %vm2420_vm0 = vcmp.gt.f32.partialorder %v6147_v53, 0.0  ;;  %v2676_v57 = vmul.f32 0.2, %v6147_v53  ;;  %v1527_v58 = vpop.f32.mrb[45].mxu0  ;;  %v2039_v59 = vpop.f32.mrb[45].mxu1 }
 0x13b   :  { %5921 = vst [vmem:[%s7459_s2 + $0x2a8] sm:$0xff] %v5625_v50   ;;  %vm2548_vm11 = vcmp.gt.f32.partialorder %v6275_v54, 0.0  ;;  %v2804_v60 = vmul.f32 0.2, %v6275_v54  ;;  %v2674_v61 = vmul.f32 0.2, %v1527_v58 }
 0x13c   :  { %5856 = vst [vmem:[%s7459_s2 + $0xa0] sm:$0xff] %v5300_v55   ;;  %5920 = vst [vmem:[%s7459_s2 + $0x2a0] sm:$0xff] %v5620_v56   ;;  %v2802_v62 = vmul.f32 0.2, %v2039_v59  ;;  %v6148_v63 = vpop.f32.mrb[46].mxu0  ;;  %v6276_v0 = vpop.f32.mrb[46].mxu1  ;;  %v2932_v1 = vsel %vm2420_vm0, %v6147_v53, %v2676_v57 }
 0x13d   :  { %vm2418_vm12 = vcmp.gt.f32.partialorder %v1527_v58, 0.0  ;;  %vm2421_vm13 = vcmp.gt.f32.partialorder %v6148_v63, 0.0  ;;  %v2677_v2 = vmul.f32 0.2, %v6148_v63  ;;  %v1530_v3 = vpop.f32.mrb[47].mxu0  ;;  %v2042_v4 = vpop.f32.mrb[47].mxu1  ;;  %v3060_v9 = vsel %vm2548_vm11, %v6275_v54, %v2804_v60 }
 0x13e   :  { %vm2546_vm14 = vcmp.gt.f32.partialorder %v2039_v59, 0.0  ;;  %vm2549_vm15 = vcmp.gt.f32.partialorder %v6276_v0, 0.0  ;;  %v2805_v5 = vmul.f32 0.2, %v6276_v0  ;;  %vm2419_vm1 = vcmp.gt.f32.partialorder %v1530_v3, 0.0 }
 0x13f   :  { %v2933_v6 = vsel %vm2421_vm13, %v6148_v63, %v2677_v2  ;;  %v2675_v7 = vmul.f32 0.2, %v1530_v3  ;;  %vm2547_vm2 = vcmp.gt.f32.partialorder %v2042_v4, 0.0  ;;  %v2803_v8 = vmul.f32 0.2, %v2042_v4 }
 0x140   :  { %v2930_v10 = vsel %vm2418_vm12, %v1527_v58, %v2674_v61  ;;  %v5315_v11 = vpack.c.bf16 %v2933_v6, %v2932_v1  ;;  %v3061_v12 = vsel %vm2549_vm15, %v6276_v0, %v2805_v5  ;;  %v3058_v13 = vsel %vm2546_vm14, %v2039_v59, %v2802_v62 }
 0x141   :  { %v5635_v14 = vpack.c.bf16 %v3061_v12, %v3060_v9  ;;  %v2931_v15 = vsel %vm2419_vm1, %v1530_v3, %v2675_v7  ;;  %v3059_v16 = vsel %vm2547_vm2, %v2042_v4, %v2803_v8  ;;  %v6151_v17 = vpop.f32.mrb[48].mxu0  ;;  %v6279_v18 = vpop.f32.mrb[48].mxu1 }
 0x142   :  { %5859 = vst [vmem:[%s7459_s2 + $0xb8] sm:$0xff] %v5315_v11   ;;  %v5310_v19 = vpack.c.bf16 %v2931_v15, %v2930_v10  ;;  %v5630_v20 = vpack.c.bf16 %v3059_v16, %v3058_v13  ;;  %vm2424_vm3 = vcmp.gt.f32.partialorder %v6151_v17, 0.0  ;;  %v2680_v21 = vmul.f32 0.2, %v6151_v17  ;;  %v1543_v22 = vpop.f32.mrb[49].mxu0  ;;  %v2055_v23 = vpop.f32.mrb[49].mxu1 }
 0x143   :  { %5923 = vst [vmem:[%s7459_s2 + $0x2b8] sm:$0xff] %v5635_v14   ;;  %vm2552_vm4 = vcmp.gt.f32.partialorder %v6279_v18, 0.0  ;;  %v2808_v24 = vmul.f32 0.2, %v6279_v18  ;;  %v2678_v25 = vmul.f32 0.2, %v1543_v22 }
 0x144   :  { %5858 = vst [vmem:[%s7459_s2 + $0xb0] sm:$0xff] %v5310_v19   ;;  %5922 = vst [vmem:[%s7459_s2 + $0x2b0] sm:$0xff] %v5630_v20   ;;  %v2806_v26 = vmul.f32 0.2, %v2055_v23  ;;  %v6152_v27 = vpop.f32.mrb[50].mxu0  ;;  %v6280_v28 = vpop.f32.mrb[50].mxu1  ;;  %v2936_v29 = vsel %vm2424_vm3, %v6151_v17, %v2680_v21 }
 0x145   :  { %vm2422_vm5 = vcmp.gt.f32.partialorder %v1543_v22, 0.0  ;;  %vm2425_vm6 = vcmp.gt.f32.partialorder %v6152_v27, 0.0  ;;  %v2681_v30 = vmul.f32 0.2, %v6152_v27  ;;  %v1546_v31 = vpop.f32.mrb[51].mxu0  ;;  %v2058_v32 = vpop.f32.mrb[51].mxu1  ;;  %v3064_v37 = vsel %vm2552_vm4, %v6279_v18, %v2808_v24 }
 0x146   :  { %vm2550_vm7 = vcmp.gt.f32.partialorder %v2055_v23, 0.0  ;;  %vm2553_vm8 = vcmp.gt.f32.partialorder %v6280_v28, 0.0  ;;  %v2809_v33 = vmul.f32 0.2, %v6280_v28  ;;  %vm2423_vm9 = vcmp.gt.f32.partialorder %v1546_v31, 0.0 }
 0x147   :  { %v2937_v34 = vsel %vm2425_vm6, %v6152_v27, %v2681_v30  ;;  %v2679_v35 = vmul.f32 0.2, %v1546_v31  ;;  %vm2551_vm10 = vcmp.gt.f32.partialorder %v2058_v32, 0.0  ;;  %v2807_v36 = vmul.f32 0.2, %v2058_v32 }
 0x148   :  { %v2934_v38 = vsel %vm2422_vm5, %v1543_v22, %v2678_v25  ;;  %v5325_v39 = vpack.c.bf16 %v2937_v34, %v2936_v29  ;;  %v3065_v40 = vsel %vm2553_vm8, %v6280_v28, %v2809_v33  ;;  %v3062_v41 = vsel %vm2550_vm7, %v2055_v23, %v2806_v26 }
 0x149   :  { %v5645_v42 = vpack.c.bf16 %v3065_v40, %v3064_v37  ;;  %v2935_v43 = vsel %vm2423_vm9, %v1546_v31, %v2679_v35  ;;  %v3063_v44 = vsel %vm2551_vm10, %v2058_v32, %v2807_v36  ;;  %v6155_v45 = vpop.f32.mrb[52].mxu0  ;;  %v6283_v46 = vpop.f32.mrb[52].mxu1 }
 0x14a   :  { %5861 = vst [vmem:[%s7459_s2 + $0xc8] sm:$0xff] %v5325_v39   ;;  %v5320_v47 = vpack.c.bf16 %v2935_v43, %v2934_v38  ;;  %v5640_v48 = vpack.c.bf16 %v3063_v44, %v3062_v41  ;;  %vm2428_vm0 = vcmp.gt.f32.partialorder %v6155_v45, 0.0  ;;  %v2684_v49 = vmul.f32 0.2, %v6155_v45  ;;  %v1559_v50 = vpop.f32.mrb[53].mxu0  ;;  %v2071_v51 = vpop.f32.mrb[53].mxu1 }
 0x14b   :  { %5925 = vst [vmem:[%s7459_s2 + $0x2c8] sm:$0xff] %v5645_v42   ;;  %vm2556_vm11 = vcmp.gt.f32.partialorder %v6283_v46, 0.0  ;;  %v2812_v52 = vmul.f32 0.2, %v6283_v46  ;;  %v2682_v53 = vmul.f32 0.2, %v1559_v50 }
 0x14c   :  { %5860 = vst [vmem:[%s7459_s2 + $0xc0] sm:$0xff] %v5320_v47   ;;  %5924 = vst [vmem:[%s7459_s2 + $0x2c0] sm:$0xff] %v5640_v48   ;;  %v2810_v54 = vmul.f32 0.2, %v2071_v51  ;;  %v6156_v55 = vpop.f32.mrb[54].mxu0  ;;  %v6284_v56 = vpop.f32.mrb[54].mxu1  ;;  %v2940_v57 = vsel %vm2428_vm0, %v6155_v45, %v2684_v49 }
 0x14d   :  { %vm2426_vm12 = vcmp.gt.f32.partialorder %v1559_v50, 0.0  ;;  %vm2429_vm13 = vcmp.gt.f32.partialorder %v6156_v55, 0.0  ;;  %v2685_v58 = vmul.f32 0.2, %v6156_v55  ;;  %v1562_v59 = vpop.f32.mrb[55].mxu0  ;;  %v2074_v60 = vpop.f32.mrb[55].mxu1  ;;  %v3068_v1 = vsel %vm2556_vm11, %v6283_v46, %v2812_v52 }
 0x14e   :  { %vm2554_vm14 = vcmp.gt.f32.partialorder %v2071_v51, 0.0  ;;  %vm2557_vm15 = vcmp.gt.f32.partialorder %v6284_v56, 0.0  ;;  %v2813_v61 = vmul.f32 0.2, %v6284_v56  ;;  %vm2427_vm1 = vcmp.gt.f32.partialorder %v1562_v59, 0.0 }
 0x14f   :  { %v2941_v62 = vsel %vm2429_vm13, %v6156_v55, %v2685_v58  ;;  %v2683_v63 = vmul.f32 0.2, %v1562_v59  ;;  %vm2555_vm2 = vcmp.gt.f32.partialorder %v2074_v60, 0.0  ;;  %v2811_v0 = vmul.f32 0.2, %v2074_v60 }
 0x150   :  { %v2938_v2 = vsel %vm2426_vm12, %v1559_v50, %v2682_v53  ;;  %v5335_v3 = vpack.c.bf16 %v2941_v62, %v2940_v57  ;;  %v3069_v4 = vsel %vm2557_vm15, %v6284_v56, %v2813_v61  ;;  %v3066_v5 = vsel %vm2554_vm14, %v2071_v51, %v2810_v54 }
 0x151   :  { %v5655_v6 = vpack.c.bf16 %v3069_v4, %v3068_v1  ;;  %v2939_v7 = vsel %vm2427_vm1, %v1562_v59, %v2683_v63  ;;  %v3067_v8 = vsel %vm2555_vm2, %v2074_v60, %v2811_v0  ;;  %v6159_v9 = vpop.f32.mrb[56].mxu0  ;;  %v6287_v10 = vpop.f32.mrb[56].mxu1 }
 0x152   :  { %5863 = vst [vmem:[%s7459_s2 + $0xd8] sm:$0xff] %v5335_v3   ;;  %v5330_v11 = vpack.c.bf16 %v2939_v7, %v2938_v2  ;;  %v5650_v12 = vpack.c.bf16 %v3067_v8, %v3066_v5  ;;  %vm2432_vm3 = vcmp.gt.f32.partialorder %v6159_v9, 0.0  ;;  %v2688_v13 = vmul.f32 0.2, %v6159_v9  ;;  %v1575_v14 = vpop.f32.mrb[57].mxu0  ;;  %v2087_v15 = vpop.f32.mrb[57].mxu1 }
 0x153   :  { %5927 = vst [vmem:[%s7459_s2 + $0x2d8] sm:$0xff] %v5655_v6   ;;  %vm2560_vm4 = vcmp.gt.f32.partialorder %v6287_v10, 0.0  ;;  %v2816_v16 = vmul.f32 0.2, %v6287_v10  ;;  %v2686_v17 = vmul.f32 0.2, %v1575_v14 }
 0x154   :  { %5862 = vst [vmem:[%s7459_s2 + $0xd0] sm:$0xff] %v5330_v11   ;;  %5926 = vst [vmem:[%s7459_s2 + $0x2d0] sm:$0xff] %v5650_v12   ;;  %v2814_v18 = vmul.f32 0.2, %v2087_v15  ;;  %v6160_v19 = vpop.f32.mrb[58].mxu0  ;;  %v6288_v20 = vpop.f32.mrb[58].mxu1  ;;  %v2944_v21 = vsel %vm2432_vm3, %v6159_v9, %v2688_v13 }
 0x155   :  { %vm2430_vm5 = vcmp.gt.f32.partialorder %v1575_v14, 0.0  ;;  %vm2433_vm6 = vcmp.gt.f32.partialorder %v6160_v19, 0.0  ;;  %v2689_v22 = vmul.f32 0.2, %v6160_v19  ;;  %v1578_v23 = vpop.f32.mrb[59].mxu0  ;;  %v2090_v24 = vpop.f32.mrb[59].mxu1  ;;  %v3072_v29 = vsel %vm2560_vm4, %v6287_v10, %v2816_v16 }
 0x156   :  { %vm2558_vm7 = vcmp.gt.f32.partialorder %v2087_v15, 0.0  ;;  %vm2561_vm8 = vcmp.gt.f32.partialorder %v6288_v20, 0.0  ;;  %v2817_v25 = vmul.f32 0.2, %v6288_v20  ;;  %vm2431_vm9 = vcmp.gt.f32.partialorder %v1578_v23, 0.0 }
 0x157   :  { %v2945_v26 = vsel %vm2433_vm6, %v6160_v19, %v2689_v22  ;;  %v2687_v27 = vmul.f32 0.2, %v1578_v23  ;;  %vm2559_vm10 = vcmp.gt.f32.partialorder %v2090_v24, 0.0  ;;  %v2815_v28 = vmul.f32 0.2, %v2090_v24 }
 0x158   :  { %v2942_v30 = vsel %vm2430_vm5, %v1575_v14, %v2686_v17  ;;  %v5345_v31 = vpack.c.bf16 %v2945_v26, %v2944_v21  ;;  %v3073_v32 = vsel %vm2561_vm8, %v6288_v20, %v2817_v25  ;;  %v3070_v33 = vsel %vm2558_vm7, %v2087_v15, %v2814_v18 }
 0x159   :  { %v5665_v34 = vpack.c.bf16 %v3073_v32, %v3072_v29  ;;  %v2943_v35 = vsel %vm2431_vm9, %v1578_v23, %v2687_v27  ;;  %v3071_v36 = vsel %vm2559_vm10, %v2090_v24, %v2815_v28  ;;  %v6163_v37 = vpop.f32.mrb[60].mxu0  ;;  %v6291_v38 = vpop.f32.mrb[60].mxu1 }
 0x15a   :  { %5865 = vst [vmem:[%s7459_s2 + $0xe8] sm:$0xff] %v5345_v31   ;;  %v5340_v39 = vpack.c.bf16 %v2943_v35, %v2942_v30  ;;  %v5660_v40 = vpack.c.bf16 %v3071_v36, %v3070_v33  ;;  %vm2436_vm0 = vcmp.gt.f32.partialorder %v6163_v37, 0.0  ;;  %v2692_v41 = vmul.f32 0.2, %v6163_v37  ;;  %v1591_v42 = vpop.f32.mrb[61].mxu0  ;;  %v2103_v43 = vpop.f32.mrb[61].mxu1 }
 0x15b   :  { %5929 = vst [vmem:[%s7459_s2 + $0x2e8] sm:$0xff] %v5665_v34   ;;  %vm2564_vm11 = vcmp.gt.f32.partialorder %v6291_v38, 0.0  ;;  %v2820_v44 = vmul.f32 0.2, %v6291_v38  ;;  %v2690_v45 = vmul.f32 0.2, %v1591_v42 }
 0x15c   :  { %5864 = vst [vmem:[%s7459_s2 + $0xe0] sm:$0xff] %v5340_v39   ;;  %5928 = vst [vmem:[%s7459_s2 + $0x2e0] sm:$0xff] %v5660_v40   ;;  %v2818_v46 = vmul.f32 0.2, %v2103_v43  ;;  %v6164_v47 = vpop.f32.mrb[62].mxu0  ;;  %v6292_v48 = vpop.f32.mrb[62].mxu1  ;;  %v2948_v49 = vsel %vm2436_vm0, %v6163_v37, %v2692_v41 }
 0x15d   :  { %vm2434_vm12 = vcmp.gt.f32.partialorder %v1591_v42, 0.0  ;;  %vm2437_vm13 = vcmp.gt.f32.partialorder %v6164_v47, 0.0  ;;  %v2693_v50 = vmul.f32 0.2, %v6164_v47  ;;  %v1594_v51 = vpop.f32.mrb[63].mxu0  ;;  %v2106_v52 = vpop.f32.mrb[63].mxu1  ;;  %v3076_v57 = vsel %vm2564_vm11, %v6291_v38, %v2820_v44 }
 0x15e   :  { %vm2562_vm14 = vcmp.gt.f32.partialorder %v2103_v43, 0.0  ;;  %vm2565_vm15 = vcmp.gt.f32.partialorder %v6292_v48, 0.0  ;;  %v2821_v53 = vmul.f32 0.2, %v6292_v48  ;;  %vm2435_vm1 = vcmp.gt.f32.partialorder %v1594_v51, 0.0 }
 0x15f   :  { %v2949_v54 = vsel %vm2437_vm13, %v6164_v47, %v2693_v50  ;;  %v2691_v55 = vmul.f32 0.2, %v1594_v51  ;;  %vm2563_vm2 = vcmp.gt.f32.partialorder %v2106_v52, 0.0  ;;  %v2819_v56 = vmul.f32 0.2, %v2106_v52 }
 0x160   :  { %v2946_v58 = vsel %vm2434_vm12, %v1591_v42, %v2690_v45  ;;  %v5355_v59 = vpack.c.bf16 %v2949_v54, %v2948_v49  ;;  %v3077_v60 = vsel %vm2565_vm15, %v6292_v48, %v2821_v53  ;;  %v3074_v61 = vsel %vm2562_vm14, %v2103_v43, %v2818_v46 }
 0x161   :  { %v5675_v62 = vpack.c.bf16 %v3077_v60, %v3076_v57  ;;  %v2947_v63 = vsel %vm2435_vm1, %v1594_v51, %v2691_v55  ;;  %v3075_v0 = vsel %vm2563_vm2, %v2106_v52, %v2819_v56  ;;  %v6167_v1 = vpop.f32.mrb[64].mxu0  ;;  %v6295_v2 = vpop.f32.mrb[64].mxu1 }
 0x162   :  { %5867 = vst [vmem:[%s7459_s2 + $0xf8] sm:$0xff] %v5355_v59   ;;  %v5350_v3 = vpack.c.bf16 %v2947_v63, %v2946_v58  ;;  %v5670_v4 = vpack.c.bf16 %v3075_v0, %v3074_v61  ;;  %vm2440_vm3 = vcmp.gt.f32.partialorder %v6167_v1, 0.0  ;;  %v2696_v5 = vmul.f32 0.2, %v6167_v1  ;;  %v1607_v6 = vpop.f32.mrb[65].mxu0  ;;  %v2119_v7 = vpop.f32.mrb[65].mxu1 }
 0x163   :  { %5931 = vst [vmem:[%s7459_s2 + $0x2f8] sm:$0xff] %v5675_v62   ;;  %vm2568_vm4 = vcmp.gt.f32.partialorder %v6295_v2, 0.0  ;;  %v2824_v8 = vmul.f32 0.2, %v6295_v2  ;;  %v2694_v9 = vmul.f32 0.2, %v1607_v6 }
 0x164   :  { %5866 = vst [vmem:[%s7459_s2 + $0xf0] sm:$0xff] %v5350_v3   ;;  %5930 = vst [vmem:[%s7459_s2 + $0x2f0] sm:$0xff] %v5670_v4   ;;  %v2822_v10 = vmul.f32 0.2, %v2119_v7  ;;  %v6168_v11 = vpop.f32.mrb[66].mxu0  ;;  %v6296_v12 = vpop.f32.mrb[66].mxu1  ;;  %v2952_v13 = vsel %vm2440_vm3, %v6167_v1, %v2696_v5 }
 0x165   :  { %vm2438_vm5 = vcmp.gt.f32.partialorder %v1607_v6, 0.0  ;;  %vm2441_vm6 = vcmp.gt.f32.partialorder %v6168_v11, 0.0  ;;  %v2697_v14 = vmul.f32 0.2, %v6168_v11  ;;  %v1610_v15 = vpop.f32.mrb[67].mxu0  ;;  %v2122_v16 = vpop.f32.mrb[67].mxu1  ;;  %v3080_v21 = vsel %vm2568_vm4, %v6295_v2, %v2824_v8 }
 0x166   :  { %vm2566_vm7 = vcmp.gt.f32.partialorder %v2119_v7, 0.0  ;;  %vm2569_vm8 = vcmp.gt.f32.partialorder %v6296_v12, 0.0  ;;  %v2825_v17 = vmul.f32 0.2, %v6296_v12  ;;  %vm2439_vm9 = vcmp.gt.f32.partialorder %v1610_v15, 0.0 }
 0x167   :  { %v2953_v18 = vsel %vm2441_vm6, %v6168_v11, %v2697_v14  ;;  %v2695_v19 = vmul.f32 0.2, %v1610_v15  ;;  %vm2567_vm10 = vcmp.gt.f32.partialorder %v2122_v16, 0.0  ;;  %v2823_v20 = vmul.f32 0.2, %v2122_v16 }
 0x168   :  { %v2950_v22 = vsel %vm2438_vm5, %v1607_v6, %v2694_v9  ;;  %v5365_v23 = vpack.c.bf16 %v2953_v18, %v2952_v13  ;;  %v3081_v24 = vsel %vm2569_vm8, %v6296_v12, %v2825_v17  ;;  %v3078_v25 = vsel %vm2566_vm7, %v2119_v7, %v2822_v10 }
 0x169   :  { %v5685_v26 = vpack.c.bf16 %v3081_v24, %v3080_v21  ;;  %v2951_v27 = vsel %vm2439_vm9, %v1610_v15, %v2695_v19  ;;  %v3079_v28 = vsel %vm2567_vm10, %v2122_v16, %v2823_v20  ;;  %v6171_v29 = vpop.f32.mrb[68].mxu0  ;;  %v6299_v30 = vpop.f32.mrb[68].mxu1 }
 0x16a   :  { %5869 = vst [vmem:[%s7459_s2 + $0x108] sm:$0xff] %v5365_v23   ;;  %v5360_v31 = vpack.c.bf16 %v2951_v27, %v2950_v22  ;;  %v5680_v32 = vpack.c.bf16 %v3079_v28, %v3078_v25  ;;  %vm2444_vm0 = vcmp.gt.f32.partialorder %v6171_v29, 0.0  ;;  %v2700_v33 = vmul.f32 0.2, %v6171_v29  ;;  %v1623_v34 = vpop.f32.mrb[69].mxu0  ;;  %v2135_v35 = vpop.f32.mrb[69].mxu1 }
 0x16b   :  { %5933 = vst [vmem:[%s7459_s2 + $0x308] sm:$0xff] %v5685_v26   ;;  %vm2572_vm11 = vcmp.gt.f32.partialorder %v6299_v30, 0.0  ;;  %v2828_v36 = vmul.f32 0.2, %v6299_v30  ;;  %v2698_v37 = vmul.f32 0.2, %v1623_v34 }
 0x16c   :  { %5868 = vst [vmem:[%s7459_s2 + $0x100] sm:$0xff] %v5360_v31   ;;  %5932 = vst [vmem:[%s7459_s2 + $0x300] sm:$0xff] %v5680_v32   ;;  %v2826_v38 = vmul.f32 0.2, %v2135_v35  ;;  %v6172_v39 = vpop.f32.mrb[70].mxu0  ;;  %v6300_v40 = vpop.f32.mrb[70].mxu1  ;;  %v2956_v41 = vsel %vm2444_vm0, %v6171_v29, %v2700_v33 }
 0x16d   :  { %vm2442_vm12 = vcmp.gt.f32.partialorder %v1623_v34, 0.0  ;;  %vm2445_vm13 = vcmp.gt.f32.partialorder %v6172_v39, 0.0  ;;  %v2701_v42 = vmul.f32 0.2, %v6172_v39  ;;  %v1626_v43 = vpop.f32.mrb[71].mxu0  ;;  %v2138_v44 = vpop.f32.mrb[71].mxu1  ;;  %v3084_v49 = vsel %vm2572_vm11, %v6299_v30, %v2828_v36 }
 0x16e   :  { %vm2570_vm14 = vcmp.gt.f32.partialorder %v2135_v35, 0.0  ;;  %vm2573_vm15 = vcmp.gt.f32.partialorder %v6300_v40, 0.0  ;;  %v2829_v45 = vmul.f32 0.2, %v6300_v40  ;;  %vm2443_vm1 = vcmp.gt.f32.partialorder %v1626_v43, 0.0 }
 0x16f   :  { %v2957_v46 = vsel %vm2445_vm13, %v6172_v39, %v2701_v42  ;;  %v2699_v47 = vmul.f32 0.2, %v1626_v43  ;;  %vm2571_vm2 = vcmp.gt.f32.partialorder %v2138_v44, 0.0  ;;  %v2827_v48 = vmul.f32 0.2, %v2138_v44 }
 0x170   :  { %v2954_v50 = vsel %vm2442_vm12, %v1623_v34, %v2698_v37  ;;  %v5375_v51 = vpack.c.bf16 %v2957_v46, %v2956_v41  ;;  %v3085_v52 = vsel %vm2573_vm15, %v6300_v40, %v2829_v45  ;;  %v3082_v53 = vsel %vm2570_vm14, %v2135_v35, %v2826_v38 }
 0x171   :  { %v5695_v54 = vpack.c.bf16 %v3085_v52, %v3084_v49  ;;  %v2955_v55 = vsel %vm2443_vm1, %v1626_v43, %v2699_v47  ;;  %v3083_v56 = vsel %vm2571_vm2, %v2138_v44, %v2827_v48  ;;  %v6175_v57 = vpop.f32.mrb[72].mxu0  ;;  %v6303_v58 = vpop.f32.mrb[72].mxu1 }
 0x172   :  { %5871 = vst [vmem:[%s7459_s2 + $0x118] sm:$0xff] %v5375_v51   ;;  %v5370_v59 = vpack.c.bf16 %v2955_v55, %v2954_v50  ;;  %v5690_v60 = vpack.c.bf16 %v3083_v56, %v3082_v53  ;;  %vm2448_vm3 = vcmp.gt.f32.partialorder %v6175_v57, 0.0  ;;  %v2704_v61 = vmul.f32 0.2, %v6175_v57  ;;  %v1639_v62 = vpop.f32.mrb[73].mxu0  ;;  %v2151_v63 = vpop.f32.mrb[73].mxu1 }
 0x173   :  { %5935 = vst [vmem:[%s7459_s2 + $0x318] sm:$0xff] %v5695_v54   ;;  %vm2576_vm4 = vcmp.gt.f32.partialorder %v6303_v58, 0.0  ;;  %v2832_v0 = vmul.f32 0.2, %v6303_v58  ;;  %v2702_v1 = vmul.f32 0.2, %v1639_v62 }
 0x174   :  { %5870 = vst [vmem:[%s7459_s2 + $0x110] sm:$0xff] %v5370_v59   ;;  %5934 = vst [vmem:[%s7459_s2 + $0x310] sm:$0xff] %v5690_v60   ;;  %v2830_v2 = vmul.f32 0.2, %v2151_v63  ;;  %v6176_v3 = vpop.f32.mrb[74].mxu0  ;;  %v6304_v4 = vpop.f32.mrb[74].mxu1  ;;  %v2960_v5 = vsel %vm2448_vm3, %v6175_v57, %v2704_v61 }
 0x175   :  { %vm2446_vm5 = vcmp.gt.f32.partialorder %v1639_v62, 0.0  ;;  %vm2449_vm6 = vcmp.gt.f32.partialorder %v6176_v3, 0.0  ;;  %v2705_v6 = vmul.f32 0.2, %v6176_v3  ;;  %v1642_v7 = vpop.f32.mrb[75].mxu0  ;;  %v2154_v8 = vpop.f32.mrb[75].mxu1  ;;  %v3088_v13 = vsel %vm2576_vm4, %v6303_v58, %v2832_v0 }
 0x176   :  { %vm2574_vm7 = vcmp.gt.f32.partialorder %v2151_v63, 0.0  ;;  %vm2577_vm8 = vcmp.gt.f32.partialorder %v6304_v4, 0.0  ;;  %v2833_v9 = vmul.f32 0.2, %v6304_v4  ;;  %vm2447_vm9 = vcmp.gt.f32.partialorder %v1642_v7, 0.0 }
 0x177   :  { %v2961_v10 = vsel %vm2449_vm6, %v6176_v3, %v2705_v6  ;;  %v2703_v11 = vmul.f32 0.2, %v1642_v7  ;;  %vm2575_vm10 = vcmp.gt.f32.partialorder %v2154_v8, 0.0  ;;  %v2831_v12 = vmul.f32 0.2, %v2154_v8 }
 0x178   :  { %v2958_v14 = vsel %vm2446_vm5, %v1639_v62, %v2702_v1  ;;  %v5385_v15 = vpack.c.bf16 %v2961_v10, %v2960_v5  ;;  %v3089_v16 = vsel %vm2577_vm8, %v6304_v4, %v2833_v9  ;;  %v3086_v17 = vsel %vm2574_vm7, %v2151_v63, %v2830_v2 }
 0x179   :  { %v5705_v18 = vpack.c.bf16 %v3089_v16, %v3088_v13  ;;  %v2959_v19 = vsel %vm2447_vm9, %v1642_v7, %v2703_v11  ;;  %v3087_v20 = vsel %vm2575_vm10, %v2154_v8, %v2831_v12  ;;  %v6179_v21 = vpop.f32.mrb[76].mxu0  ;;  %v6307_v22 = vpop.f32.mrb[76].mxu1 }
 0x17a   :  { %5873 = vst [vmem:[%s7459_s2 + $0x128] sm:$0xff] %v5385_v15   ;;  %v5380_v23 = vpack.c.bf16 %v2959_v19, %v2958_v14  ;;  %v5700_v24 = vpack.c.bf16 %v3087_v20, %v3086_v17  ;;  %vm2452_vm0 = vcmp.gt.f32.partialorder %v6179_v21, 0.0  ;;  %v2708_v25 = vmul.f32 0.2, %v6179_v21  ;;  %v1655_v26 = vpop.f32.mrb[77].mxu0  ;;  %v2167_v27 = vpop.f32.mrb[77].mxu1 }
 0x17b   :  { %5937 = vst [vmem:[%s7459_s2 + $0x328] sm:$0xff] %v5705_v18   ;;  %vm2580_vm11 = vcmp.gt.f32.partialorder %v6307_v22, 0.0  ;;  %v2836_v28 = vmul.f32 0.2, %v6307_v22  ;;  %v2706_v29 = vmul.f32 0.2, %v1655_v26 }
 0x17c   :  { %5872 = vst [vmem:[%s7459_s2 + $0x120] sm:$0xff] %v5380_v23   ;;  %5936 = vst [vmem:[%s7459_s2 + $0x320] sm:$0xff] %v5700_v24   ;;  %v2834_v30 = vmul.f32 0.2, %v2167_v27  ;;  %v6180_v31 = vpop.f32.mrb[78].mxu0  ;;  %v6308_v32 = vpop.f32.mrb[78].mxu1  ;;  %v2964_v33 = vsel %vm2452_vm0, %v6179_v21, %v2708_v25 }
 0x17d   :  { %vm2450_vm12 = vcmp.gt.f32.partialorder %v1655_v26, 0.0  ;;  %vm2453_vm13 = vcmp.gt.f32.partialorder %v6180_v31, 0.0  ;;  %v2709_v34 = vmul.f32 0.2, %v6180_v31  ;;  %v1658_v35 = vpop.f32.mrb[79].mxu0  ;;  %v2170_v36 = vpop.f32.mrb[79].mxu1  ;;  %v3092_v41 = vsel %vm2580_vm11, %v6307_v22, %v2836_v28 }
 0x17e   :  { %vm2578_vm14 = vcmp.gt.f32.partialorder %v2167_v27, 0.0  ;;  %vm2581_vm15 = vcmp.gt.f32.partialorder %v6308_v32, 0.0  ;;  %v2837_v37 = vmul.f32 0.2, %v6308_v32  ;;  %vm2451_vm1 = vcmp.gt.f32.partialorder %v1658_v35, 0.0 }
 0x17f   :  { %v2965_v38 = vsel %vm2453_vm13, %v6180_v31, %v2709_v34  ;;  %v2707_v39 = vmul.f32 0.2, %v1658_v35  ;;  %vm2579_vm2 = vcmp.gt.f32.partialorder %v2170_v36, 0.0  ;;  %v2835_v40 = vmul.f32 0.2, %v2170_v36 }
 0x180   :  { %v2962_v42 = vsel %vm2450_vm12, %v1655_v26, %v2706_v29  ;;  %v5395_v43 = vpack.c.bf16 %v2965_v38, %v2964_v33  ;;  %v3093_v44 = vsel %vm2581_vm15, %v6308_v32, %v2837_v37  ;;  %v3090_v45 = vsel %vm2578_vm14, %v2167_v27, %v2834_v30 }
 0x181   :  { %v5715_v46 = vpack.c.bf16 %v3093_v44, %v3092_v41  ;;  %v2963_v47 = vsel %vm2451_vm1, %v1658_v35, %v2707_v39  ;;  %v3091_v48 = vsel %vm2579_vm2, %v2170_v36, %v2835_v40  ;;  %v6183_v49 = vpop.f32.mrb[80].mxu0  ;;  %v6311_v50 = vpop.f32.mrb[80].mxu1 }
 0x182   :  { %5875 = vst [vmem:[%s7459_s2 + $0x138] sm:$0xff] %v5395_v43   ;;  %v5390_v51 = vpack.c.bf16 %v2963_v47, %v2962_v42  ;;  %v5710_v52 = vpack.c.bf16 %v3091_v48, %v3090_v45  ;;  %vm2456_vm3 = vcmp.gt.f32.partialorder %v6183_v49, 0.0  ;;  %v2712_v53 = vmul.f32 0.2, %v6183_v49  ;;  %v1671_v54 = vpop.f32.mrb[81].mxu0  ;;  %v2183_v55 = vpop.f32.mrb[81].mxu1 }
 0x183   :  { %5939 = vst [vmem:[%s7459_s2 + $0x338] sm:$0xff] %v5715_v46   ;;  %vm2584_vm4 = vcmp.gt.f32.partialorder %v6311_v50, 0.0  ;;  %v2840_v56 = vmul.f32 0.2, %v6311_v50  ;;  %v2710_v57 = vmul.f32 0.2, %v1671_v54 }
 0x184   :  { %5874 = vst [vmem:[%s7459_s2 + $0x130] sm:$0xff] %v5390_v51   ;;  %5938 = vst [vmem:[%s7459_s2 + $0x330] sm:$0xff] %v5710_v52   ;;  %v2838_v58 = vmul.f32 0.2, %v2183_v55  ;;  %v6184_v59 = vpop.f32.mrb[82].mxu0  ;;  %v6312_v60 = vpop.f32.mrb[82].mxu1  ;;  %v2968_v61 = vsel %vm2456_vm3, %v6183_v49, %v2712_v53 }
 0x185   :  { %vm2454_vm5 = vcmp.gt.f32.partialorder %v1671_v54, 0.0  ;;  %vm2457_vm6 = vcmp.gt.f32.partialorder %v6184_v59, 0.0  ;;  %v2713_v62 = vmul.f32 0.2, %v6184_v59  ;;  %v1674_v63 = vpop.f32.mrb[83].mxu0  ;;  %v2186_v0 = vpop.f32.mrb[83].mxu1  ;;  %v3096_v5 = vsel %vm2584_vm4, %v6311_v50, %v2840_v56 }
 0x186   :  { %vm2582_vm7 = vcmp.gt.f32.partialorder %v2183_v55, 0.0  ;;  %vm2585_vm8 = vcmp.gt.f32.partialorder %v6312_v60, 0.0  ;;  %v2841_v1 = vmul.f32 0.2, %v6312_v60  ;;  %vm2455_vm9 = vcmp.gt.f32.partialorder %v1674_v63, 0.0 }
 0x187   :  { %v2969_v2 = vsel %vm2457_vm6, %v6184_v59, %v2713_v62  ;;  %v2711_v3 = vmul.f32 0.2, %v1674_v63  ;;  %vm2583_vm10 = vcmp.gt.f32.partialorder %v2186_v0, 0.0  ;;  %v2839_v4 = vmul.f32 0.2, %v2186_v0 }
 0x188   :  { %v2966_v6 = vsel %vm2454_vm5, %v1671_v54, %v2710_v57  ;;  %v5405_v7 = vpack.c.bf16 %v2969_v2, %v2968_v61  ;;  %v3097_v8 = vsel %vm2585_vm8, %v6312_v60, %v2841_v1  ;;  %v3094_v9 = vsel %vm2582_vm7, %v2183_v55, %v2838_v58 }
 0x189   :  { %v5725_v10 = vpack.c.bf16 %v3097_v8, %v3096_v5  ;;  %v2967_v11 = vsel %vm2455_vm9, %v1674_v63, %v2711_v3  ;;  %v3095_v12 = vsel %vm2583_vm10, %v2186_v0, %v2839_v4  ;;  %v6187_v13 = vpop.f32.mrb[84].mxu0  ;;  %v6315_v14 = vpop.f32.mrb[84].mxu1 }
 0x18a   :  { %5877 = vst [vmem:[%s7459_s2 + $0x148] sm:$0xff] %v5405_v7   ;;  %v5400_v15 = vpack.c.bf16 %v2967_v11, %v2966_v6  ;;  %v5720_v16 = vpack.c.bf16 %v3095_v12, %v3094_v9  ;;  %vm2460_vm0 = vcmp.gt.f32.partialorder %v6187_v13, 0.0  ;;  %v2716_v17 = vmul.f32 0.2, %v6187_v13  ;;  %v1687_v18 = vpop.f32.mrb[85].mxu0  ;;  %v2199_v19 = vpop.f32.mrb[85].mxu1 }
 0x18b   :  { %5941 = vst [vmem:[%s7459_s2 + $0x348] sm:$0xff] %v5725_v10   ;;  %vm2588_vm11 = vcmp.gt.f32.partialorder %v6315_v14, 0.0  ;;  %v2844_v20 = vmul.f32 0.2, %v6315_v14  ;;  %v2714_v21 = vmul.f32 0.2, %v1687_v18 }
 0x18c   :  { %5876 = vst [vmem:[%s7459_s2 + $0x140] sm:$0xff] %v5400_v15   ;;  %5940 = vst [vmem:[%s7459_s2 + $0x340] sm:$0xff] %v5720_v16   ;;  %v2842_v22 = vmul.f32 0.2, %v2199_v19  ;;  %v6188_v23 = vpop.f32.mrb[86].mxu0  ;;  %v6316_v24 = vpop.f32.mrb[86].mxu1  ;;  %v2972_v25 = vsel %vm2460_vm0, %v6187_v13, %v2716_v17 }
 0x18d   :  { %vm2458_vm12 = vcmp.gt.f32.partialorder %v1687_v18, 0.0  ;;  %vm2461_vm13 = vcmp.gt.f32.partialorder %v6188_v23, 0.0  ;;  %v2717_v26 = vmul.f32 0.2, %v6188_v23  ;;  %v1690_v27 = vpop.f32.mrb[87].mxu0  ;;  %v2202_v28 = vpop.f32.mrb[87].mxu1  ;;  %v3100_v33 = vsel %vm2588_vm11, %v6315_v14, %v2844_v20 }
 0x18e   :  { %vm2586_vm14 = vcmp.gt.f32.partialorder %v2199_v19, 0.0  ;;  %vm2589_vm15 = vcmp.gt.f32.partialorder %v6316_v24, 0.0  ;;  %v2845_v29 = vmul.f32 0.2, %v6316_v24  ;;  %vm2459_vm1 = vcmp.gt.f32.partialorder %v1690_v27, 0.0 }
 0x18f   :  { %v2973_v30 = vsel %vm2461_vm13, %v6188_v23, %v2717_v26  ;;  %v2715_v31 = vmul.f32 0.2, %v1690_v27  ;;  %vm2587_vm2 = vcmp.gt.f32.partialorder %v2202_v28, 0.0  ;;  %v2843_v32 = vmul.f32 0.2, %v2202_v28 }
 0x190   :  { %v2970_v34 = vsel %vm2458_vm12, %v1687_v18, %v2714_v21  ;;  %v5415_v35 = vpack.c.bf16 %v2973_v30, %v2972_v25  ;;  %v3101_v36 = vsel %vm2589_vm15, %v6316_v24, %v2845_v29  ;;  %v3098_v37 = vsel %vm2586_vm14, %v2199_v19, %v2842_v22 }
 0x191   :  { %v5735_v38 = vpack.c.bf16 %v3101_v36, %v3100_v33  ;;  %v2971_v39 = vsel %vm2459_vm1, %v1690_v27, %v2715_v31  ;;  %v3099_v40 = vsel %vm2587_vm2, %v2202_v28, %v2843_v32  ;;  %v6191_v41 = vpop.f32.mrb[88].mxu0  ;;  %v6319_v42 = vpop.f32.mrb[88].mxu1 }
 0x192   :  { %5879 = vst [vmem:[%s7459_s2 + $0x158] sm:$0xff] %v5415_v35   ;;  %v5410_v43 = vpack.c.bf16 %v2971_v39, %v2970_v34  ;;  %v5730_v44 = vpack.c.bf16 %v3099_v40, %v3098_v37  ;;  %vm2464_vm3 = vcmp.gt.f32.partialorder %v6191_v41, 0.0  ;;  %v2720_v45 = vmul.f32 0.2, %v6191_v41  ;;  %v1703_v46 = vpop.f32.mrb[89].mxu0  ;;  %v2215_v47 = vpop.f32.mrb[89].mxu1 }
 0x193   :  { %5943 = vst [vmem:[%s7459_s2 + $0x358] sm:$0xff] %v5735_v38   ;;  %vm2592_vm4 = vcmp.gt.f32.partialorder %v6319_v42, 0.0  ;;  %v2848_v48 = vmul.f32 0.2, %v6319_v42  ;;  %v2718_v49 = vmul.f32 0.2, %v1703_v46 }
 0x194   :  { %5878 = vst [vmem:[%s7459_s2 + $0x150] sm:$0xff] %v5410_v43   ;;  %5942 = vst [vmem:[%s7459_s2 + $0x350] sm:$0xff] %v5730_v44   ;;  %v2846_v50 = vmul.f32 0.2, %v2215_v47  ;;  %v6192_v51 = vpop.f32.mrb[90].mxu0  ;;  %v6320_v52 = vpop.f32.mrb[90].mxu1  ;;  %v2976_v53 = vsel %vm2464_vm3, %v6191_v41, %v2720_v45 }
 0x195   :  { %vm2462_vm5 = vcmp.gt.f32.partialorder %v1703_v46, 0.0  ;;  %vm2465_vm6 = vcmp.gt.f32.partialorder %v6192_v51, 0.0  ;;  %v2721_v54 = vmul.f32 0.2, %v6192_v51  ;;  %v1706_v55 = vpop.f32.mrb[91].mxu0  ;;  %v2218_v56 = vpop.f32.mrb[91].mxu1  ;;  %v3104_v61 = vsel %vm2592_vm4, %v6319_v42, %v2848_v48 }
 0x196   :  { %vm2590_vm7 = vcmp.gt.f32.partialorder %v2215_v47, 0.0  ;;  %vm2593_vm8 = vcmp.gt.f32.partialorder %v6320_v52, 0.0  ;;  %v2849_v57 = vmul.f32 0.2, %v6320_v52  ;;  %vm2463_vm9 = vcmp.gt.f32.partialorder %v1706_v55, 0.0 }
 0x197   :  { %v2977_v58 = vsel %vm2465_vm6, %v6192_v51, %v2721_v54  ;;  %v2719_v59 = vmul.f32 0.2, %v1706_v55  ;;  %vm2591_vm10 = vcmp.gt.f32.partialorder %v2218_v56, 0.0  ;;  %v2847_v60 = vmul.f32 0.2, %v2218_v56 }
 0x198   :  { %v2974_v62 = vsel %vm2462_vm5, %v1703_v46, %v2718_v49  ;;  %v5425_v63 = vpack.c.bf16 %v2977_v58, %v2976_v53  ;;  %v3105_v0 = vsel %vm2593_vm8, %v6320_v52, %v2849_v57  ;;  %v3102_v1 = vsel %vm2590_vm7, %v2215_v47, %v2846_v50 }
 0x199   :  { %v5745_v2 = vpack.c.bf16 %v3105_v0, %v3104_v61  ;;  %v2975_v3 = vsel %vm2463_vm9, %v1706_v55, %v2719_v59  ;;  %v3103_v4 = vsel %vm2591_vm10, %v2218_v56, %v2847_v60  ;;  %v6195_v5 = vpop.f32.mrb[92].mxu0  ;;  %v6323_v6 = vpop.f32.mrb[92].mxu1 }
 0x19a   :  { %5881 = vst [vmem:[%s7459_s2 + $0x168] sm:$0xff] %v5425_v63   ;;  %v5420_v7 = vpack.c.bf16 %v2975_v3, %v2974_v62  ;;  %v5740_v8 = vpack.c.bf16 %v3103_v4, %v3102_v1  ;;  %vm2468_vm0 = vcmp.gt.f32.partialorder %v6195_v5, 0.0  ;;  %v2724_v9 = vmul.f32 0.2, %v6195_v5  ;;  %v1719_v10 = vpop.f32.mrb[93].mxu0  ;;  %v2231_v11 = vpop.f32.mrb[93].mxu1 }
 0x19b   :  { %5945 = vst [vmem:[%s7459_s2 + $0x368] sm:$0xff] %v5745_v2   ;;  %vm2596_vm11 = vcmp.gt.f32.partialorder %v6323_v6, 0.0  ;;  %v2852_v12 = vmul.f32 0.2, %v6323_v6  ;;  %v2722_v13 = vmul.f32 0.2, %v1719_v10 }
 0x19c   :  { %5880 = vst [vmem:[%s7459_s2 + $0x160] sm:$0xff] %v5420_v7   ;;  %5944 = vst [vmem:[%s7459_s2 + $0x360] sm:$0xff] %v5740_v8   ;;  %v2850_v14 = vmul.f32 0.2, %v2231_v11  ;;  %v6196_v15 = vpop.f32.mrb[94].mxu0  ;;  %v6324_v16 = vpop.f32.mrb[94].mxu1  ;;  %v2980_v17 = vsel %vm2468_vm0, %v6195_v5, %v2724_v9 }
 0x19d   :  { %vm2466_vm12 = vcmp.gt.f32.partialorder %v1719_v10, 0.0  ;;  %vm2469_vm13 = vcmp.gt.f32.partialorder %v6196_v15, 0.0  ;;  %v2725_v18 = vmul.f32 0.2, %v6196_v15  ;;  %v1722_v19 = vpop.f32.mrb[95].mxu0  ;;  %v2234_v20 = vpop.f32.mrb[95].mxu1  ;;  %v3108_v25 = vsel %vm2596_vm11, %v6323_v6, %v2852_v12 }
 0x19e   :  { %vm2594_vm14 = vcmp.gt.f32.partialorder %v2231_v11, 0.0  ;;  %vm2597_vm15 = vcmp.gt.f32.partialorder %v6324_v16, 0.0  ;;  %v2853_v21 = vmul.f32 0.2, %v6324_v16  ;;  %vm2467_vm1 = vcmp.gt.f32.partialorder %v1722_v19, 0.0 }
 0x19f   :  { %v2981_v22 = vsel %vm2469_vm13, %v6196_v15, %v2725_v18  ;;  %v2723_v23 = vmul.f32 0.2, %v1722_v19  ;;  %vm2595_vm2 = vcmp.gt.f32.partialorder %v2234_v20, 0.0  ;;  %v2851_v24 = vmul.f32 0.2, %v2234_v20 }
 0x1a0   :  { %v2978_v26 = vsel %vm2466_vm12, %v1719_v10, %v2722_v13  ;;  %v5435_v27 = vpack.c.bf16 %v2981_v22, %v2980_v17  ;;  %v3109_v28 = vsel %vm2597_vm15, %v6324_v16, %v2853_v21  ;;  %v3106_v29 = vsel %vm2594_vm14, %v2231_v11, %v2850_v14 }
 0x1a1   :  { %v5755_v30 = vpack.c.bf16 %v3109_v28, %v3108_v25  ;;  %v2979_v31 = vsel %vm2467_vm1, %v1722_v19, %v2723_v23  ;;  %v3107_v32 = vsel %vm2595_vm2, %v2234_v20, %v2851_v24  ;;  %v6199_v33 = vpop.f32.mrb[96].mxu0  ;;  %v6327_v34 = vpop.f32.mrb[96].mxu1 }
 0x1a2   :  { %5883 = vst [vmem:[%s7459_s2 + $0x178] sm:$0xff] %v5435_v27   ;;  %v5430_v35 = vpack.c.bf16 %v2979_v31, %v2978_v26  ;;  %v5750_v36 = vpack.c.bf16 %v3107_v32, %v3106_v29  ;;  %vm2472_vm3 = vcmp.gt.f32.partialorder %v6199_v33, 0.0  ;;  %v2728_v37 = vmul.f32 0.2, %v6199_v33  ;;  %v1735_v38 = vpop.f32.mrb[97].mxu0  ;;  %v2247_v39 = vpop.f32.mrb[97].mxu1 }
 0x1a3   :  { %5947 = vst [vmem:[%s7459_s2 + $0x378] sm:$0xff] %v5755_v30   ;;  %vm2600_vm4 = vcmp.gt.f32.partialorder %v6327_v34, 0.0  ;;  %v2856_v40 = vmul.f32 0.2, %v6327_v34  ;;  %v2726_v41 = vmul.f32 0.2, %v1735_v38 }
 0x1a4   :  { %5882 = vst [vmem:[%s7459_s2 + $0x170] sm:$0xff] %v5430_v35   ;;  %5946 = vst [vmem:[%s7459_s2 + $0x370] sm:$0xff] %v5750_v36   ;;  %v2854_v42 = vmul.f32 0.2, %v2247_v39  ;;  %v6200_v43 = vpop.f32.mrb[98].mxu0  ;;  %v6328_v44 = vpop.f32.mrb[98].mxu1  ;;  %v2984_v45 = vsel %vm2472_vm3, %v6199_v33, %v2728_v37 }
 0x1a5   :  { %vm2470_vm5 = vcmp.gt.f32.partialorder %v1735_v38, 0.0  ;;  %vm2473_vm6 = vcmp.gt.f32.partialorder %v6200_v43, 0.0  ;;  %v2729_v46 = vmul.f32 0.2, %v6200_v43  ;;  %v1738_v47 = vpop.f32.mrb[99].mxu0  ;;  %v2250_v48 = vpop.f32.mrb[99].mxu1  ;;  %v3112_v53 = vsel %vm2600_vm4, %v6327_v34, %v2856_v40 }
 0x1a6   :  { %vm2598_vm7 = vcmp.gt.f32.partialorder %v2247_v39, 0.0  ;;  %vm2601_vm8 = vcmp.gt.f32.partialorder %v6328_v44, 0.0  ;;  %v2857_v49 = vmul.f32 0.2, %v6328_v44  ;;  %vm2471_vm9 = vcmp.gt.f32.partialorder %v1738_v47, 0.0 }
 0x1a7   :  { %v2985_v50 = vsel %vm2473_vm6, %v6200_v43, %v2729_v46  ;;  %v2727_v51 = vmul.f32 0.2, %v1738_v47  ;;  %vm2599_vm10 = vcmp.gt.f32.partialorder %v2250_v48, 0.0  ;;  %v2855_v52 = vmul.f32 0.2, %v2250_v48 }
 0x1a8   :  { %v2982_v54 = vsel %vm2470_vm5, %v1735_v38, %v2726_v41  ;;  %v5445_v55 = vpack.c.bf16 %v2985_v50, %v2984_v45  ;;  %v3113_v56 = vsel %vm2601_vm8, %v6328_v44, %v2857_v49  ;;  %v3110_v57 = vsel %vm2598_vm7, %v2247_v39, %v2854_v42 }
 0x1a9   :  { %v5765_v58 = vpack.c.bf16 %v3113_v56, %v3112_v53  ;;  %v2983_v59 = vsel %vm2471_vm9, %v1738_v47, %v2727_v51  ;;  %v3111_v60 = vsel %vm2599_vm10, %v2250_v48, %v2855_v52  ;;  %v6203_v61 = vpop.f32.mrb[100].mxu0  ;;  %v6331_v62 = vpop.f32.mrb[100].mxu1 }
 0x1aa   :  { %5885 = vst [vmem:[%s7459_s2 + $0x188] sm:$0xff] %v5445_v55   ;;  %v5440_v63 = vpack.c.bf16 %v2983_v59, %v2982_v54  ;;  %v5760_v0 = vpack.c.bf16 %v3111_v60, %v3110_v57  ;;  %vm2476_vm0 = vcmp.gt.f32.partialorder %v6203_v61, 0.0  ;;  %v2732_v1 = vmul.f32 0.2, %v6203_v61  ;;  %v1751_v2 = vpop.f32.mrb[101].mxu0  ;;  %v2263_v3 = vpop.f32.mrb[101].mxu1 }
 0x1ab   :  { %5949 = vst [vmem:[%s7459_s2 + $0x388] sm:$0xff] %v5765_v58   ;;  %vm2604_vm11 = vcmp.gt.f32.partialorder %v6331_v62, 0.0  ;;  %v2860_v4 = vmul.f32 0.2, %v6331_v62  ;;  %v2730_v5 = vmul.f32 0.2, %v1751_v2 }
 0x1ac   :  { %5884 = vst [vmem:[%s7459_s2 + $0x180] sm:$0xff] %v5440_v63   ;;  %5948 = vst [vmem:[%s7459_s2 + $0x380] sm:$0xff] %v5760_v0   ;;  %v2858_v6 = vmul.f32 0.2, %v2263_v3  ;;  %v6204_v7 = vpop.f32.mrb[102].mxu0  ;;  %v6332_v8 = vpop.f32.mrb[102].mxu1  ;;  %v2988_v9 = vsel %vm2476_vm0, %v6203_v61, %v2732_v1 }
 0x1ad   :  { %vm2474_vm12 = vcmp.gt.f32.partialorder %v1751_v2, 0.0  ;;  %vm2477_vm13 = vcmp.gt.f32.partialorder %v6204_v7, 0.0  ;;  %v2733_v10 = vmul.f32 0.2, %v6204_v7  ;;  %v1754_v11 = vpop.f32.mrb[103].mxu0  ;;  %v2266_v12 = vpop.f32.mrb[103].mxu1  ;;  %v3116_v17 = vsel %vm2604_vm11, %v6331_v62, %v2860_v4 }
 0x1ae   :  { %vm2602_vm14 = vcmp.gt.f32.partialorder %v2263_v3, 0.0  ;;  %vm2605_vm15 = vcmp.gt.f32.partialorder %v6332_v8, 0.0  ;;  %v2861_v13 = vmul.f32 0.2, %v6332_v8  ;;  %vm2475_vm1 = vcmp.gt.f32.partialorder %v1754_v11, 0.0 }
 0x1af   :  { %v2989_v14 = vsel %vm2477_vm13, %v6204_v7, %v2733_v10  ;;  %v2731_v15 = vmul.f32 0.2, %v1754_v11  ;;  %vm2603_vm2 = vcmp.gt.f32.partialorder %v2266_v12, 0.0  ;;  %v2859_v16 = vmul.f32 0.2, %v2266_v12 }
 0x1b0   :  { %v2986_v18 = vsel %vm2474_vm12, %v1751_v2, %v2730_v5  ;;  %v5455_v19 = vpack.c.bf16 %v2989_v14, %v2988_v9  ;;  %v3117_v20 = vsel %vm2605_vm15, %v6332_v8, %v2861_v13  ;;  %v3114_v21 = vsel %vm2602_vm14, %v2263_v3, %v2858_v6 }
 0x1b1   :  { %v5775_v22 = vpack.c.bf16 %v3117_v20, %v3116_v17  ;;  %v2987_v23 = vsel %vm2475_vm1, %v1754_v11, %v2731_v15  ;;  %v3115_v24 = vsel %vm2603_vm2, %v2266_v12, %v2859_v16  ;;  %v6207_v25 = vpop.f32.mrb[104].mxu0  ;;  %v6335_v26 = vpop.f32.mrb[104].mxu1 }
 0x1b2   :  { %5887 = vst [vmem:[%s7459_s2 + $0x198] sm:$0xff] %v5455_v19   ;;  %v5450_v27 = vpack.c.bf16 %v2987_v23, %v2986_v18  ;;  %v5770_v28 = vpack.c.bf16 %v3115_v24, %v3114_v21  ;;  %vm2480_vm3 = vcmp.gt.f32.partialorder %v6207_v25, 0.0  ;;  %v2736_v29 = vmul.f32 0.2, %v6207_v25  ;;  %v1767_v30 = vpop.f32.mrb[105].mxu0  ;;  %v2279_v31 = vpop.f32.mrb[105].mxu1 }
 0x1b3   :  { %5951 = vst [vmem:[%s7459_s2 + $0x398] sm:$0xff] %v5775_v22   ;;  %vm2608_vm4 = vcmp.gt.f32.partialorder %v6335_v26, 0.0  ;;  %v2864_v32 = vmul.f32 0.2, %v6335_v26  ;;  %v2734_v33 = vmul.f32 0.2, %v1767_v30 }
 0x1b4   :  { %5886 = vst [vmem:[%s7459_s2 + $0x190] sm:$0xff] %v5450_v27   ;;  %5950 = vst [vmem:[%s7459_s2 + $0x390] sm:$0xff] %v5770_v28   ;;  %v2862_v34 = vmul.f32 0.2, %v2279_v31  ;;  %v6208_v35 = vpop.f32.mrb[106].mxu0  ;;  %v6336_v36 = vpop.f32.mrb[106].mxu1  ;;  %v2992_v37 = vsel %vm2480_vm3, %v6207_v25, %v2736_v29 }
 0x1b5   :  { %vm2478_vm5 = vcmp.gt.f32.partialorder %v1767_v30, 0.0  ;;  %vm2481_vm6 = vcmp.gt.f32.partialorder %v6208_v35, 0.0  ;;  %v2737_v38 = vmul.f32 0.2, %v6208_v35  ;;  %v1770_v39 = vpop.f32.mrb[107].mxu0  ;;  %v2282_v40 = vpop.f32.mrb[107].mxu1  ;;  %v3120_v45 = vsel %vm2608_vm4, %v6335_v26, %v2864_v32 }
 0x1b6   :  { %vm2606_vm7 = vcmp.gt.f32.partialorder %v2279_v31, 0.0  ;;  %vm2609_vm8 = vcmp.gt.f32.partialorder %v6336_v36, 0.0  ;;  %v2865_v41 = vmul.f32 0.2, %v6336_v36  ;;  %vm2479_vm9 = vcmp.gt.f32.partialorder %v1770_v39, 0.0 }
 0x1b7   :  { %v2993_v42 = vsel %vm2481_vm6, %v6208_v35, %v2737_v38  ;;  %v2735_v43 = vmul.f32 0.2, %v1770_v39  ;;  %vm2607_vm10 = vcmp.gt.f32.partialorder %v2282_v40, 0.0  ;;  %v2863_v44 = vmul.f32 0.2, %v2282_v40 }
 0x1b8   :  { %v2990_v46 = vsel %vm2478_vm5, %v1767_v30, %v2734_v33  ;;  %v5465_v47 = vpack.c.bf16 %v2993_v42, %v2992_v37  ;;  %v3121_v48 = vsel %vm2609_vm8, %v6336_v36, %v2865_v41  ;;  %v3118_v49 = vsel %vm2606_vm7, %v2279_v31, %v2862_v34 }
 0x1b9   :  { %v5785_v50 = vpack.c.bf16 %v3121_v48, %v3120_v45  ;;  %v2991_v51 = vsel %vm2479_vm9, %v1770_v39, %v2735_v43  ;;  %v3119_v52 = vsel %vm2607_vm10, %v2282_v40, %v2863_v44  ;;  %v6211_v53 = vpop.f32.mrb[108].mxu0  ;;  %v6339_v54 = vpop.f32.mrb[108].mxu1 }
 0x1ba   :  { %5889 = vst [vmem:[%s7459_s2 + $0x1a8] sm:$0xff] %v5465_v47   ;;  %v5460_v55 = vpack.c.bf16 %v2991_v51, %v2990_v46  ;;  %v5780_v56 = vpack.c.bf16 %v3119_v52, %v3118_v49  ;;  %vm2484_vm0 = vcmp.gt.f32.partialorder %v6211_v53, 0.0  ;;  %v2740_v57 = vmul.f32 0.2, %v6211_v53  ;;  %v1783_v58 = vpop.f32.mrb[109].mxu0  ;;  %v2295_v59 = vpop.f32.mrb[109].mxu1 }
 0x1bb   :  { %5953 = vst [vmem:[%s7459_s2 + $0x3a8] sm:$0xff] %v5785_v50   ;;  %vm2612_vm11 = vcmp.gt.f32.partialorder %v6339_v54, 0.0  ;;  %v2868_v60 = vmul.f32 0.2, %v6339_v54  ;;  %v2738_v61 = vmul.f32 0.2, %v1783_v58 }
 0x1bc   :  { %5888 = vst [vmem:[%s7459_s2 + $0x1a0] sm:$0xff] %v5460_v55   ;;  %5952 = vst [vmem:[%s7459_s2 + $0x3a0] sm:$0xff] %v5780_v56   ;;  %v2866_v62 = vmul.f32 0.2, %v2295_v59  ;;  %v6212_v63 = vpop.f32.mrb[110].mxu0  ;;  %v6340_v0 = vpop.f32.mrb[110].mxu1  ;;  %v2996_v1 = vsel %vm2484_vm0, %v6211_v53, %v2740_v57 }
 0x1bd   :  { %vm2482_vm12 = vcmp.gt.f32.partialorder %v1783_v58, 0.0  ;;  %vm2485_vm13 = vcmp.gt.f32.partialorder %v6212_v63, 0.0  ;;  %v2741_v2 = vmul.f32 0.2, %v6212_v63  ;;  %v1786_v3 = vpop.f32.mrb[111].mxu0  ;;  %v2298_v4 = vpop.f32.mrb[111].mxu1  ;;  %v3124_v9 = vsel %vm2612_vm11, %v6339_v54, %v2868_v60 }
 0x1be   :  { %vm2610_vm14 = vcmp.gt.f32.partialorder %v2295_v59, 0.0  ;;  %vm2613_vm15 = vcmp.gt.f32.partialorder %v6340_v0, 0.0  ;;  %v2869_v5 = vmul.f32 0.2, %v6340_v0  ;;  %vm2483_vm1 = vcmp.gt.f32.partialorder %v1786_v3, 0.0 }
 0x1bf   :  { %v2997_v6 = vsel %vm2485_vm13, %v6212_v63, %v2741_v2  ;;  %v2739_v7 = vmul.f32 0.2, %v1786_v3  ;;  %vm2611_vm2 = vcmp.gt.f32.partialorder %v2298_v4, 0.0  ;;  %v2867_v8 = vmul.f32 0.2, %v2298_v4 }
 0x1c0   :  { %v2994_v10 = vsel %vm2482_vm12, %v1783_v58, %v2738_v61  ;;  %v5475_v11 = vpack.c.bf16 %v2997_v6, %v2996_v1  ;;  %v3125_v12 = vsel %vm2613_vm15, %v6340_v0, %v2869_v5  ;;  %v3122_v13 = vsel %vm2610_vm14, %v2295_v59, %v2866_v62 }
 0x1c1   :  { %v5795_v14 = vpack.c.bf16 %v3125_v12, %v3124_v9  ;;  %v2995_v15 = vsel %vm2483_vm1, %v1786_v3, %v2739_v7  ;;  %v3123_v16 = vsel %vm2611_vm2, %v2298_v4, %v2867_v8  ;;  %v6215_v17 = vpop.f32.mrb[112].mxu0  ;;  %v6343_v18 = vpop.f32.mrb[112].mxu1 }
 0x1c2   :  { %5891 = vst [vmem:[%s7459_s2 + $0x1b8] sm:$0xff] %v5475_v11   ;;  %v5470_v19 = vpack.c.bf16 %v2995_v15, %v2994_v10  ;;  %v5790_v20 = vpack.c.bf16 %v3123_v16, %v3122_v13  ;;  %vm2488_vm3 = vcmp.gt.f32.partialorder %v6215_v17, 0.0  ;;  %v2744_v21 = vmul.f32 0.2, %v6215_v17  ;;  %v1799_v22 = vpop.f32.mrb[113].mxu0  ;;  %v2311_v23 = vpop.f32.mrb[113].mxu1 }
 0x1c3   :  { %5955 = vst [vmem:[%s7459_s2 + $0x3b8] sm:$0xff] %v5795_v14   ;;  %vm2616_vm4 = vcmp.gt.f32.partialorder %v6343_v18, 0.0  ;;  %v2872_v24 = vmul.f32 0.2, %v6343_v18  ;;  %v2742_v25 = vmul.f32 0.2, %v1799_v22 }
 0x1c4   :  { %5890 = vst [vmem:[%s7459_s2 + $0x1b0] sm:$0xff] %v5470_v19   ;;  %5954 = vst [vmem:[%s7459_s2 + $0x3b0] sm:$0xff] %v5790_v20   ;;  %v2870_v26 = vmul.f32 0.2, %v2311_v23  ;;  %v6216_v27 = vpop.f32.mrb[114].mxu0  ;;  %v6344_v28 = vpop.f32.mrb[114].mxu1  ;;  %v3000_v29 = vsel %vm2488_vm3, %v6215_v17, %v2744_v21 }
 0x1c5   :  { %vm2486_vm5 = vcmp.gt.f32.partialorder %v1799_v22, 0.0  ;;  %vm2489_vm6 = vcmp.gt.f32.partialorder %v6216_v27, 0.0  ;;  %v2745_v30 = vmul.f32 0.2, %v6216_v27  ;;  %v1802_v31 = vpop.f32.mrb[115].mxu0  ;;  %v2314_v32 = vpop.f32.mrb[115].mxu1  ;;  %v3128_v37 = vsel %vm2616_vm4, %v6343_v18, %v2872_v24 }
 0x1c6   :  { %vm2614_vm7 = vcmp.gt.f32.partialorder %v2311_v23, 0.0  ;;  %vm2617_vm8 = vcmp.gt.f32.partialorder %v6344_v28, 0.0  ;;  %v2873_v33 = vmul.f32 0.2, %v6344_v28  ;;  %vm2487_vm9 = vcmp.gt.f32.partialorder %v1802_v31, 0.0 }
 0x1c7   :  { %v3001_v34 = vsel %vm2489_vm6, %v6216_v27, %v2745_v30  ;;  %v2743_v35 = vmul.f32 0.2, %v1802_v31  ;;  %vm2615_vm10 = vcmp.gt.f32.partialorder %v2314_v32, 0.0  ;;  %v2871_v36 = vmul.f32 0.2, %v2314_v32 }
 0x1c8   :  { %v2998_v38 = vsel %vm2486_vm5, %v1799_v22, %v2742_v25  ;;  %v5485_v39 = vpack.c.bf16 %v3001_v34, %v3000_v29  ;;  %v3129_v40 = vsel %vm2617_vm8, %v6344_v28, %v2873_v33  ;;  %v3126_v41 = vsel %vm2614_vm7, %v2311_v23, %v2870_v26 }
 0x1c9   :  { %v5805_v42 = vpack.c.bf16 %v3129_v40, %v3128_v37  ;;  %v2999_v43 = vsel %vm2487_vm9, %v1802_v31, %v2743_v35  ;;  %v3127_v44 = vsel %vm2615_vm10, %v2314_v32, %v2871_v36  ;;  %v6219_v45 = vpop.f32.mrb[116].mxu0  ;;  %v6347_v46 = vpop.f32.mrb[116].mxu1 }
 0x1ca   :  { %5893 = vst [vmem:[%s7459_s2 + $0x1c8] sm:$0xff] %v5485_v39   ;;  %v5480_v47 = vpack.c.bf16 %v2999_v43, %v2998_v38  ;;  %v5800_v48 = vpack.c.bf16 %v3127_v44, %v3126_v41  ;;  %vm2492_vm0 = vcmp.gt.f32.partialorder %v6219_v45, 0.0  ;;  %v2748_v49 = vmul.f32 0.2, %v6219_v45  ;;  %v1815_v50 = vpop.f32.mrb[117].mxu0  ;;  %v2327_v51 = vpop.f32.mrb[117].mxu1 }
 0x1cb   :  { %5957 = vst [vmem:[%s7459_s2 + $0x3c8] sm:$0xff] %v5805_v42   ;;  %vm2620_vm11 = vcmp.gt.f32.partialorder %v6347_v46, 0.0  ;;  %v2876_v52 = vmul.f32 0.2, %v6347_v46  ;;  %v2746_v53 = vmul.f32 0.2, %v1815_v50 }
 0x1cc   :  { %5892 = vst [vmem:[%s7459_s2 + $0x1c0] sm:$0xff] %v5480_v47   ;;  %5956 = vst [vmem:[%s7459_s2 + $0x3c0] sm:$0xff] %v5800_v48   ;;  %v2874_v54 = vmul.f32 0.2, %v2327_v51  ;;  %v6220_v55 = vpop.f32.mrb[118].mxu0  ;;  %v6348_v56 = vpop.f32.mrb[118].mxu1  ;;  %v3004_v57 = vsel %vm2492_vm0, %v6219_v45, %v2748_v49 }
 0x1cd   :  { %vm2490_vm12 = vcmp.gt.f32.partialorder %v1815_v50, 0.0  ;;  %vm2493_vm13 = vcmp.gt.f32.partialorder %v6220_v55, 0.0  ;;  %v2749_v58 = vmul.f32 0.2, %v6220_v55  ;;  %v1818_v59 = vpop.f32.mrb[119].mxu0  ;;  %v2330_v60 = vpop.f32.mrb[119].mxu1  ;;  %v3132_v1 = vsel %vm2620_vm11, %v6347_v46, %v2876_v52 }
 0x1ce   :  { %vm2618_vm14 = vcmp.gt.f32.partialorder %v2327_v51, 0.0  ;;  %vm2621_vm15 = vcmp.gt.f32.partialorder %v6348_v56, 0.0  ;;  %v2877_v61 = vmul.f32 0.2, %v6348_v56  ;;  %vm2491_vm1 = vcmp.gt.f32.partialorder %v1818_v59, 0.0 }
 0x1cf   :  { %v3005_v62 = vsel %vm2493_vm13, %v6220_v55, %v2749_v58  ;;  %v2747_v63 = vmul.f32 0.2, %v1818_v59  ;;  %vm2619_vm2 = vcmp.gt.f32.partialorder %v2330_v60, 0.0  ;;  %v2875_v0 = vmul.f32 0.2, %v2330_v60 }
 0x1d0   :  { %v3002_v2 = vsel %vm2490_vm12, %v1815_v50, %v2746_v53  ;;  %v5495_v3 = vpack.c.bf16 %v3005_v62, %v3004_v57  ;;  %v3133_v4 = vsel %vm2621_vm15, %v6348_v56, %v2877_v61  ;;  %v3130_v5 = vsel %vm2618_vm14, %v2327_v51, %v2874_v54 }
 0x1d1   :  { %v5815_v6 = vpack.c.bf16 %v3133_v4, %v3132_v1  ;;  %v3003_v7 = vsel %vm2491_vm1, %v1818_v59, %v2747_v63  ;;  %v3131_v8 = vsel %vm2619_vm2, %v2330_v60, %v2875_v0  ;;  %v6223_v9 = vpop.f32.mrb[120].mxu0  ;;  %v6351_v10 = vpop.f32.mrb[120].mxu1 }
 0x1d2   :  { %5895 = vst [vmem:[%s7459_s2 + $0x1d8] sm:$0xff] %v5495_v3   ;;  %v5490_v11 = vpack.c.bf16 %v3003_v7, %v3002_v2  ;;  %v5810_v12 = vpack.c.bf16 %v3131_v8, %v3130_v5  ;;  %vm2496_vm3 = vcmp.gt.f32.partialorder %v6223_v9, 0.0  ;;  %v2752_v13 = vmul.f32 0.2, %v6223_v9  ;;  %v1831_v14 = vpop.f32.mrb[121].mxu0  ;;  %v2343_v15 = vpop.f32.mrb[121].mxu1 }
 0x1d3   :  { %5959 = vst [vmem:[%s7459_s2 + $0x3d8] sm:$0xff] %v5815_v6   ;;  %vm2624_vm4 = vcmp.gt.f32.partialorder %v6351_v10, 0.0  ;;  %v2880_v16 = vmul.f32 0.2, %v6351_v10  ;;  %v2750_v17 = vmul.f32 0.2, %v1831_v14 }
 0x1d4   :  { %5894 = vst [vmem:[%s7459_s2 + $0x1d0] sm:$0xff] %v5490_v11   ;;  %5958 = vst [vmem:[%s7459_s2 + $0x3d0] sm:$0xff] %v5810_v12   ;;  %v2878_v18 = vmul.f32 0.2, %v2343_v15  ;;  %v6224_v19 = vpop.f32.mrb[122].mxu0  ;;  %v6352_v20 = vpop.f32.mrb[122].mxu1  ;;  %v3008_v21 = vsel %vm2496_vm3, %v6223_v9, %v2752_v13 }
 0x1d5   :  { %vm2494_vm5 = vcmp.gt.f32.partialorder %v1831_v14, 0.0  ;;  %vm2497_vm6 = vcmp.gt.f32.partialorder %v6224_v19, 0.0  ;;  %v2753_v22 = vmul.f32 0.2, %v6224_v19  ;;  %v1834_v23 = vpop.f32.mrb[123].mxu0  ;;  %v2346_v24 = vpop.f32.mrb[123].mxu1  ;;  %v3136_v29 = vsel %vm2624_vm4, %v6351_v10, %v2880_v16 }
 0x1d6   :  { %vm2622_vm7 = vcmp.gt.f32.partialorder %v2343_v15, 0.0  ;;  %vm2625_vm8 = vcmp.gt.f32.partialorder %v6352_v20, 0.0  ;;  %v2881_v25 = vmul.f32 0.2, %v6352_v20  ;;  %vm2495_vm9 = vcmp.gt.f32.partialorder %v1834_v23, 0.0 }
 0x1d7   :  { %v3009_v26 = vsel %vm2497_vm6, %v6224_v19, %v2753_v22  ;;  %v2751_v27 = vmul.f32 0.2, %v1834_v23  ;;  %vm2623_vm10 = vcmp.gt.f32.partialorder %v2346_v24, 0.0  ;;  %v2879_v28 = vmul.f32 0.2, %v2346_v24 }
 0x1d8   :  { %v3006_v30 = vsel %vm2494_vm5, %v1831_v14, %v2750_v17  ;;  %v5505_v31 = vpack.c.bf16 %v3009_v26, %v3008_v21  ;;  %v3137_v32 = vsel %vm2625_vm8, %v6352_v20, %v2881_v25  ;;  %v3134_v33 = vsel %vm2622_vm7, %v2343_v15, %v2878_v18 }
 0x1d9   :  { %v5825_v34 = vpack.c.bf16 %v3137_v32, %v3136_v29  ;;  %v3007_v35 = vsel %vm2495_vm9, %v1834_v23, %v2751_v27  ;;  %v3135_v36 = vsel %vm2623_vm10, %v2346_v24, %v2879_v28  ;;  %v6227_v37 = vpop.f32.mrb[124].mxu0  ;;  %v6355_v38 = vpop.f32.mrb[124].mxu1 }
 0x1da   :  { %5897 = vst [vmem:[%s7459_s2 + $0x1e8] sm:$0xff] %v5505_v31   ;;  %v5500_v39 = vpack.c.bf16 %v3007_v35, %v3006_v30  ;;  %v5820_v40 = vpack.c.bf16 %v3135_v36, %v3134_v33  ;;  %vm2500_vm0 = vcmp.gt.f32.partialorder %v6227_v37, 0.0  ;;  %v2756_v41 = vmul.f32 0.2, %v6227_v37  ;;  %v1847_v42 = vpop.f32.mrb[125].mxu0  ;;  %v2359_v43 = vpop.f32.mrb[125].mxu1 }
 0x1db   :  { %5961 = vst [vmem:[%s7459_s2 + $0x3e8] sm:$0xff] %v5825_v34   ;;  %vm2628_vm11 = vcmp.gt.f32.partialorder %v6355_v38, 0.0  ;;  %v2884_v44 = vmul.f32 0.2, %v6355_v38  ;;  %v2754_v45 = vmul.f32 0.2, %v1847_v42 }
 0x1dc   :  { %5896 = vst [vmem:[%s7459_s2 + $0x1e0] sm:$0xff] %v5500_v39   ;;  %5960 = vst [vmem:[%s7459_s2 + $0x3e0] sm:$0xff] %v5820_v40   ;;  %v2882_v46 = vmul.f32 0.2, %v2359_v43  ;;  %v6228_v47 = vpop.f32.mrb[126].mxu0  ;;  %v6356_v48 = vpop.f32.mrb[126].mxu1  ;;  %v3012_v49 = vsel %vm2500_vm0, %v6227_v37, %v2756_v41 }
 0x1dd   :  { %vm2498_vm12 = vcmp.gt.f32.partialorder %v1847_v42, 0.0  ;;  %vm2501_vm13 = vcmp.gt.f32.partialorder %v6228_v47, 0.0  ;;  %v2757_v50 = vmul.f32 0.2, %v6228_v47  ;;  %v1850_v51 = vpop.f32.mrb[127].mxu0  ;;  %v2362_v52 = vpop.f32.mrb[127].mxu1  ;;  %v3140_v57 = vsel %vm2628_vm11, %v6355_v38, %v2884_v44 }
 0x1de   :  { %vm2626_vm14 = vcmp.gt.f32.partialorder %v2359_v43, 0.0  ;;  %vm2629_vm15 = vcmp.gt.f32.partialorder %v6356_v48, 0.0  ;;  %v2885_v53 = vmul.f32 0.2, %v6356_v48  ;;  %vm2499_vm1 = vcmp.gt.f32.partialorder %v1850_v51, 0.0 }
 0x1df   :  { %v3013_v54 = vsel %vm2501_vm13, %v6228_v47, %v2757_v50  ;;  %v2755_v55 = vmul.f32 0.2, %v1850_v51  ;;  %vm2627_vm2 = vcmp.gt.f32.partialorder %v2362_v52, 0.0  ;;  %v2883_v56 = vmul.f32 0.2, %v2362_v52 }
 0x1e0   :  { %v3010_v58 = vsel %vm2498_vm12, %v1847_v42, %v2754_v45  ;;  %v5515_v59 = vpack.c.bf16 %v3013_v54, %v3012_v49  ;;  %v3141_v60 = vsel %vm2629_vm15, %v6356_v48, %v2885_v53  ;;  %v3138_v61 = vsel %vm2626_vm14, %v2359_v43, %v2882_v46 }
 0x1e1   :  { %v5835_v62 = vpack.c.bf16 %v3141_v60, %v3140_v57  ;;  %v3011_v63 = vsel %vm2499_vm1, %v1850_v51, %v2755_v55  ;;  %v3139_v0 = vsel %vm2627_vm2, %v2362_v52, %v2883_v56 }
 0x1e2   :  { %5899 = vst [vmem:[%s7459_s2 + $0x1f8] sm:$0xff] %v5515_v59   ;;  %v5510_v1 = vpack.c.bf16 %v3011_v63, %v3010_v58  ;;  %v5830_v2 = vpack.c.bf16 %v3139_v0, %v3138_v61 }
 0x1e3   :  { %5963 = vst [vmem:[%s7459_s2 + $0x3f8] sm:$0xff] %v5835_v62  }
 0x1e4   :  { %5898 = vst [vmem:[%s7459_s2 + $0x1f0] sm:$0xff] %v5510_v1   ;;  %5962 = vst [vmem:[%s7459_s2 + $0x3f0] sm:$0xff] %v5830_v2  }

// kernel: discriminator_forward.6
= control target key start
LH: loop header
LB: loop body
LE: loop exit
PB: predicated region body
PF: predicated region fallthrough
CT: control target
= control target key end

     0   :  { %s2134_s1 = inlined_call_operand.vmem [shape: bf16[128,128], index: 1, kind: input, shape index: {}]   ;;  %s2135_s0 = inlined_call_operand.vmem [shape: bf16[512,128], index: 0, kind: input, shape index: {}]   ;;  %s2136_s2 = inlined_call_operand.vmem [shape: bf16[512,128], index: 2, kind: output, shape index: {0}]   ;;  %s2137_s3 = inlined_call_operand.vmem [shape: f32[8,128], index: 3, kind: output, shape index: {1}]   ;;  %s2138_s4 = inlined_call_operand.vmem [shape: f32[8,128], index: 4, kind: output, shape index: {2}]  }
   0x1   :  { %v1655_v0 = vld [vmem:[%s2134_s1] sm:$0xff]   ;;  %v1656_v1 = vld [vmem:[%s2134_s1 + $0x8] sm:$0xff]   ;;  %v1657_v2 = vld [vmem:[%s2134_s1 + $0x10] sm:$0xff]  }
   0x2   :  { %1559 = vmatprep.subr.bf16.mxu0 %v1655_v0  ;;  %1639 = vmatprep.subr.bf16.mxu1 %v1655_v0  ;;  %v1658_v3 = vld [vmem:[%s2134_s1 + $0x18] sm:$0xff]   ;;  %v1663_v4 = vld [vmem:[%s2135_s0] sm:$0xff]   ;;  %v1660_v6 = vld [vmem:[%s2134_s1 + $0x28] sm:$0xff]  }
   0x3   :  { %1560 = vmatpush3.bf16.msra.mxu0 %v1655_v0  ;;  %1647 = vmatpush3.bf16.msra.mxu1 %v1655_v0  ;;  %v1659_v5 = vld [vmem:[%s2134_s1 + $0x20] sm:$0xff]   ;;  %v1661_v7 = vld [vmem:[%s2134_s1 + $0x30] sm:$0xff]   ;;  %v1662_v8 = vld [vmem:[%s2134_s1 + $0x38] sm:$0xff]  }
   0x4   :  { %1561 = vmatprep.subr.bf16.mxu0 %v1656_v1  ;;  %1640 = vmatprep.subr.bf16.mxu1 %v1656_v1  ;;  %v1679_v9 = vld [vmem:[%s2135_s0 + $0x80] sm:$0xff]   ;;  %v1664_v10 = vld [vmem:[%s2135_s0 + $0x8] sm:$0xff]   ;;  %v1665_v11 = vld [vmem:[%s2135_s0 + $0x10] sm:$0xff]  }
   0x5   :  { %1575 = vmatprep.mubr.bf16.mxu0 %v1663_v4  ;;  %1607 = vmatprep.mubr.bf16.mxu1 %v1679_v9  ;;  %v1680_v12 = vld [vmem:[%s2135_s0 + $0x88] sm:$0xff]   ;;  %v1681_v13 = vld [vmem:[%s2135_s0 + $0x90] sm:$0xff]   ;;  %v1666_v14 = vld [vmem:[%s2135_s0 + $0x18] sm:$0xff]  }
   0x6   :  { %v1667_v15 = vld [vmem:[%s2135_s0 + $0x20] sm:$0xff]   ;;  %v1682_v16 = vld [vmem:[%s2135_s0 + $0x98] sm:$0xff]   ;;  %v1668_v18 = vld [vmem:[%s2135_s0 + $0x28] sm:$0xff]  }
   0x7   :  { %1562 = vmatpush3.bf16.msra.mxu0 %v1656_v1  ;;  %1648 = vmatpush3.bf16.msra.mxu1 %v1656_v1  ;;  %v1683_v17 = vld [vmem:[%s2135_s0 + $0xa0] sm:$0xff]   ;;  %v1684_v19 = vld [vmem:[%s2135_s0 + $0xa8] sm:$0xff]   ;;  %v1669_v20 = vld [vmem:[%s2135_s0 + $0x30] sm:$0xff]  }
   0x8   :  { %1563 = vmatprep.subr.bf16.mxu0 %v1657_v2  ;;  %1641 = vmatprep.subr.bf16.mxu1 %v1657_v2  ;;  %v1685_v21 = vld [vmem:[%s2135_s0 + $0xb0] sm:$0xff]   ;;  %v1670_v22 = vld [vmem:[%s2135_s0 + $0x38] sm:$0xff]   ;;  %v1671_v24 = vld [vmem:[%s2135_s0 + $0x40] sm:$0xff]  }
   0x9   :  { %v1686_v23 = vld [vmem:[%s2135_s0 + $0xb8] sm:$0xff]   ;;  %v1687_v25 = vld [vmem:[%s2135_s0 + $0xc0] sm:$0xff]   ;;  %v1672_v26 = vld [vmem:[%s2135_s0 + $0x48] sm:$0xff]  }
   0xa   :  { %v1688_v27 = vld [vmem:[%s2135_s0 + $0xc8] sm:$0xff]   ;;  %v1673_v28 = vld [vmem:[%s2135_s0 + $0x50] sm:$0xff]   ;;  %v1674_v30 = vld [vmem:[%s2135_s0 + $0x58] sm:$0xff]  }
   0xb   :  { %1564 = vmatpush3.bf16.msra.mxu0 %v1657_v2  ;;  %1649 = vmatpush3.bf16.msra.mxu1 %v1657_v2  ;;  %v1689_v29 = vld [vmem:[%s2135_s0 + $0xd0] sm:$0xff]   ;;  %v1690_v31 = vld [vmem:[%s2135_s0 + $0xd8] sm:$0xff]   ;;  %v1675_v32 = vld [vmem:[%s2135_s0 + $0x60] sm:$0xff]  }
   0xc   :  { %1565 = vmatprep.subr.bf16.mxu0 %v1658_v3  ;;  %1642 = vmatprep.subr.bf16.mxu1 %v1658_v3  ;;  %v1691_v33 = vld [vmem:[%s2135_s0 + $0xe0] sm:$0xff]   ;;  %v1676_v34 = vld [vmem:[%s2135_s0 + $0x68] sm:$0xff]   ;;  %v1677_v36 = vld [vmem:[%s2135_s0 + $0x70] sm:$0xff]  }
   0xd   :  { %v1692_v35 = vld [vmem:[%s2135_s0 + $0xe8] sm:$0xff]   ;;  %v1693_v37 = vld [vmem:[%s2135_s0 + $0xf0] sm:$0xff]   ;;  %v1678_v38 = vld [vmem:[%s2135_s0 + $0x78] sm:$0xff]  }
   0xe   :  { %v1694_v39 = vld [vmem:[%s2135_s0 + $0xf8] sm:$0xff]  }
   0xf   :  { %1566 = vmatpush3.bf16.msra.mxu0 %v1658_v3  ;;  %1650 = vmatpush3.bf16.msra.mxu1 %v1658_v3 }
  0x10   :  { %1567 = vmatprep.subr.bf16.mxu0 %v1659_v5  ;;  %1643 = vmatprep.subr.bf16.mxu1 %v1659_v5 }
  0x13   :  { %1568 = vmatpush3.bf16.msra.mxu0 %v1659_v5  ;;  %1651 = vmatpush3.bf16.msra.mxu1 %v1659_v5 }
  0x14   :  { %1569 = vmatprep.subr.bf16.mxu0 %v1660_v6  ;;  %1644 = vmatprep.subr.bf16.mxu1 %v1660_v6 }
  0x17   :  { %1570 = vmatpush3.bf16.msra.mxu0 %v1660_v6  ;;  %1652 = vmatpush3.bf16.msra.mxu1 %v1660_v6 }
  0x18   :  { %1571 = vmatprep.subr.bf16.mxu0 %v1661_v7  ;;  %1645 = vmatprep.subr.bf16.mxu1 %v1661_v7 }
  0x1b   :  { %1572 = vmatpush3.bf16.msra.mxu0 %v1661_v7  ;;  %1653 = vmatpush3.bf16.msra.mxu1 %v1661_v7 }
  0x1c   :  { %1573 = vmatprep.subr.bf16.mxu0 %v1662_v8  ;;  %1646 = vmatprep.subr.bf16.mxu1 %v1662_v8 }
  0x1f   :  { %1574 = vmatpush3.bf16.msra.mxu0 %v1662_v8  ;;  %1654 = vmatpush3.bf16.msra.mxu1 %v1662_v8 }
  0x22   :  { %1576 = vmatmul.mubr.bf16.vlgmr.msra.gmra.mrb[0].mxu0 %v1664_v10  ;;  %1608 = vmatmul.mubr.bf16.vlgmr.msra.gmra.mrb[0].mxu1 %v1680_v12 }
  0x23   :  { %1579 = vmatprep.mubr.bf16.mxu0 %v1665_v11  ;;  %1611 = vmatprep.mubr.bf16.mxu1 %v1681_v13 }
  0x2a   :  { %1580 = vmatmul.mubr.bf16.gmra.mrb[4].mxu0 %v1666_v14  ;;  %1612 = vmatmul.mubr.bf16.gmra.mrb[4].mxu1 %v1682_v16 }
  0x2b   :  { %1583 = vmatprep.mubr.bf16.mxu0 %v1667_v15  ;;  %1615 = vmatprep.mubr.bf16.mxu1 %v1683_v17 }
  0x32   :  { %1584 = vmatmul.mubr.bf16.gmra.mrb[8].mxu0 %v1668_v18  ;;  %1616 = vmatmul.mubr.bf16.gmra.mrb[8].mxu1 %v1684_v19 }
  0x33   :  { %1587 = vmatprep.mubr.bf16.mxu0 %v1669_v20  ;;  %1619 = vmatprep.mubr.bf16.mxu1 %v1685_v21 }
  0x3a   :  { %1588 = vmatmul.mubr.bf16.gmra.mrb[12].mxu0 %v1670_v22  ;;  %1620 = vmatmul.mubr.bf16.gmra.mrb[12].mxu1 %v1686_v23 }
  0x3b   :  { %1591 = vmatprep.mubr.bf16.mxu0 %v1671_v24  ;;  %1623 = vmatprep.mubr.bf16.mxu1 %v1687_v25 }
  0x42   :  { %1592 = vmatmul.mubr.bf16.gmra.mrb[16].mxu0 %v1672_v26  ;;  %1624 = vmatmul.mubr.bf16.gmra.mrb[16].mxu1 %v1688_v27 }
  0x43   :  { %1595 = vmatprep.mubr.bf16.mxu0 %v1673_v28  ;;  %1627 = vmatprep.mubr.bf16.mxu1 %v1689_v29 }
  0x4a   :  { %1596 = vmatmul.mubr.bf16.gmra.mrb[20].mxu0 %v1674_v30  ;;  %1628 = vmatmul.mubr.bf16.gmra.mrb[20].mxu1 %v1690_v31 }
  0x4b   :  { %1599 = vmatprep.mubr.bf16.mxu0 %v1675_v32  ;;  %1631 = vmatprep.mubr.bf16.mxu1 %v1691_v33 }
  0x52   :  { %1600 = vmatmul.mubr.bf16.gmra.mrb[24].mxu0 %v1676_v34  ;;  %1632 = vmatmul.mubr.bf16.gmra.mrb[24].mxu1 %v1692_v35 }
  0x53   :  { %1603 = vmatprep.mubr.bf16.mxu0 %v1677_v36  ;;  %1635 = vmatprep.mubr.bf16.mxu1 %v1693_v37 }
  0x5a   :  { %1604 = vmatmul.mubr.bf16.gmra.mrb[28].mxu0 %v1678_v38  ;;  %1636 = vmatmul.mubr.bf16.gmra.mrb[28].mxu1 %v1694_v39 }
  0xf5   :  { %v1577_v40 = vpop.f32.mrb[0].mxu0  ;;  %v1840_v41 = vpop.f32.mrb[0].mxu1 }
  0xf6   :  { %v369_v42 = vpop.f32.mrb[1].mxu0  ;;  %v1842_v43 = vpop.f32.mrb[1].mxu1  ;;  %v1015_v55 = vmul.f32 %v1577_v40, %v1577_v40 }
  0xf7   :  { %v1578_v44 = vpop.f32.mrb[2].mxu0  ;;  %v1844_v45 = vpop.f32.mrb[2].mxu1  ;;  %v1013_v46 = vmul.f32 %v369_v42, %v369_v42 }
  0xf8   :  { %v1336_v47 = vpack.c.bf16 %v1578_v44, %v1577_v40  ;;  %v372_v48 = vpop.f32.mrb[3].mxu0  ;;  %v1416_v49 = vpack.c.bf16 %v1844_v45, %v1840_v41  ;;  %v1848_v50 = vpop.f32.mrb[3].mxu1  ;;  %v1016_v58 = vmul.f32 %v1578_v44, %v1578_v44 }
  0xf9   :  { %v1331_v51 = vpack.c.bf16 %v372_v48, %v369_v42  ;;  %v944_v52 = vadd.f32 %v372_v48, %v369_v42  ;;  %v1014_v53 = vmul.f32 %v372_v48, %v372_v48  ;;  %v1411_v54 = vpack.c.bf16 %v1848_v50, %v1842_v43 }
  0xfa   :  { %1488 = vst [vmem:[%s2136_s2 + $0x8] sm:$0xff] %v1336_v47   ;;  %1504 = vst [vmem:[%s2136_s2 + $0x88] sm:$0xff] %v1416_v49  }
  0xfb   :  { %1332 = vst [vmem:[%s2136_s2] sm:$0xff] %v1331_v51   ;;  %v945_v56 = vadd.f32 %v1577_v40, %v944_v52  ;;  %v1077_v57 = vadd.f32 %v1014_v53, %v1013_v46  ;;  %1503 = vst [vmem:[%s2136_s2 + $0x80] sm:$0xff] %v1411_v54  }
  0xfd   :  { %v1078_v59 = vadd.f32 %v1077_v57, %v1015_v55  ;;  %v1581_v60 = vpop.f32.mrb[4].mxu0  ;;  %v946_v61 = vadd.f32 %v1578_v44, %v945_v56  ;;  %v1864_v62 = vpop.f32.mrb[4].mxu1 }
  0xfe   :  { %v385_v63 = vpop.f32.mrb[5].mxu0  ;;  %v1866_v0 = vpop.f32.mrb[5].mxu1  ;;  %v1019_v15 = vmul.f32 %v1581_v60, %v1581_v60 }
  0xff   :  { %v947_v1 = vadd.f32 %v946_v61, %v385_v63  ;;  %v1017_v2 = vmul.f32 %v385_v63, %v385_v63  ;;  %v1079_v3 = vadd.f32 %v1078_v59, %v1016_v58  ;;  %v1582_v4 = vpop.f32.mrb[6].mxu0  ;;  %v1868_v5 = vpop.f32.mrb[6].mxu1 }
 0x100   :  { %v1346_v6 = vpack.c.bf16 %v1582_v4, %v1581_v60  ;;  %v388_v7 = vpop.f32.mrb[7].mxu0  ;;  %v1426_v8 = vpack.c.bf16 %v1868_v5, %v1864_v62  ;;  %v1872_v9 = vpop.f32.mrb[7].mxu1  ;;  %v1020_v18 = vmul.f32 %v1582_v4, %v1582_v4 }
 0x101   :  { %v1080_v10 = vadd.f32 %v1079_v3, %v1017_v2  ;;  %v1341_v11 = vpack.c.bf16 %v388_v7, %v385_v63  ;;  %v948_v12 = vadd.f32 %v947_v1, %v388_v7  ;;  %v1018_v13 = vmul.f32 %v388_v7, %v388_v7 }
 0x102   :  { %1490 = vst [vmem:[%s2136_s2 + $0x18] sm:$0xff] %v1346_v6   ;;  %1506 = vst [vmem:[%s2136_s2 + $0x98] sm:$0xff] %v1426_v8   ;;  %v1421_v14 = vpack.c.bf16 %v1872_v9, %v1866_v0 }
 0x103   :  { %1489 = vst [vmem:[%s2136_s2 + $0x10] sm:$0xff] %v1341_v11   ;;  %v949_v16 = vadd.f32 %v1581_v60, %v948_v12  ;;  %v1081_v17 = vadd.f32 %v1080_v10, %v1018_v13 }
 0x104   :  { %1505 = vst [vmem:[%s2136_s2 + $0x90] sm:$0xff] %v1421_v14  }
 0x105   :  { %v1082_v19 = vadd.f32 %v1081_v17, %v1019_v15  ;;  %v1585_v20 = vpop.f32.mrb[8].mxu0  ;;  %v950_v21 = vadd.f32 %v1582_v4, %v949_v16  ;;  %v1888_v22 = vpop.f32.mrb[8].mxu1 }
 0x106   :  { %v401_v23 = vpop.f32.mrb[9].mxu0  ;;  %v1890_v24 = vpop.f32.mrb[9].mxu1  ;;  %v1023_v39 = vmul.f32 %v1585_v20, %v1585_v20 }
 0x107   :  { %v951_v25 = vadd.f32 %v950_v21, %v401_v23  ;;  %v1021_v26 = vmul.f32 %v401_v23, %v401_v23  ;;  %v1083_v27 = vadd.f32 %v1082_v19, %v1020_v18  ;;  %v1586_v28 = vpop.f32.mrb[10].mxu0  ;;  %v1892_v29 = vpop.f32.mrb[10].mxu1 }
 0x108   :  { %v1356_v30 = vpack.c.bf16 %v1586_v28, %v1585_v20  ;;  %v404_v31 = vpop.f32.mrb[11].mxu0  ;;  %v1436_v32 = vpack.c.bf16 %v1892_v29, %v1888_v22  ;;  %v1896_v33 = vpop.f32.mrb[11].mxu1  ;;  %v1024_v44 = vmul.f32 %v1586_v28, %v1586_v28 }
 0x109   :  { %v1084_v34 = vadd.f32 %v1083_v27, %v1021_v26  ;;  %v1351_v35 = vpack.c.bf16 %v404_v31, %v401_v23  ;;  %v952_v36 = vadd.f32 %v951_v25, %v404_v31  ;;  %v1022_v37 = vmul.f32 %v404_v31, %v404_v31 }
 0x10a   :  { %1492 = vst [vmem:[%s2136_s2 + $0x28] sm:$0xff] %v1356_v30   ;;  %1508 = vst [vmem:[%s2136_s2 + $0xa8] sm:$0xff] %v1436_v32   ;;  %v1431_v38 = vpack.c.bf16 %v1896_v33, %v1890_v24 }
 0x10b   :  { %1491 = vst [vmem:[%s2136_s2 + $0x20] sm:$0xff] %v1351_v35   ;;  %v953_v40 = vadd.f32 %v1585_v20, %v952_v36  ;;  %v1085_v42 = vadd.f32 %v1084_v34, %v1022_v37 }
 0x10c   :  { %1507 = vst [vmem:[%s2136_s2 + $0xa0] sm:$0xff] %v1431_v38  }
 0x10d   :  { %v1086_v46 = vadd.f32 %v1085_v42, %v1023_v39  ;;  %v1589_v47 = vpop.f32.mrb[12].mxu0  ;;  %v954_v48 = vadd.f32 %v1586_v28, %v953_v40  ;;  %v1912_v49 = vpop.f32.mrb[12].mxu1 }
 0x10e   :  { %v417_v51 = vpop.f32.mrb[13].mxu0  ;;  %v1914_v52 = vpop.f32.mrb[13].mxu1  ;;  %v1027_v6 = vmul.f32 %v1589_v47, %v1589_v47 }
 0x10f   :  { %v955_v53 = vadd.f32 %v954_v48, %v417_v51  ;;  %v1025_v54 = vmul.f32 %v417_v51, %v417_v51  ;;  %v1087_v55 = vadd.f32 %v1086_v46, %v1024_v44  ;;  %v1590_v56 = vpop.f32.mrb[14].mxu0  ;;  %v1916_v57 = vpop.f32.mrb[14].mxu1 }
 0x110   :  { %v1366_v58 = vpack.c.bf16 %v1590_v56, %v1589_v47  ;;  %v420_v59 = vpop.f32.mrb[15].mxu0  ;;  %v1446_v60 = vpack.c.bf16 %v1916_v57, %v1912_v49  ;;  %v1920_v61 = vpop.f32.mrb[15].mxu1  ;;  %v1028_v10 = vmul.f32 %v1590_v56, %v1590_v56 }
 0x111   :  { %v1088_v63 = vadd.f32 %v1087_v55, %v1025_v54  ;;  %v1361_v1 = vpack.c.bf16 %v420_v59, %v417_v51  ;;  %v956_v2 = vadd.f32 %v955_v53, %v420_v59  ;;  %v1026_v3 = vmul.f32 %v420_v59, %v420_v59 }
 0x112   :  { %1494 = vst [vmem:[%s2136_s2 + $0x38] sm:$0xff] %v1366_v58   ;;  %1510 = vst [vmem:[%s2136_s2 + $0xb8] sm:$0xff] %v1446_v60   ;;  %v1441_v4 = vpack.c.bf16 %v1920_v61, %v1914_v52 }
 0x113   :  { %1493 = vst [vmem:[%s2136_s2 + $0x30] sm:$0xff] %v1361_v1   ;;  %v957_v7 = vadd.f32 %v1589_v47, %v956_v2  ;;  %v1089_v8 = vadd.f32 %v1088_v63, %v1026_v3 }
 0x114   :  { %1509 = vst [vmem:[%s2136_s2 + $0xb0] sm:$0xff] %v1441_v4  }
 0x115   :  { %v1090_v11 = vadd.f32 %v1089_v8, %v1027_v6  ;;  %v1593_v12 = vpop.f32.mrb[16].mxu0  ;;  %v958_v13 = vadd.f32 %v1590_v56, %v957_v7  ;;  %v1936_v14 = vpop.f32.mrb[16].mxu1 }
 0x116   :  { %v433_v15 = vpop.f32.mrb[17].mxu0  ;;  %v1938_v16 = vpop.f32.mrb[17].mxu1  ;;  %v1031_v35 = vmul.f32 %v1593_v12, %v1593_v12 }
 0x117   :  { %v959_v17 = vadd.f32 %v958_v13, %v433_v15  ;;  %v1029_v18 = vmul.f32 %v433_v15, %v433_v15  ;;  %v1091_v19 = vadd.f32 %v1090_v11, %v1028_v10  ;;  %v1594_v20 = vpop.f32.mrb[18].mxu0  ;;  %v1940_v21 = vpop.f32.mrb[18].mxu1 }
 0x118   :  { %v1376_v23 = vpack.c.bf16 %v1594_v20, %v1593_v12  ;;  %v436_v25 = vpop.f32.mrb[19].mxu0  ;;  %v1456_v26 = vpack.c.bf16 %v1940_v21, %v1936_v14  ;;  %v1944_v27 = vpop.f32.mrb[19].mxu1  ;;  %v1032_v38 = vmul.f32 %v1594_v20, %v1594_v20 }
 0x119   :  { %v1092_v28 = vadd.f32 %v1091_v19, %v1029_v18  ;;  %v1371_v30 = vpack.c.bf16 %v436_v25, %v433_v15  ;;  %v960_v31 = vadd.f32 %v959_v17, %v436_v25  ;;  %v1030_v32 = vmul.f32 %v436_v25, %v436_v25 }
 0x11a   :  { %1496 = vst [vmem:[%s2136_s2 + $0x48] sm:$0xff] %v1376_v23   ;;  %1512 = vst [vmem:[%s2136_s2 + $0xc8] sm:$0xff] %v1456_v26   ;;  %v1451_v34 = vpack.c.bf16 %v1944_v27, %v1938_v16 }
 0x11b   :  { %1495 = vst [vmem:[%s2136_s2 + $0x40] sm:$0xff] %v1371_v30   ;;  %v961_v36 = vadd.f32 %v1593_v12, %v960_v31  ;;  %v1093_v37 = vadd.f32 %v1092_v28, %v1030_v32 }
 0x11c   :  { %1511 = vst [vmem:[%s2136_s2 + $0xc0] sm:$0xff] %v1451_v34  }
 0x11d   :  { %v1094_v39 = vadd.f32 %v1093_v37, %v1031_v35  ;;  %v1597_v40 = vpop.f32.mrb[20].mxu0  ;;  %v962_v42 = vadd.f32 %v1594_v20, %v961_v36  ;;  %v1960_v44 = vpop.f32.mrb[20].mxu1 }
 0x11e   :  { %v449_v46 = vpop.f32.mrb[21].mxu0  ;;  %v1962_v47 = vpop.f32.mrb[21].mxu1  ;;  %v1035_v6 = vmul.f32 %v1597_v40, %v1597_v40 }
 0x11f   :  { %v963_v48 = vadd.f32 %v962_v42, %v449_v46  ;;  %v1033_v51 = vmul.f32 %v449_v46, %v449_v46  ;;  %v1095_v53 = vadd.f32 %v1094_v39, %v1032_v38  ;;  %v1598_v54 = vpop.f32.mrb[22].mxu0  ;;  %v1964_v55 = vpop.f32.mrb[22].mxu1 }
 0x120   :  { %v1386_v56 = vpack.c.bf16 %v1598_v54, %v1597_v40  ;;  %v452_v58 = vpop.f32.mrb[23].mxu0  ;;  %v1466_v59 = vpack.c.bf16 %v1964_v55, %v1960_v44  ;;  %v1968_v60 = vpop.f32.mrb[23].mxu1  ;;  %v1036_v10 = vmul.f32 %v1598_v54, %v1598_v54 }
 0x121   :  { %v1096_v63 = vadd.f32 %v1095_v53, %v1033_v51  ;;  %v1381_v1 = vpack.c.bf16 %v452_v58, %v449_v46  ;;  %v964_v2 = vadd.f32 %v963_v48, %v452_v58  ;;  %v1034_v3 = vmul.f32 %v452_v58, %v452_v58 }
 0x122   :  { %1498 = vst [vmem:[%s2136_s2 + $0x58] sm:$0xff] %v1386_v56   ;;  %1514 = vst [vmem:[%s2136_s2 + $0xd8] sm:$0xff] %v1466_v59   ;;  %v1461_v4 = vpack.c.bf16 %v1968_v60, %v1962_v47 }
 0x123   :  { %1497 = vst [vmem:[%s2136_s2 + $0x50] sm:$0xff] %v1381_v1   ;;  %v965_v7 = vadd.f32 %v1597_v40, %v964_v2  ;;  %v1097_v8 = vadd.f32 %v1096_v63, %v1034_v3 }
 0x124   :  { %1513 = vst [vmem:[%s2136_s2 + $0xd0] sm:$0xff] %v1461_v4  }
 0x125   :  { %v1098_v11 = vadd.f32 %v1097_v8, %v1035_v6  ;;  %v1601_v12 = vpop.f32.mrb[24].mxu0  ;;  %v966_v13 = vadd.f32 %v1598_v54, %v965_v7  ;;  %v1984_v15 = vpop.f32.mrb[24].mxu1 }
 0x126   :  { %v465_v17 = vpop.f32.mrb[25].mxu0  ;;  %v1986_v18 = vpop.f32.mrb[25].mxu1  ;;  %v1039_v39 = vmul.f32 %v1601_v12, %v1601_v12 }
 0x127   :  { %v967_v19 = vadd.f32 %v966_v13, %v465_v17  ;;  %v1037_v20 = vmul.f32 %v465_v17, %v465_v17  ;;  %v1099_v23 = vadd.f32 %v1098_v11, %v1036_v10  ;;  %v1602_v25 = vpop.f32.mrb[26].mxu0  ;;  %v1988_v26 = vpop.f32.mrb[26].mxu1 }
 0x128   :  { %v1396_v28 = vpack.c.bf16 %v1602_v25, %v1601_v12  ;;  %v468_v30 = vpop.f32.mrb[27].mxu0  ;;  %v1476_v31 = vpack.c.bf16 %v1988_v26, %v1984_v15  ;;  %v1992_v32 = vpop.f32.mrb[27].mxu1  ;;  %v1040_v46 = vmul.f32 %v1602_v25, %v1602_v25 }
 0x129   :  { %v1100_v34 = vadd.f32 %v1099_v23, %v1037_v20  ;;  %v1391_v35 = vpack.c.bf16 %v468_v30, %v465_v17  ;;  %v968_v36 = vadd.f32 %v967_v19, %v468_v30  ;;  %v1038_v37 = vmul.f32 %v468_v30, %v468_v30 }
 0x12a   :  { %1500 = vst [vmem:[%s2136_s2 + $0x68] sm:$0xff] %v1396_v28   ;;  %1516 = vst [vmem:[%s2136_s2 + $0xe8] sm:$0xff] %v1476_v31   ;;  %v1471_v38 = vpack.c.bf16 %v1992_v32, %v1986_v18  ;;  %v1045_v31 = vmul.f32 %v1842_v43, %v1842_v43 }
 0x12b   :  { %1499 = vst [vmem:[%s2136_s2 + $0x60] sm:$0xff] %v1391_v35   ;;  %v969_v40 = vadd.f32 %v1601_v12, %v968_v36  ;;  %v1101_v42 = vadd.f32 %v1100_v34, %v1038_v37 }
 0x12c   :  { %1515 = vst [vmem:[%s2136_s2 + $0xe0] sm:$0xff] %v1471_v38   ;;  %v1046_v38 = vmul.f32 %v1848_v50, %v1848_v50 }
 0x12d   :  { %v1102_v48 = vadd.f32 %v1101_v42, %v1039_v39  ;;  %v1605_v51 = vpop.f32.mrb[28].mxu0  ;;  %v970_v53 = vadd.f32 %v1602_v25, %v969_v40  ;;  %v2008_v54 = vpop.f32.mrb[28].mxu1  ;;  %v1047_v39 = vmul.f32 %v1840_v41, %v1840_v41 }
 0x12e   :  { %v481_v56 = vpop.f32.mrb[29].mxu0  ;;  %v2010_v58 = vpop.f32.mrb[29].mxu1  ;;  %v1043_v19 = vmul.f32 %v1605_v51, %v1605_v51 }
 0x12f   :  { %v971_v59 = vadd.f32 %v970_v53, %v481_v56  ;;  %v1041_v63 = vmul.f32 %v481_v56, %v481_v56  ;;  %v1103_v1 = vadd.f32 %v1102_v48, %v1040_v46  ;;  %v1606_v2 = vpop.f32.mrb[30].mxu0  ;;  %v2012_v3 = vpop.f32.mrb[30].mxu1  ;;  %v1048_v46 = vmul.f32 %v1844_v45, %v1844_v45 }
 0x130   :  { %v1406_v4 = vpack.c.bf16 %v1606_v2, %v1605_v51  ;;  %v484_v6 = vpop.f32.mrb[31].mxu0  ;;  %v1486_v7 = vpack.c.bf16 %v2012_v3, %v2008_v54  ;;  %v2016_v8 = vpop.f32.mrb[31].mxu1  ;;  %v1044_v25 = vmul.f32 %v1606_v2, %v1606_v2 }
 0x131   :  { %v1104_v10 = vadd.f32 %v1103_v1, %v1041_v63  ;;  %v1401_v11 = vpack.c.bf16 %v484_v6, %v481_v56  ;;  %v972_v12 = vadd.f32 %v971_v59, %v484_v6  ;;  %v1042_v13 = vmul.f32 %v484_v6, %v484_v6 }
 0x132   :  { %1502 = vst [vmem:[%s2136_s2 + $0x78] sm:$0xff] %v1406_v4   ;;  %1518 = vst [vmem:[%s2136_s2 + $0xf8] sm:$0xff] %v1486_v7   ;;  %v1481_v17 = vpack.c.bf16 %v2016_v8, %v2010_v58  ;;  %v1050_v63 = vmul.f32 %v1872_v9, %v1872_v9 }
 0x133   :  { %1501 = vst [vmem:[%s2136_s2 + $0x70] sm:$0xff] %v1401_v11   ;;  %v973_v20 = vadd.f32 %v1605_v51, %v972_v12  ;;  %v1105_v23 = vadd.f32 %v1104_v10, %v1042_v13  ;;  %v1054_v12 = vmul.f32 %v1896_v33, %v1896_v33 }
 0x134   :  { %1517 = vst [vmem:[%s2136_s2 + $0xf0] sm:$0xff] %v1481_v17  }
 0x135   :  { %v1106_v28 = vadd.f32 %v1105_v23, %v1043_v19  ;;  %v974_v30 = vadd.f32 %v1606_v2, %v973_v20 }
 0x137   :  { %v975_v34 = vadd.f32 %v974_v30, %v1842_v43  ;;  %v1107_v35 = vadd.f32 %v1106_v28, %v1044_v25  ;;  %v1049_v43 = vmul.f32 %v1866_v0, %v1866_v0  ;;  %v1058_v30 = vmul.f32 %v1920_v61, %v1920_v61 }
 0x139   :  { %v1108_v36 = vadd.f32 %v1107_v35, %v1045_v31  ;;  %v976_v37 = vadd.f32 %v975_v34, %v1848_v50 }
 0x13b   :  { %v977_v40 = vadd.f32 %v1840_v41, %v976_v37  ;;  %v1109_v42 = vadd.f32 %v1108_v36, %v1046_v38  ;;  %v1051_v41 = vmul.f32 %v1864_v62, %v1864_v62 }
 0x13d   :  { %v1110_v48 = vadd.f32 %v1109_v42, %v1047_v39  ;;  %v978_v51 = vadd.f32 %v1844_v45, %v977_v40  ;;  %v1052_v45 = vmul.f32 %v1868_v5, %v1868_v5  ;;  %v1062_v40 = vmul.f32 %v1944_v27, %v1944_v27 }
 0x13f   :  { %v979_v53 = vadd.f32 %v978_v51, %v1866_v0  ;;  %v1111_v56 = vadd.f32 %v1110_v48, %v1048_v46  ;;  %v1053_v0 = vmul.f32 %v1890_v24, %v1890_v24 }
 0x141   :  { %v1112_v59 = vadd.f32 %v1111_v56, %v1049_v43  ;;  %v980_v50 = vadd.f32 %v979_v53, %v1872_v9 }
 0x143   :  { %v981_v1 = vadd.f32 %v1864_v62, %v980_v50  ;;  %v1113_v2 = vadd.f32 %v1112_v59, %v1050_v63  ;;  %v1055_v62 = vmul.f32 %v1888_v22, %v1888_v22  ;;  %v1066_v59 = vmul.f32 %v1968_v60, %v1968_v60 }
 0x145   :  { %v1114_v4 = vadd.f32 %v1113_v2, %v1051_v41  ;;  %v982_v6 = vadd.f32 %v1868_v5, %v981_v1  ;;  %v1056_v5 = vmul.f32 %v1892_v29, %v1892_v29 }
 0x147   :  { %v983_v7 = vadd.f32 %v982_v6, %v1890_v24  ;;  %v1115_v10 = vadd.f32 %v1114_v4, %v1052_v45  ;;  %v1057_v24 = vmul.f32 %v1914_v52, %v1914_v52  ;;  %v1070_v6 = vmul.f32 %v1992_v32, %v1992_v32 }
 0x149   :  { %v1116_v11 = vadd.f32 %v1115_v10, %v1053_v0  ;;  %v984_v9 = vadd.f32 %v983_v7, %v1896_v33 }
 0x14b   :  { %v985_v13 = vadd.f32 %v1888_v22, %v984_v9  ;;  %v1117_v17 = vadd.f32 %v1116_v11, %v1054_v12  ;;  %v1059_v22 = vmul.f32 %v1912_v49, %v1912_v49 }
 0x14d   :  { %v1118_v19 = vadd.f32 %v1117_v17, %v1055_v62  ;;  %v986_v20 = vadd.f32 %v1892_v29, %v985_v13  ;;  %v1060_v29 = vmul.f32 %v1916_v57, %v1916_v57  ;;  %v1074_v13 = vmul.f32 %v2016_v8, %v2016_v8 }
 0x14f   :  { %v987_v23 = vadd.f32 %v986_v20, %v1914_v52  ;;  %v1119_v25 = vadd.f32 %v1118_v19, %v1056_v5  ;;  %v1061_v52 = vmul.f32 %v1938_v16, %v1938_v16 }
 0x151   :  { %v1120_v28 = vadd.f32 %v1119_v25, %v1057_v24  ;;  %v988_v33 = vadd.f32 %v987_v23, %v1920_v61 }
 0x153   :  { %v989_v31 = vadd.f32 %v1912_v49, %v988_v33  ;;  %v1121_v34 = vadd.f32 %v1120_v28, %v1058_v30  ;;  %v1063_v49 = vmul.f32 %v1936_v14, %v1936_v14 }
 0x155   :  { %v1122_v35 = vadd.f32 %v1121_v34, %v1059_v22  ;;  %v990_v36 = vadd.f32 %v1916_v57, %v989_v31  ;;  %v1064_v57 = vmul.f32 %v1940_v21, %v1940_v21 }
 0x157   :  { %v991_v37 = vadd.f32 %v990_v36, %v1938_v16  ;;  %v1123_v38 = vadd.f32 %v1122_v35, %v1060_v29  ;;  %v1065_v16 = vmul.f32 %v1962_v47, %v1962_v47 }
 0x159   :  { %v1124_v39 = vadd.f32 %v1123_v38, %v1061_v52  ;;  %v992_v61 = vadd.f32 %v991_v37, %v1944_v27 }
 0x15b   :  { %v993_v42 = vadd.f32 %v1936_v14, %v992_v61  ;;  %v1125_v46 = vadd.f32 %v1124_v39, %v1062_v40  ;;  %v1067_v14 = vmul.f32 %v1960_v44, %v1960_v44 }
 0x15d   :  { %v1126_v48 = vadd.f32 %v1125_v46, %v1063_v49  ;;  %v994_v51 = vadd.f32 %v1940_v21, %v993_v42  ;;  %v1068_v21 = vmul.f32 %v1964_v55, %v1964_v55 }
 0x15f   :  { %v995_v43 = vadd.f32 %v994_v51, %v1962_v47  ;;  %v1127_v53 = vadd.f32 %v1126_v48, %v1064_v57  ;;  %v1069_v47 = vmul.f32 %v1986_v18, %v1986_v18 }
 0x161   :  { %v1128_v56 = vadd.f32 %v1127_v53, %v1065_v16  ;;  %v996_v27 = vadd.f32 %v995_v43, %v1968_v60 }
 0x163   :  { %v997_v50 = vadd.f32 %v1960_v44, %v996_v27  ;;  %v1129_v63 = vadd.f32 %v1128_v56, %v1066_v59  ;;  %v1071_v44 = vmul.f32 %v1984_v15, %v1984_v15 }
 0x165   :  { %v1130_v41 = vadd.f32 %v1129_v63, %v1067_v14  ;;  %v998_v1 = vadd.f32 %v1964_v55, %v997_v50  ;;  %v1072_v55 = vmul.f32 %v1988_v26, %v1988_v26 }
 0x167   :  { %v999_v2 = vadd.f32 %v998_v1, %v1986_v18  ;;  %v1131_v45 = vadd.f32 %v1130_v41, %v1068_v21  ;;  %v1073_v18 = vmul.f32 %v2010_v58, %v2010_v58 }
 0x169   :  { %v1132_v4 = vadd.f32 %v1131_v45, %v1069_v47  ;;  %v1000_v60 = vadd.f32 %v999_v2, %v1992_v32 }
 0x16b   :  { %v1001_v0 = vadd.f32 %v1984_v15, %v1000_v60  ;;  %v1133_v7 = vadd.f32 %v1132_v4, %v1070_v6  ;;  %v1075_v15 = vmul.f32 %v2008_v54, %v2008_v54 }
 0x16d   :  { %v1134_v10 = vadd.f32 %v1133_v7, %v1071_v44  ;;  %v1002_v11 = vadd.f32 %v1988_v26, %v1001_v0  ;;  %v1076_v26 = vmul.f32 %v2012_v3, %v2012_v3 }
 0x16f   :  { %v1003_v9 = vadd.f32 %v1002_v11, %v2010_v58  ;;  %v1135_v12 = vadd.f32 %v1134_v10, %v1072_v55 }
 0x171   :  { %v1136_v62 = vadd.f32 %v1135_v12, %v1073_v18  ;;  %v1004_v32 = vadd.f32 %v1003_v9, %v2016_v8 }
 0x173   :  { %v1005_v17 = vadd.f32 %v2008_v54, %v1004_v32  ;;  %v1137_v5 = vadd.f32 %v1136_v62, %v1074_v13 }
 0x175   :  { %v1006_v19 = vadd.f32 %v2012_v3, %v1005_v17  ;;  %v1138_v20 = vadd.f32 %v1137_v5, %v1075_v15 }
 0x177   :  { %v1007_v58 = vrot.slane %v1006_v19, 4  ;;  %v1139_v24 = vadd.f32 %v1138_v20, %v1076_v26 }
 0x179   :  { %v1008_v23 = vadd.f32 %v1007_v58, %v1006_v19  ;;  %v1140_v25 = vrot.slane %v1139_v24, 4 }
 0x17b   :  { %v1009_v28 = vrot.slane %v1008_v23, 2  ;;  %v1141_v33 = vadd.f32 %v1140_v25, %v1139_v24 }
 0x17d   :  { %v1010_v30 = vadd.f32 %v1009_v28, %v1008_v23  ;;  %v1142_v8 = vrot.slane %v1141_v33, 2 }
 0x17f   :  { %v1011_v22 = vrot.slane %v1010_v30, 1  ;;  %v1143_v31 = vadd.f32 %v1142_v8, %v1141_v33 }
 0x181   :  { %v1012_v34 = vadd.f32 %v1011_v22, %v1010_v30  ;;  %v1144_v29 = vrot.slane %v1143_v31, 1 }
 0x183   :  { %v1145_v54 = vadd.f32 %v1144_v29, %v1143_v31  ;;  %1146 = vst [vmem:[%s2137_s3] sm:$0xff] %v1012_v34 }
 0x185   :  { %1147 = vst [vmem:[%s2138_s4] sm:$0xff] %v1145_v54 }

// kernel: discriminator_forward.7
= control target key start
LH: loop header
LB: loop body
LE: loop exit
PB: predicated region body
PF: predicated region fallthrough
CT: control target
= control target key end

     0   :  { %s888_s1 = inlined_call_operand.vmem [shape: bf16[256,128], index: 1, kind: input, shape index: {}]   ;;  %s889_s0 = inlined_call_operand.vmem [shape: bf16[128,256], index: 0, kind: input, shape index: {}]   ;;  %s890_s2 = inlined_call_operand.vmem [shape: bf16[128,128], index: 2, kind: output, shape index: {0}]   ;;  %s891_s3 = inlined_call_operand.vmem [shape: f32[8,128], index: 3, kind: output, shape index: {1}]   ;;  %s892_s4 = inlined_call_operand.vmem [shape: f32[8,128], index: 4, kind: output, shape index: {2}]  }
   0x1   :  { %v679_v0 = vld [vmem:[%s888_s1 + $0x40] sm:$0xff]   ;;  %v681_v2 = vld [vmem:[%s888_s1 + $0x48] sm:$0xff]   ;;  %v683_v4 = vld [vmem:[%s888_s1 + $0x50] sm:$0xff]  }
   0x2   :  { %v680_v1 = vld [vmem:[%s888_s1] sm:$0xff]   ;;  %599 = vmatprep.subr.bf16.mxu0 %v679_v0  ;;  %663 = vmatprep.subr.bf16.mxu1 %v679_v0  ;;  %v682_v3 = vld [vmem:[%s888_s1 + $0x8] sm:$0xff]   ;;  %v684_v5 = vld [vmem:[%s888_s1 + $0x10] sm:$0xff]  }
   0x3   :  { %600 = vmatpush3.bf16.msra.mxu0 %v680_v1  ;;  %671 = vmatpush3.bf16.msra.mxu1 %v680_v1  ;;  %v685_v6 = vld [vmem:[%s888_s1 + $0x58] sm:$0xff]   ;;  %v687_v8 = vld [vmem:[%s888_s1 + $0x60] sm:$0xff]   ;;  %v689_v10 = vld [vmem:[%s888_s1 + $0x68] sm:$0xff]  }
   0x4   :  { %601 = vmatprep.subr.bf16.mxu0 %v681_v2  ;;  %664 = vmatprep.subr.bf16.mxu1 %v681_v2  ;;  %v686_v7 = vld [vmem:[%s888_s1 + $0x18] sm:$0xff]   ;;  %v688_v9 = vld [vmem:[%s888_s1 + $0x20] sm:$0xff]   ;;  %v690_v12 = vld [vmem:[%s888_s1 + $0x28] sm:$0xff]  }
   0x5   :  { %v697_v11 = vld [vmem:[%s889_s0 + $0x4] ss:$8 sps:$4 sm:$0xff]   ;;  %v691_v14 = vld [vmem:[%s888_s1 + $0x70] sm:$0xff]   ;;  %v693_v16 = vld [vmem:[%s888_s1 + $0x78] sm:$0xff]  }
   0x6   :  { %v703_v13 = vld [vmem:[%s889_s0 + $0x44] ss:$8 sps:$4 sm:$0xff]   ;;  %271 = vmatprep.mubr.bf16.mxu0 %v697_v11  ;;  %v692_v15 = vld [vmem:[%s888_s1 + $0x30] sm:$0xff]   ;;  %v694_v17 = vld [vmem:[%s888_s1 + $0x38] sm:$0xff]  }
   0x7   :  { %602 = vmatpush3.bf16.msra.mxu0 %v682_v3  ;;  %672 = vmatpush3.bf16.msra.mxu1 %v682_v3  ;;  %v695_v18 = vld [vmem:[%s889_s0] ss:$8 sps:$4 sm:$0xff]   ;;  %v698_v20 = vld [vmem:[%s889_s0 + $0x14] ss:$8 sps:$4 sm:$0xff]   ;;  %v700_v22 = vld [vmem:[%s889_s0 + $0x10] ss:$8 sps:$4 sm:$0xff]  }
   0x8   :  { %603 = vmatprep.subr.bf16.mxu0 %v683_v4  ;;  %665 = vmatprep.subr.bf16.mxu1 %v683_v4  ;;  %v701_v19 = vld [vmem:[%s889_s0 + $0x40] ss:$8 sps:$4 sm:$0xff]   ;;  %v707_v21 = vld [vmem:[%s889_s0 + $0x54] ss:$8 sps:$4 sm:$0xff]   ;;  %v709_v23 = vld [vmem:[%s889_s0 + $0x50] ss:$8 sps:$4 sm:$0xff]  }
   0x9   :  { %303 = vmatprep.mubr.bf16.mxu1 %v703_v13  ;;  %v704_v24 = vld [vmem:[%s889_s0 + $0x24] ss:$8 sps:$4 sm:$0xff]   ;;  %v706_v26 = vld [vmem:[%s889_s0 + $0x20] ss:$8 sps:$4 sm:$0xff]   ;;  %v710_v28 = vld [vmem:[%s889_s0 + $0x34] ss:$8 sps:$4 sm:$0xff]  }
   0xa   :  { %v713_v25 = vld [vmem:[%s889_s0 + $0x64] ss:$8 sps:$4 sm:$0xff]   ;;  %v715_v27 = vld [vmem:[%s889_s0 + $0x60] ss:$8 sps:$4 sm:$0xff]   ;;  %v716_v29 = vld [vmem:[%s889_s0 + $0x74] ss:$8 sps:$4 sm:$0xff]  }
   0xb   :  { %604 = vmatpush3.bf16.msra.mxu0 %v684_v5  ;;  %673 = vmatpush3.bf16.msra.mxu1 %v684_v5  ;;  %v712_v30 = vld [vmem:[%s889_s0 + $0x30] ss:$8 sps:$4 sm:$0xff]  }
   0xc   :  { %605 = vmatprep.subr.bf16.mxu0 %v685_v6  ;;  %666 = vmatprep.subr.bf16.mxu1 %v685_v6  ;;  %v718_v31 = vld [vmem:[%s889_s0 + $0x70] ss:$8 sps:$4 sm:$0xff]  }
   0xf   :  { %606 = vmatpush3.bf16.msra.mxu0 %v686_v7  ;;  %674 = vmatpush3.bf16.msra.mxu1 %v686_v7 }
  0x10   :  { %607 = vmatprep.subr.bf16.mxu0 %v687_v8  ;;  %667 = vmatprep.subr.bf16.mxu1 %v687_v8 }
  0x13   :  { %608 = vmatpush3.bf16.msra.mxu0 %v688_v9  ;;  %675 = vmatpush3.bf16.msra.mxu1 %v688_v9 }
  0x14   :  { %609 = vmatprep.subr.bf16.mxu0 %v689_v10  ;;  %668 = vmatprep.subr.bf16.mxu1 %v689_v10 }
  0x17   :  { %610 = vmatpush3.bf16.msra.mxu0 %v690_v12  ;;  %676 = vmatpush3.bf16.msra.mxu1 %v690_v12 }
  0x18   :  { %611 = vmatprep.subr.bf16.mxu0 %v691_v14  ;;  %669 = vmatprep.subr.bf16.mxu1 %v691_v14 }
  0x1b   :  { %612 = vmatpush3.bf16.msra.mxu0 %v692_v15  ;;  %677 = vmatpush3.bf16.msra.mxu1 %v692_v15 }
  0x1c   :  { %613 = vmatprep.subr.bf16.mxu0 %v693_v16  ;;  %670 = vmatprep.subr.bf16.mxu1 %v693_v16 }
  0x1f   :  { %614 = vmatpush3.bf16.msra.mxu0 %v694_v17  ;;  %678 = vmatpush3.bf16.msra.mxu1 %v694_v17 }
  0x22   :  { %272 = vmatmul.mubr.bf16.vlgmr.msra.gmra.mrb[0].mxu0 %v695_v18  ;;  %304 = vmatmul.mubr.bf16.vlgmr.msra.gmra.mrb[0].mxu1 %v701_v19 }
  0x23   :  { %279 = vmatprep.mubr.bf16.mxu0 %v698_v20  ;;  %311 = vmatprep.mubr.bf16.mxu1 %v707_v21 }
  0x2a   :  { %280 = vmatmul.mubr.bf16.gmra.mrb[4].mxu0 %v700_v22  ;;  %312 = vmatmul.mubr.bf16.gmra.mrb[4].mxu1 %v709_v23 }
  0x2b   :  { %287 = vmatprep.mubr.bf16.mxu0 %v704_v24  ;;  %319 = vmatprep.mubr.bf16.mxu1 %v713_v25 }
  0x32   :  { %288 = vmatmul.mubr.bf16.gmra.mrb[8].mxu0 %v706_v26  ;;  %320 = vmatmul.mubr.bf16.gmra.mrb[8].mxu1 %v715_v27 }
  0x33   :  { %295 = vmatprep.mubr.bf16.mxu0 %v710_v28  ;;  %327 = vmatprep.mubr.bf16.mxu1 %v716_v29 }
  0x3a   :  { %296 = vmatmul.mubr.bf16.gmra.mrb[12].mxu0 %v712_v30  ;;  %328 = vmatmul.mubr.bf16.gmra.mrb[12].mxu1 %v718_v31 }
  0xf5   :  { %v615_v32 = vpop.f32.mrb[0].mxu0  ;;  %v639_v33 = vpop.f32.mrb[0].mxu1 }
  0xf6   :  { %v616_v34 = vpop.f32.mrb[1].mxu0  ;;  %v640_v35 = vpop.f32.mrb[1].mxu1 }
  0xf7   :  { %v617_v36 = vadd.f32 %v616_v34, %v615_v32  ;;  %v618_v37 = vpop.f32.mrb[2].mxu0  ;;  %v840_v38 = vadd.f32 %v640_v35, %v639_v33  ;;  %v642_v39 = vpop.f32.mrb[2].mxu1 }
  0xf8   :  { %v619_v40 = vpop.f32.mrb[3].mxu0  ;;  %v643_v41 = vpop.f32.mrb[3].mxu1 }
  0xf9   :  { %v620_v42 = vadd.f32 %v619_v40, %v618_v37  ;;  %v842_v43 = vadd.f32 %v643_v41, %v642_v39  ;;  %v437_v44 = vmul.f32 %v617_v36, %v617_v36 }
  0xfb   :  { %v555_v45 = vpack.c.bf16 %v620_v42, %v617_v36  ;;  %v416_v46 = vadd.f32 %v620_v42, %v617_v36  ;;  %v438_v47 = vmul.f32 %v620_v42, %v620_v42  ;;  %v575_v48 = vpack.c.bf16 %v842_v43, %v840_v38 }
  0xfd   :  { %556 = vst [vmem:[%s890_s2] sm:$0xff] %v555_v45   ;;  %v453_v49 = vadd.f32 %v438_v47, %v437_v44  ;;  %v621_v50 = vpop.f32.mrb[4].mxu0  ;;  %595 = vst [vmem:[%s890_s2 + $0x20] sm:$0xff] %v575_v48   ;;  %v645_v51 = vpop.f32.mrb[4].mxu1  ;;  %v445_v47 = vmul.f32 %v840_v38, %v840_v38 }
  0xfe   :  { %v622_v52 = vpop.f32.mrb[5].mxu0  ;;  %v646_v53 = vpop.f32.mrb[5].mxu1 }
  0xff   :  { %v623_v54 = vadd.f32 %v622_v52, %v621_v50  ;;  %v624_v55 = vpop.f32.mrb[6].mxu0  ;;  %v852_v56 = vadd.f32 %v646_v53, %v645_v51  ;;  %v648_v57 = vpop.f32.mrb[6].mxu1  ;;  %v446_v50 = vmul.f32 %v842_v43, %v842_v43 }
 0x100   :  { %v625_v58 = vpop.f32.mrb[7].mxu0  ;;  %v649_v59 = vpop.f32.mrb[7].mxu1 }
 0x101   :  { %v417_v60 = vadd.f32 %v623_v54, %v416_v46  ;;  %v439_v61 = vmul.f32 %v623_v54, %v623_v54  ;;  %v626_v62 = vadd.f32 %v625_v58, %v624_v55  ;;  %v650_v63 = vadd.f32 %v649_v59, %v648_v57 }
 0x102   :  { %v447_v53 = vmul.f32 %v852_v56, %v852_v56 }
 0x103   :  { %v454_v0 = vadd.f32 %v453_v49, %v439_v61  ;;  %v560_v1 = vpack.c.bf16 %v626_v62, %v623_v54  ;;  %v418_v2 = vadd.f32 %v626_v62, %v417_v60  ;;  %v440_v3 = vmul.f32 %v626_v62, %v626_v62 }
 0x104   :  { %v580_v4 = vpack.c.bf16 %v650_v63, %v852_v56  ;;  %v448_v57 = vmul.f32 %v650_v63, %v650_v63 }
 0x105   :  { %592 = vst [vmem:[%s890_s2 + $0x8] sm:$0xff] %v560_v1   ;;  %v455_v5 = vadd.f32 %v454_v0, %v440_v3  ;;  %v627_v6 = vpop.f32.mrb[8].mxu0  ;;  %v651_v7 = vpop.f32.mrb[8].mxu1 }
 0x106   :  { %v628_v8 = vpop.f32.mrb[9].mxu0  ;;  %596 = vst [vmem:[%s890_s2 + $0x28] sm:$0xff] %v580_v4   ;;  %v652_v9 = vpop.f32.mrb[9].mxu1 }
 0x107   :  { %v629_v10 = vadd.f32 %v628_v8, %v627_v6  ;;  %v630_v11 = vpop.f32.mrb[10].mxu0  ;;  %v653_v12 = vadd.f32 %v652_v9, %v651_v7  ;;  %v654_v13 = vpop.f32.mrb[10].mxu1 }
 0x108   :  { %v631_v14 = vpop.f32.mrb[11].mxu0  ;;  %v655_v15 = vpop.f32.mrb[11].mxu1 }
 0x109   :  { %v419_v16 = vadd.f32 %v629_v10, %v418_v2  ;;  %v441_v17 = vmul.f32 %v629_v10, %v629_v10  ;;  %v632_v18 = vadd.f32 %v631_v14, %v630_v11  ;;  %v656_v19 = vadd.f32 %v655_v15, %v654_v13 }
 0x10a   :  { %v449_v60 = vmul.f32 %v653_v12, %v653_v12 }
 0x10b   :  { %v456_v20 = vadd.f32 %v455_v5, %v441_v17  ;;  %v565_v21 = vpack.c.bf16 %v632_v18, %v629_v10  ;;  %v420_v22 = vadd.f32 %v632_v18, %v419_v16  ;;  %v442_v23 = vmul.f32 %v632_v18, %v632_v18 }
 0x10c   :  { %v585_v24 = vpack.c.bf16 %v656_v19, %v653_v12  ;;  %v450_v1 = vmul.f32 %v656_v19, %v656_v19 }
 0x10d   :  { %593 = vst [vmem:[%s890_s2 + $0x10] sm:$0xff] %v565_v21   ;;  %v457_v25 = vadd.f32 %v456_v20, %v442_v23  ;;  %v633_v26 = vpop.f32.mrb[12].mxu0  ;;  %v657_v27 = vpop.f32.mrb[12].mxu1 }
 0x10e   :  { %v634_v28 = vpop.f32.mrb[13].mxu0  ;;  %597 = vst [vmem:[%s890_s2 + $0x30] sm:$0xff] %v585_v24   ;;  %v658_v29 = vpop.f32.mrb[13].mxu1 }
 0x10f   :  { %v635_v30 = vadd.f32 %v634_v28, %v633_v26  ;;  %v636_v31 = vpop.f32.mrb[14].mxu0  ;;  %v659_v32 = vadd.f32 %v658_v29, %v657_v27  ;;  %v660_v33 = vpop.f32.mrb[14].mxu1 }
 0x110   :  { %v637_v34 = vpop.f32.mrb[15].mxu0  ;;  %v661_v35 = vpop.f32.mrb[15].mxu1 }
 0x111   :  { %v421_v36 = vadd.f32 %v635_v30, %v420_v22  ;;  %v443_v37 = vmul.f32 %v635_v30, %v635_v30  ;;  %v638_v39 = vadd.f32 %v637_v34, %v636_v31  ;;  %v662_v40 = vadd.f32 %v661_v35, %v660_v33 }
 0x112   :  { %v451_v2 = vmul.f32 %v659_v32, %v659_v32 }
 0x113   :  { %v458_v41 = vadd.f32 %v457_v25, %v443_v37  ;;  %v570_v42 = vpack.c.bf16 %v638_v39, %v635_v30  ;;  %v422_v44 = vadd.f32 %v638_v39, %v421_v36  ;;  %v444_v45 = vmul.f32 %v638_v39, %v638_v39 }
 0x114   :  { %v590_v46 = vpack.c.bf16 %v662_v40, %v659_v32  ;;  %v452_v6 = vmul.f32 %v662_v40, %v662_v40 }
 0x115   :  { %594 = vst [vmem:[%s890_s2 + $0x18] sm:$0xff] %v570_v42   ;;  %v423_v48 = vadd.f32 %v840_v38, %v422_v44  ;;  %v459_v49 = vadd.f32 %v458_v41, %v444_v45 }
 0x116   :  { %598 = vst [vmem:[%s890_s2 + $0x38] sm:$0xff] %v590_v46  }
 0x117   :  { %v424_v51 = vadd.f32 %v842_v43, %v423_v48  ;;  %v460_v52 = vadd.f32 %v459_v49, %v445_v47 }
 0x119   :  { %v461_v54 = vadd.f32 %v460_v52, %v446_v50  ;;  %v425_v55 = vadd.f32 %v852_v56, %v424_v51 }
 0x11b   :  { %v426_v58 = vadd.f32 %v650_v63, %v425_v55  ;;  %v462_v38 = vadd.f32 %v461_v54, %v447_v53 }
 0x11d   :  { %v427_v59 = vadd.f32 %v653_v12, %v426_v58  ;;  %v463_v61 = vadd.f32 %v462_v38, %v448_v57 }
 0x11f   :  { %v464_v62 = vadd.f32 %v463_v61, %v449_v60  ;;  %v428_v0 = vadd.f32 %v656_v19, %v427_v59 }
 0x121   :  { %v465_v3 = vadd.f32 %v464_v62, %v450_v1  ;;  %v429_v4 = vadd.f32 %v659_v32, %v428_v0 }
 0x123   :  { %v466_v43 = vadd.f32 %v465_v3, %v451_v2  ;;  %v430_v5 = vadd.f32 %v662_v40, %v429_v4 }
 0x125   :  { %v431_v7 = vrot.slane %v430_v5, 4  ;;  %v467_v8 = vadd.f32 %v466_v43, %v452_v6 }
 0x127   :  { %v432_v9 = vadd.f32 %v431_v7, %v430_v5  ;;  %v468_v10 = vrot.slane %v467_v8, 4 }
 0x129   :  { %v433_v56 = vrot.slane %v432_v9, 2  ;;  %v469_v11 = vadd.f32 %v468_v10, %v467_v8 }
 0x12b   :  { %v434_v63 = vadd.f32 %v433_v56, %v432_v9  ;;  %v470_v13 = vrot.slane %v469_v11, 2 }
 0x12d   :  { %v435_v14 = vrot.slane %v434_v63, 1  ;;  %v471_v12 = vadd.f32 %v470_v13, %v469_v11 }
 0x12f   :  { %v436_v15 = vadd.f32 %v435_v14, %v434_v63  ;;  %v472_v16 = vrot.slane %v471_v12, 1 }
 0x131   :  { %v473_v17 = vadd.f32 %v472_v16, %v471_v12  ;;  %474 = vst [vmem:[%s891_s3] sm:$0xff] %v436_v15 }
 0x133   :  { %475 = vst [vmem:[%s892_s4] sm:$0xff] %v473_v17 }

// kernel: discriminator_forward.8
= control target key start
LH: loop header
LB: loop body
LE: loop exit
PB: predicated region body
PF: predicated region fallthrough
CT: control target
= control target key end

     0   :  { %s789_s1 = inlined_call_operand.vmem [shape: bf16[512,128], index: 1, kind: input, shape index: {}]   ;;  %s790_s0 = inlined_call_operand.vmem [shape: bf16[32,512], index: 0, kind: input, shape index: {}]   ;;  %s791_s2 = inlined_call_operand.vmem [shape: bf16[32,128], index: 2, kind: output, shape index: {0}]   ;;  %s792_s3 = inlined_call_operand.vmem [shape: f32[8,128], index: 3, kind: output, shape index: {1}]   ;;  %s793_s4 = inlined_call_operand.vmem [shape: f32[8,128], index: 4, kind: output, shape index: {2}]  }
   0x1   :  { %v588_v0 = vld [vmem:[%s789_s1 + $0x40] sm:$0xff]   ;;  %v592_v4 = vld [vmem:[%s789_s1 + $0x48] sm:$0xff]   ;;  %v596_v8 = vld [vmem:[%s789_s1 + $0x50] sm:$0xff]  }
   0x2   :  { %v589_v1 = vld [vmem:[%s789_s1 + $0xc0] sm:$0xff]   ;;  %532 = vmatprep.subr.bf16.mxu0 %v588_v0  ;;  %v593_v5 = vld [vmem:[%s789_s1 + $0xc8] sm:$0xff]   ;;  %v597_v9 = vld [vmem:[%s789_s1 + $0xd0] sm:$0xff]  }
   0x3   :  { %v590_v2 = vld [vmem:[%s789_s1] sm:$0xff]   ;;  %560 = vmatprep.subr.bf16.mxu1 %v589_v1  ;;  %v594_v6 = vld [vmem:[%s789_s1 + $0x8] sm:$0xff]   ;;  %v598_v10 = vld [vmem:[%s789_s1 + $0x10] sm:$0xff]  }
   0x4   :  { %v591_v3 = vld [vmem:[%s789_s1 + $0x80] sm:$0xff]   ;;  %533 = vmatpush3.bf16.msra.mxu0 %v590_v2  ;;  %v595_v7 = vld [vmem:[%s789_s1 + $0x88] sm:$0xff]   ;;  %v599_v11 = vld [vmem:[%s789_s1 + $0x90] sm:$0xff]  }
   0x5   :  { %561 = vmatpush3.bf16.msra.mxu1 %v591_v3  ;;  %534 = vmatprep.subr.bf16.mxu0 %v592_v4  ;;  %v600_v12 = vld [vmem:[%s789_s1 + $0x58] sm:$0xff]   ;;  %v604_v16 = vld [vmem:[%s789_s1 + $0x60] sm:$0xff]   ;;  %v608_v20 = vld [vmem:[%s789_s1 + $0x68] sm:$0xff]  }
   0x6   :  { %562 = vmatprep.subr.bf16.mxu1 %v593_v5  ;;  %v601_v13 = vld [vmem:[%s789_s1 + $0xd8] sm:$0xff]   ;;  %v605_v17 = vld [vmem:[%s789_s1 + $0xe0] sm:$0xff]   ;;  %v609_v21 = vld [vmem:[%s789_s1 + $0xe8] sm:$0xff]  }
   0x7   :  { %v602_v14 = vld [vmem:[%s789_s1 + $0x18] sm:$0xff]   ;;  %v606_v18 = vld [vmem:[%s789_s1 + $0x20] sm:$0xff]   ;;  %v610_v22 = vld [vmem:[%s789_s1 + $0x28] sm:$0xff]  }
   0x8   :  { %535 = vmatpush3.bf16.msra.mxu0 %v594_v6  ;;  %v603_v15 = vld [vmem:[%s789_s1 + $0x98] sm:$0xff]   ;;  %v607_v19 = vld [vmem:[%s789_s1 + $0xa0] sm:$0xff]   ;;  %v611_v23 = vld [vmem:[%s789_s1 + $0xa8] sm:$0xff]  }
   0x9   :  { %563 = vmatpush3.bf16.msra.mxu1 %v595_v7  ;;  %536 = vmatprep.subr.bf16.mxu0 %v596_v8  ;;  %v612_v24 = vld [vmem:[%s789_s1 + $0x70] sm:$0xff]   ;;  %v616_v28 = vld [vmem:[%s789_s1 + $0x78] sm:$0xff]  }
   0xa   :  { %564 = vmatprep.subr.bf16.mxu1 %v597_v9  ;;  %v613_v25 = vld [vmem:[%s789_s1 + $0xf0] sm:$0xff]   ;;  %v617_v29 = vld [vmem:[%s789_s1 + $0xf8] sm:$0xff]  }
   0xb   :  { %v614_v26 = vld [vmem:[%s789_s1 + $0x30] sm:$0xff]   ;;  %v618_v30 = vld [vmem:[%s789_s1 + $0x38] sm:$0xff]  }
   0xc   :  { %537 = vmatpush3.bf16.msra.mxu0 %v598_v10  ;;  %v615_v27 = vld [vmem:[%s789_s1 + $0xb0] sm:$0xff]   ;;  %v619_v31 = vld [vmem:[%s789_s1 + $0xb8] sm:$0xff]  }
   0xd   :  { %565 = vmatpush3.bf16.msra.mxu1 %v599_v11  ;;  %538 = vmatprep.subr.bf16.mxu0 %v600_v12  ;;  %v620_v32 = vld [vmem:[%s790_s0] ss:$16 sps:$4 sm:$0xff]   ;;  %v622_v33 = vld [vmem:[%s790_s0 + $0x4] ss:$16 sps:$4 sm:$0xff]   ;;  %v623_v34 = vld [vmem:[%s790_s0 + $0x8] ss:$16 sps:$4 sm:$0xff]  }
   0xe   :  { %566 = vmatprep.subr.bf16.mxu1 %v601_v13  ;;  %v625_v35 = vld [vmem:[%s790_s0 + $0xc] ss:$16 sps:$4 sm:$0xff]   ;;  %351 = vmatprep.mubr.bf16.mxu0 %v622_v33  ;;  %v626_v36 = vld [vmem:[%s790_s0 + $0x24] ss:$16 sps:$4 sm:$0xff]   ;;  %v630_v38 = vld [vmem:[%s790_s0 + $0x20] ss:$16 sps:$4 sm:$0xff]  }
   0xf   :  { %400 = vmatprep.mubr.bf16.mxu1 %v625_v35  ;;  %v628_v37 = vld [vmem:[%s790_s0 + $0x2c] ss:$16 sps:$4 sm:$0xff]   ;;  %v631_v39 = vld [vmem:[%s790_s0 + $0x28] ss:$16 sps:$4 sm:$0xff]  }
  0x10   :  { %539 = vmatpush3.bf16.msra.mxu0 %v602_v14 }
  0x11   :  { %567 = vmatpush3.bf16.msra.mxu1 %v603_v15  ;;  %540 = vmatprep.subr.bf16.mxu0 %v604_v16 }
  0x12   :  { %568 = vmatprep.subr.bf16.mxu1 %v605_v17 }
  0x14   :  { %541 = vmatpush3.bf16.msra.mxu0 %v606_v18 }
  0x15   :  { %569 = vmatpush3.bf16.msra.mxu1 %v607_v19  ;;  %542 = vmatprep.subr.bf16.mxu0 %v608_v20 }
  0x16   :  { %570 = vmatprep.subr.bf16.mxu1 %v609_v21 }
  0x18   :  { %543 = vmatpush3.bf16.msra.mxu0 %v610_v22 }
  0x19   :  { %571 = vmatpush3.bf16.msra.mxu1 %v611_v23  ;;  %544 = vmatprep.subr.bf16.mxu0 %v612_v24 }
  0x1a   :  { %572 = vmatprep.subr.bf16.mxu1 %v613_v25 }
  0x1c   :  { %545 = vmatpush3.bf16.msra.mxu0 %v614_v26 }
  0x1d   :  { %573 = vmatpush3.bf16.msra.mxu1 %v615_v27  ;;  %546 = vmatprep.subr.bf16.mxu0 %v616_v28 }
  0x1e   :  { %574 = vmatprep.subr.bf16.mxu1 %v617_v29 }
  0x20   :  { %547 = vmatpush3.bf16.msra.mxu0 %v618_v30 }
  0x21   :  { %575 = vmatpush3.bf16.msra.mxu1 %v619_v31 }
  0x23   :  { %352 = vmatmul.mubr.bf16.vlgmr.msra.gmra.mrb[0].mxu0 %v620_v32 }
  0x24   :  { %401 = vmatmul.mubr.bf16.vlgmr.msra.gmra.mrb[0].mxu1 %v623_v34  ;;  %359 = vmatprep.mubr.bf16.mxu0 %v626_v36 }
  0x25   :  { %408 = vmatprep.mubr.bf16.mxu1 %v628_v37 }
  0x2b   :  { %360 = vmatmul.mubr.bf16.gmra.mrb[4].mxu0 %v630_v38 }
  0x2c   :  { %409 = vmatmul.mubr.bf16.gmra.mrb[4].mxu1 %v631_v39 }
  0xf6   :  { %v548_v40 = vpop.f32.mrb[0].mxu0 }
  0xf7   :  { %v576_v41 = vpop.f32.mrb[0].mxu1  ;;  %v549_v42 = vpop.f32.mrb[1].mxu0 }
  0xf8   :  { %v550_v43 = vadd.f32 %v549_v42, %v548_v40  ;;  %v577_v44 = vpop.f32.mrb[1].mxu1  ;;  %v551_v45 = vpop.f32.mrb[2].mxu0 }
  0xf9   :  { %v578_v46 = vadd.f32 %v577_v44, %v576_v41  ;;  %v579_v47 = vpop.f32.mrb[2].mxu1  ;;  %v552_v48 = vpop.f32.mrb[3].mxu0 }
  0xfa   :  { %v553_v49 = vadd.f32 %v552_v48, %v551_v45  ;;  %v580_v50 = vpop.f32.mrb[3].mxu1 }
  0xfb   :  { %v403_v51 = vadd.f32 %v578_v46, %v550_v43  ;;  %v581_v52 = vadd.f32 %v580_v50, %v579_v47 }
  0xfd   :  { %v406_v53 = vadd.f32 %v581_v52, %v553_v49  ;;  %v446_v55 = vmul.f32 %v403_v51, %v403_v51 }
  0xfe   :  { %v554_v54 = vpop.f32.mrb[4].mxu0 }
  0xff   :  { %v524_v56 = vpack.c.bf16 %v406_v53, %v403_v51  ;;  %v437_v57 = vadd.f32 %v406_v53, %v403_v51  ;;  %v447_v58 = vmul.f32 %v406_v53, %v406_v53  ;;  %v582_v59 = vpop.f32.mrb[4].mxu1  ;;  %v555_v60 = vpop.f32.mrb[5].mxu0 }
 0x100   :  { %v556_v61 = vadd.f32 %v555_v60, %v554_v54  ;;  %v583_v62 = vpop.f32.mrb[5].mxu1  ;;  %v557_v63 = vpop.f32.mrb[6].mxu0 }
 0x101   :  { %525 = vst [vmem:[%s791_s2] sm:$0xff] %v524_v56   ;;  %v450_v0 = vadd.f32 %v447_v58, %v446_v55  ;;  %v584_v1 = vadd.f32 %v583_v62, %v582_v59  ;;  %v585_v2 = vpop.f32.mrb[6].mxu1  ;;  %v558_v3 = vpop.f32.mrb[7].mxu0 }
 0x102   :  { %v559_v4 = vadd.f32 %v558_v3, %v557_v63  ;;  %v586_v5 = vpop.f32.mrb[7].mxu1 }
 0x103   :  { %v411_v6 = vadd.f32 %v584_v1, %v556_v61  ;;  %v587_v7 = vadd.f32 %v586_v5, %v585_v2 }
 0x105   :  { %v438_v8 = vadd.f32 %v437_v57, %v411_v6  ;;  %v448_v9 = vmul.f32 %v411_v6, %v411_v6  ;;  %v414_v10 = vadd.f32 %v587_v7, %v559_v4 }
 0x107   :  { %v451_v11 = vadd.f32 %v450_v0, %v448_v9  ;;  %v529_v12 = vpack.c.bf16 %v414_v10, %v411_v6  ;;  %v439_v13 = vadd.f32 %v438_v8, %v414_v10  ;;  %v449_v14 = vmul.f32 %v414_v10, %v414_v10 }
 0x109   :  { %531 = vst [vmem:[%s791_s2 + $0x8] sm:$0xff] %v529_v12   ;;  %v440_v15 = vrot.slane %v439_v13, 4  ;;  %v452_v16 = vadd.f32 %v451_v11, %v449_v14 }
 0x10b   :  { %v441_v17 = vadd.f32 %v440_v15, %v439_v13  ;;  %v453_v18 = vrot.slane %v452_v16, 4 }
 0x10d   :  { %v442_v19 = vrot.slane %v441_v17, 2  ;;  %v454_v20 = vadd.f32 %v453_v18, %v452_v16 }
 0x10f   :  { %v443_v21 = vadd.f32 %v442_v19, %v441_v17  ;;  %v455_v22 = vrot.slane %v454_v20, 2 }
 0x111   :  { %v444_v23 = vrot.slane %v443_v21, 1  ;;  %v456_v24 = vadd.f32 %v455_v22, %v454_v20 }
 0x113   :  { %v445_v25 = vadd.f32 %v444_v23, %v443_v21  ;;  %v457_v26 = vrot.slane %v456_v24, 1 }
 0x115   :  { %v458_v27 = vadd.f32 %v457_v26, %v456_v24  ;;  %459 = vst [vmem:[%s792_s3] sm:$0xff] %v445_v25 }
 0x117   :  { %460 = vst [vmem:[%s793_s4] sm:$0xff] %v458_v27 }

// kernel: discriminator_forward.9
= control target key start
LH: loop header
LB: loop body
LE: loop exit
PB: predicated region body
PF: predicated region fallthrough
CT: control target
= control target key end

     0   :  { %s1186_s1 = inlined_call_operand.vmem [shape: bf16[1024,128], index: 1, kind: input, shape index: {}]   ;;  %s1187_s0 = inlined_call_operand.vmem [shape: bf16[8,1024], index: 0, kind: input, shape index: {}]   ;;  %s1188_s2 = inlined_call_operand.vmem [shape: f32[8,128], index: 2, kind: output, shape index: {}]  }
   0x1   :  { %v888_v0 = vld [vmem:[%s1186_s1 + $0x40] sm:$0xff]   ;;  %v892_v4 = vld [vmem:[%s1186_s1 + $0x48] sm:$0xff]   ;;  %v896_v8 = vld [vmem:[%s1186_s1 + $0x50] sm:$0xff]  }
   0x2   :  { %v889_v1 = vld [vmem:[%s1186_s1 + $0xc0] sm:$0xff]   ;;  %800 = vmatprep.subr.bf16.mxu0 %v888_v0  ;;  %v893_v5 = vld [vmem:[%s1186_s1 + $0xc8] sm:$0xff]   ;;  %v897_v9 = vld [vmem:[%s1186_s1 + $0xd0] sm:$0xff]  }
   0x3   :  { %v890_v2 = vld [vmem:[%s1186_s1] sm:$0xff]   ;;  %822 = vmatprep.subr.bf16.mxu1 %v889_v1  ;;  %v894_v6 = vld [vmem:[%s1186_s1 + $0x8] sm:$0xff]   ;;  %v898_v10 = vld [vmem:[%s1186_s1 + $0x10] sm:$0xff]  }
   0x4   :  { %v891_v3 = vld [vmem:[%s1186_s1 + $0x80] sm:$0xff]   ;;  %801 = vmatpush3.bf16.msra.mxu0 %v890_v2  ;;  %v895_v7 = vld [vmem:[%s1186_s1 + $0x88] sm:$0xff]   ;;  %v899_v11 = vld [vmem:[%s1186_s1 + $0x90] sm:$0xff]  }
   0x5   :  { %823 = vmatpush3.bf16.msra.mxu1 %v891_v3  ;;  %802 = vmatprep.subr.bf16.mxu0 %v892_v4  ;;  %v900_v12 = vld [vmem:[%s1186_s1 + $0x58] sm:$0xff]   ;;  %v904_v16 = vld [vmem:[%s1186_s1 + $0x60] sm:$0xff]   ;;  %v908_v20 = vld [vmem:[%s1186_s1 + $0x68] sm:$0xff]  }
   0x6   :  { %824 = vmatprep.subr.bf16.mxu1 %v893_v5  ;;  %v901_v13 = vld [vmem:[%s1186_s1 + $0xd8] sm:$0xff]   ;;  %v905_v17 = vld [vmem:[%s1186_s1 + $0xe0] sm:$0xff]   ;;  %v909_v21 = vld [vmem:[%s1186_s1 + $0xe8] sm:$0xff]  }
   0x7   :  { %v902_v14 = vld [vmem:[%s1186_s1 + $0x18] sm:$0xff]   ;;  %v906_v18 = vld [vmem:[%s1186_s1 + $0x20] sm:$0xff]   ;;  %v910_v22 = vld [vmem:[%s1186_s1 + $0x28] sm:$0xff]  }
   0x8   :  { %803 = vmatpush3.bf16.msra.mxu0 %v894_v6  ;;  %v903_v15 = vld [vmem:[%s1186_s1 + $0x98] sm:$0xff]   ;;  %v907_v19 = vld [vmem:[%s1186_s1 + $0xa0] sm:$0xff]   ;;  %v911_v23 = vld [vmem:[%s1186_s1 + $0xa8] sm:$0xff]  }
   0x9   :  { %825 = vmatpush3.bf16.msra.mxu1 %v895_v7  ;;  %804 = vmatprep.subr.bf16.mxu0 %v896_v8  ;;  %v912_v24 = vld [vmem:[%s1186_s1 + $0x70] sm:$0xff]   ;;  %v916_v28 = vld [vmem:[%s1186_s1 + $0x78] sm:$0xff]   ;;  %v12_v32 = vld [vmem:[%s1187_s0] sm:$0xff] }
   0xa   :  { %826 = vmatprep.subr.bf16.mxu1 %v897_v9  ;;  %v913_v25 = vld [vmem:[%s1186_s1 + $0xf0] sm:$0xff]   ;;  %v917_v29 = vld [vmem:[%s1186_s1 + $0xf8] sm:$0xff]   ;;  %v13_v33 = vld [vmem:[%s1187_s0 + $0x8] sm:$0xff]  ;;  %v727_v34 = vcombine.low %v12_v32, %v12_v32  ;;  %v728_v35 = vcombine.high %v12_v32, %v12_v32 }
   0xb   :  { %v914_v26 = vld [vmem:[%s1186_s1 + $0x30] sm:$0xff]   ;;  %v918_v30 = vld [vmem:[%s1186_s1 + $0x38] sm:$0xff]   ;;  %v729_v36 = vcombine.low %v13_v33, %v13_v33  ;;  %v730_v37 = vcombine.high %v13_v33, %v13_v33  ;;  %v924_v38 = vld [vmem:[%s1186_s1 + $0x140] sm:$0xff]  }
   0xc   :  { %805 = vmatpush3.bf16.msra.mxu0 %v898_v10  ;;  %v915_v27 = vld [vmem:[%s1186_s1 + $0xb0] sm:$0xff]   ;;  %v919_v31 = vld [vmem:[%s1186_s1 + $0xb8] sm:$0xff]   ;;  %v925_v39 = vld [vmem:[%s1186_s1 + $0x1c0] sm:$0xff]   ;;  %588 = vmatprep.mubr.bf16.mxu0 %v728_v35 }
   0xd   :  { %827 = vmatpush3.bf16.msra.mxu1 %v899_v11  ;;  %806 = vmatprep.subr.bf16.mxu0 %v900_v12  ;;  %v926_v40 = vld [vmem:[%s1186_s1 + $0x100] sm:$0xff]   ;;  %v928_v42 = vld [vmem:[%s1186_s1 + $0x148] sm:$0xff]   ;;  %v932_v46 = vld [vmem:[%s1186_s1 + $0x150] sm:$0xff]  }
   0xe   :  { %828 = vmatprep.subr.bf16.mxu1 %v901_v13  ;;  %628 = vmatprep.mubr.bf16.mxu1 %v730_v37  ;;  %v927_v41 = vld [vmem:[%s1186_s1 + $0x180] sm:$0xff]   ;;  %v929_v43 = vld [vmem:[%s1186_s1 + $0x1c8] sm:$0xff]   ;;  %v933_v47 = vld [vmem:[%s1186_s1 + $0x1d0] sm:$0xff]  }
   0xf   :  { %v930_v44 = vld [vmem:[%s1186_s1 + $0x108] sm:$0xff]   ;;  %v934_v48 = vld [vmem:[%s1186_s1 + $0x110] sm:$0xff]   ;;  %v936_v50 = vld [vmem:[%s1186_s1 + $0x158] sm:$0xff]  }
  0x10   :  { %807 = vmatpush3.bf16.msra.mxu0 %v902_v14  ;;  %v931_v45 = vld [vmem:[%s1186_s1 + $0x188] sm:$0xff]   ;;  %v935_v49 = vld [vmem:[%s1186_s1 + $0x190] sm:$0xff]   ;;  %v937_v51 = vld [vmem:[%s1186_s1 + $0x1d8] sm:$0xff]  }
  0x11   :  { %829 = vmatpush3.bf16.msra.mxu1 %v903_v15  ;;  %808 = vmatprep.subr.bf16.mxu0 %v904_v16  ;;  %v938_v52 = vld [vmem:[%s1186_s1 + $0x118] sm:$0xff]   ;;  %v940_v54 = vld [vmem:[%s1186_s1 + $0x160] sm:$0xff]   ;;  %v944_v58 = vld [vmem:[%s1186_s1 + $0x168] sm:$0xff]  }
  0x12   :  { %830 = vmatprep.subr.bf16.mxu1 %v905_v17  ;;  %v939_v53 = vld [vmem:[%s1186_s1 + $0x198] sm:$0xff]   ;;  %v941_v55 = vld [vmem:[%s1186_s1 + $0x1e0] sm:$0xff]   ;;  %v945_v59 = vld [vmem:[%s1186_s1 + $0x1e8] sm:$0xff]  }
  0x13   :  { %v942_v56 = vld [vmem:[%s1186_s1 + $0x120] sm:$0xff]   ;;  %v946_v60 = vld [vmem:[%s1186_s1 + $0x128] sm:$0xff]   ;;  %v948_v62 = vld [vmem:[%s1186_s1 + $0x170] sm:$0xff]  }
  0x14   :  { %809 = vmatpush3.bf16.msra.mxu0 %v906_v18  ;;  %v943_v57 = vld [vmem:[%s1186_s1 + $0x1a0] sm:$0xff]   ;;  %v947_v61 = vld [vmem:[%s1186_s1 + $0x1a8] sm:$0xff]   ;;  %v949_v63 = vld [vmem:[%s1186_s1 + $0x1f0] sm:$0xff]  }
  0x15   :  { %831 = vmatpush3.bf16.msra.mxu1 %v907_v19  ;;  %810 = vmatprep.subr.bf16.mxu0 %v908_v20  ;;  %v950_v0 = vld [vmem:[%s1186_s1 + $0x130] sm:$0xff]   ;;  %v952_v2 = vld [vmem:[%s1186_s1 + $0x178] sm:$0xff]  }
  0x16   :  { %832 = vmatprep.subr.bf16.mxu1 %v909_v21  ;;  %v951_v1 = vld [vmem:[%s1186_s1 + $0x1b0] sm:$0xff]   ;;  %v953_v3 = vld [vmem:[%s1186_s1 + $0x1f8] sm:$0xff]  }
  0x17   :  { %v954_v4 = vld [vmem:[%s1186_s1 + $0x138] sm:$0xff]   ;;  %v14_v6 = vld [vmem:[%s1187_s0 + $0x10] sm:$0xff] }
  0x18   :  { %811 = vmatpush3.bf16.msra.mxu0 %v910_v22  ;;  %v955_v5 = vld [vmem:[%s1186_s1 + $0x1b8] sm:$0xff]   ;;  %v731_v7 = vcombine.low %v14_v6, %v14_v6  ;;  %v732_v8 = vcombine.high %v14_v6, %v14_v6 }
  0x19   :  { %833 = vmatpush3.bf16.msra.mxu1 %v911_v23  ;;  %812 = vmatprep.subr.bf16.mxu0 %v912_v24  ;;  %v15_v9 = vld [vmem:[%s1187_s0 + $0x18] sm:$0xff] }
  0x1a   :  { %834 = vmatprep.subr.bf16.mxu1 %v913_v25  ;;  %v733_v10 = vcombine.low %v15_v9, %v15_v9  ;;  %v734_v11 = vcombine.high %v15_v9, %v15_v9 }
  0x1c   :  { %813 = vmatpush3.bf16.msra.mxu0 %v914_v26 }
  0x1d   :  { %835 = vmatpush3.bf16.msra.mxu1 %v915_v27  ;;  %814 = vmatprep.subr.bf16.mxu0 %v916_v28 }
  0x1e   :  { %836 = vmatprep.subr.bf16.mxu1 %v917_v29 }
  0x20   :  { %815 = vmatpush3.bf16.msra.mxu0 %v918_v30 }
  0x21   :  { %837 = vmatpush3.bf16.msra.mxu1 %v919_v31  ;;  %844 = vmatprep.subr.bf16.mxu0 %v924_v38 }
  0x22   :  { %866 = vmatprep.subr.bf16.mxu1 %v925_v39 }
  0x23   :  { %589 = vmatmul.mubr.bf16.vlgmr.msra.gmra.mrb[0].mxu0 %v727_v34 }
  0x24   :  { %629 = vmatmul.mubr.bf16.vlgmr.msra.gmra.mrb[0].mxu1 %v729_v36  ;;  %845 = vmatpush3.bf16.msra.mxu0 %v926_v40 }
  0x25   :  { %867 = vmatpush3.bf16.msra.mxu1 %v927_v41  ;;  %846 = vmatprep.subr.bf16.mxu0 %v928_v42 }
  0x26   :  { %868 = vmatprep.subr.bf16.mxu1 %v929_v43  ;;  %668 = vmatprep.mubr.bf16.mxu0 %v732_v8 }
  0x27   :  { %708 = vmatprep.mubr.bf16.mxu1 %v734_v11 }
  0x28   :  { %847 = vmatpush3.bf16.msra.mxu0 %v930_v44 }
  0x29   :  { %869 = vmatpush3.bf16.msra.mxu1 %v931_v45  ;;  %848 = vmatprep.subr.bf16.mxu0 %v932_v46 }
  0x2a   :  { %870 = vmatprep.subr.bf16.mxu1 %v933_v47 }
  0x2c   :  { %849 = vmatpush3.bf16.msra.mxu0 %v934_v48 }
  0x2d   :  { %871 = vmatpush3.bf16.msra.mxu1 %v935_v49  ;;  %850 = vmatprep.subr.bf16.mxu0 %v936_v50 }
  0x2e   :  { %872 = vmatprep.subr.bf16.mxu1 %v937_v51 }
  0x30   :  { %851 = vmatpush3.bf16.msra.mxu0 %v938_v52 }
  0x31   :  { %873 = vmatpush3.bf16.msra.mxu1 %v939_v53  ;;  %852 = vmatprep.subr.bf16.mxu0 %v940_v54 }
  0x32   :  { %874 = vmatprep.subr.bf16.mxu1 %v941_v55 }
  0x34   :  { %853 = vmatpush3.bf16.msra.mxu0 %v942_v56 }
  0x35   :  { %875 = vmatpush3.bf16.msra.mxu1 %v943_v57  ;;  %854 = vmatprep.subr.bf16.mxu0 %v944_v58 }
  0x36   :  { %876 = vmatprep.subr.bf16.mxu1 %v945_v59 }
  0x38   :  { %855 = vmatpush3.bf16.msra.mxu0 %v946_v60 }
  0x39   :  { %877 = vmatpush3.bf16.msra.mxu1 %v947_v61  ;;  %856 = vmatprep.subr.bf16.mxu0 %v948_v62 }
  0x3a   :  { %878 = vmatprep.subr.bf16.mxu1 %v949_v63 }
  0x3c   :  { %857 = vmatpush3.bf16.msra.mxu0 %v950_v0 }
  0x3d   :  { %879 = vmatpush3.bf16.msra.mxu1 %v951_v1  ;;  %858 = vmatprep.subr.bf16.mxu0 %v952_v2 }
  0x3e   :  { %880 = vmatprep.subr.bf16.mxu1 %v953_v3 }
  0x40   :  { %859 = vmatpush3.bf16.msra.mxu0 %v954_v4 }
  0x41   :  { %881 = vmatpush3.bf16.msra.mxu1 %v955_v5 }
  0x43   :  { %669 = vmatmul.mubr.bf16.vlgmr.msra.gmra.mrb[4].mxu0 %v731_v7 }
  0x44   :  { %709 = vmatmul.mubr.bf16.vlgmr.msra.gmra.mrb[4].mxu1 %v733_v10 }
  0xf6   :  { %v816_v12 = vpop.f32.mrb[0].mxu0 }
  0xf7   :  { %v838_v13 = vpop.f32.mrb[0].mxu1  ;;  %v817_v14 = vpop.f32.mrb[1].mxu0 }
  0xf8   :  { %v839_v15 = vpop.f32.mrb[1].mxu1  ;;  %v818_v16 = vadd.f32 %v817_v14, %v816_v12  ;;  %v819_v18 = vpop.f32.mrb[2].mxu0 }
  0xf9   :  { %v840_v17 = vadd.f32 %v839_v15, %v838_v13  ;;  %v841_v19 = vpop.f32.mrb[2].mxu1  ;;  %v820_v20 = vpop.f32.mrb[3].mxu0 }
  0xfa   :  { %v842_v21 = vpop.f32.mrb[3].mxu1 }
  0xfb   :  { %v631_v22 = vadd.f32 %v840_v17, %v818_v16 }
 0x116   :  { %v860_v23 = vpop.f32.mrb[4].mxu0 }
 0x117   :  { %v882_v24 = vpop.f32.mrb[4].mxu1  ;;  %v861_v25 = vpop.f32.mrb[5].mxu0 }
 0x118   :  { %v883_v26 = vpop.f32.mrb[5].mxu1  ;;  %v862_v27 = vadd.f32 %v861_v25, %v860_v23  ;;  %v863_v29 = vpop.f32.mrb[6].mxu0 }
 0x119   :  { %v884_v28 = vadd.f32 %v883_v26, %v882_v24  ;;  %v885_v30 = vpop.f32.mrb[6].mxu1  ;;  %v864_v31 = vpop.f32.mrb[7].mxu0 }
 0x11a   :  { %v886_v32 = vpop.f32.mrb[7].mxu1  ;;  %v671_v33 = vadd.f32 %v862_v27, %v631_v22 }
 0x11c   :  { %v711_v34 = vadd.f32 %v884_v28, %v671_v33 }
 0x11e   :  { %v799_v35 = vmul.f32 -1.442695, %v711_v34 }
 0x120   :  { %960 = vpow2.f32 %v799_v35 }
 0x12a   :  { %v961_v36 = vpop.eup %960 }
 0x12b   :  { %v719_v37 = vadd.f32 1.0, %v961_v36 }
 0x12d   :  { %962 = vrcp.f32 %v719_v37 }
 0x137   :  { %v963_v38 = vpop.eup %962 }
 0x138   :  { %722 = vst [vmem:[%s1188_s2] sm:$0xff] %v963_v38 }

</bundles_post_ra>
